<compile_context>
chip_gen: v7x
topology: tpu7x:2x2x1
jax: 0.10.0
libtpu: 0.0.40
codegen_flags: <defaults>
</compile_context>

<pallas_src>
import functools

import jax
import jax.numpy as jnp
from jax import lax
from jax.experimental import pallas as pl
from jax.experimental.pallas import tpu as pltpu


# ----------------------------------------------------------------------------
# Kernel: one grid step = one batch element, both convs + residual fused.
# ----------------------------------------------------------------------------
def _rcu_kernel(H, W, C,
                x_ref,                   # (1, H, W, C)   f32
                w1_ref, b1_ref,          # (9C, C) bf16, (1, C) f32
                w2_ref, b2_ref,          # (9C, C) bf16, (1, C) f32
                o_ref,                   # (1, H, W, C)   f32
                pad_ref,                 # scratch (H+2, W+2, C) f32
                col_ref):                # scratch (H, W, 9C)    f32
    f32 = jnp.float32
    S = H * W

    # Zero only the 1-element halo border (interior is fully overwritten below).
    pad_ref[0:1, :, :] = jnp.zeros((1, W + 2, C), f32)
    pad_ref[H + 1:H + 2, :, :] = jnp.zeros((1, W + 2, C), f32)
    pad_ref[1:H + 1, 0:1, :] = jnp.zeros((H, 1, C), f32)
    pad_ref[1:H + 1, W + 1:W + 2, :] = jnp.zeros((H, 1, C), f32)

    def conv3x3(act_hwc, w_ref, b_ref):
        """'same' 3x3 conv with bias; act_hwc (H, W, C) f32 -> (S, C) f32."""
        # Stage activation into the padded scratch interior (border stays zero).
        pad_ref[1:H + 1, 1:W + 1, :] = act_hwc
        # Fused im2col: 9 shifted tap windows packed along channels -> one matmul.
        for ky in range(3):
            for kx in range(3):
                t = ky * 3 + kx
                col_ref[:, :, t * C:(t + 1) * C] = pad_ref[ky:ky + H, kx:kx + W, :]
        patches = col_ref[...].reshape(S, 9 * C).astype(jnp.bfloat16)
        y = jnp.dot(patches, w_ref[...], preferred_element_type=f32)   # (S, C)
        return y + b_ref[...]

    # ReLU -> Conv1 -> ReLU -> Conv2
    h = jnp.maximum(x_ref[0].astype(f32), 0.0)                 # (H, W, C)
    h = conv3x3(h, w1_ref, b1_ref)                             # (S, C)
    h = jnp.maximum(h, 0.0).reshape(H, W, C)
    h = conv3x3(h, w2_ref, b2_ref)                             # (S, C)

    # Residual add (re-load x_ref here rather than keeping it live through both convs).
    o_ref[0] = (h.reshape(H, W, C) + x_ref[0].astype(f32)).astype(o_ref.dtype)


# ----------------------------------------------------------------------------
# Wrapper (NCHW in / NCHW out, PyTorch convention)
# ----------------------------------------------------------------------------
@jax.jit
def residual_conv_unit(x_nchw, params):
    """x_nchw: (N, C, H, W) f32.  params = (w1, b1, w2, b2):
       w*: (9*C, C) bf16 (HWIO-reshaped), b*: (1, C) f32."""
    N, C, H, W = x_nchw.shape
    w1, b1, w2, b2 = params

    x_nhwc = jnp.transpose(x_nchw, (0, 2, 3, 1))               # NCHW -> NHWC (once)

    kernel = functools.partial(_rcu_kernel, H, W, C)
    const2 = lambda n: (0, 0)                                  # grid-invariant params

    out_nhwc = pl.pallas_call(
        kernel,
        out_shape=jax.ShapeDtypeStruct((N, H, W, C), x_nchw.dtype),
        grid_spec=pltpu.PrefetchScalarGridSpec(
            num_scalar_prefetch=0,
            grid=(N,),
            in_specs=[
                pl.BlockSpec((1, H, W, C), lambda n: (n, 0, 0, 0)),   # x
                pl.BlockSpec((9 * C, C), const2),                     # w1 (bf16)
                pl.BlockSpec((1, C), const2),                         # b1
                pl.BlockSpec((9 * C, C), const2),                     # w2 (bf16)
                pl.BlockSpec((1, C), const2),                         # b2
            ],
            out_specs=pl.BlockSpec((1, H, W, C), lambda n: (n, 0, 0, 0)),
            scratch_shapes=[
                pltpu.VMEM((H + 2, W + 2, C), jnp.float32),           # padded act
                pltpu.VMEM((H, W, 9 * C), jnp.float32),               # im2col buffer
            ],
        ),
        compiler_params=pltpu.CompilerParams(
            dimension_semantics=("parallel",),        # shards batch across TCs (v7x)
            vmem_limit_bytes=32 * 1024 * 1024,        # explicit budget, safe on v5e/v6e/v7x
        ),
    )(x_nhwc, w1, b1, w2, b2)

    return jnp.transpose(out_nhwc, (0, 3, 1, 2))               # NHWC -> NCHW


# ----------------------------------------------------------------------------
# Pure-JAX reference (same bf16-rounded weights; activations kept in f32)
# ----------------------------------------------------------------------------
def reference(x_nchw, w1_hwio, b1, w2_hwio, b2):
    x = jnp.transpose(x_nchw, (0, 2, 3, 1))                    # NHWC
    dn = ("NHWC", "HWIO", "NHWC")
    pad = [(1, 1), (1, 1)]
    h = jnp.maximum(x, 0.0)
    h = lax.conv_general_dilated(h, w1_hwio, (1, 1), pad, dimension_numbers=dn) + b1
    h = jnp.maximum(h, 0.0)
    h = lax.conv_general_dilated(h, w2_hwio, (1, 1), pad, dimension_numbers=dn) + b2
    out = h + x
    return jnp.transpose(out, (0, 3, 1, 2))


if __name__ == "__main__":
    key = jax.random.PRNGKey(0)
    kx, kw1, kb1, kw2, kb2 = jax.random.split(key, 5)

    N, C, H, W = 2, 4, 16, 16
    x = jax.random.normal(kx, (N, C, H, W), jnp.float32)

    # Synthetic Conv2d weights in HWIO; kernel consumes the (9C, C) bf16 reshape
    # with K ordered (ky, kx, c_in) to match the im2col tap packing.
    w1_hwio = 0.1 * jax.random.normal(kw1, (3, 3, C, C), jnp.float32)
    w2_hwio = 0.1 * jax.random.normal(kw2, (3, 3, C, C), jnp.float32)
    b1 = 0.1 * jax.random.normal(kb1, (C,), jnp.float32)
    b2 = 0.1 * jax.random.normal(kb2, (C,), jnp.float32)

    w1_bf = w1_hwio.reshape(9 * C, C).astype(jnp.bfloat16)
    w2_bf = w2_hwio.reshape(9 * C, C).astype(jnp.bfloat16)
    params = (w1_bf, b1.reshape(1, C), w2_bf, b2.reshape(1, C))

    out = residual_conv_unit(x, params)
    out = jax.block_until_ready(out)

    ref = reference(x,
                    w1_bf.astype(jnp.float32).reshape(3, 3, C, C), b1,
                    w2_bf.astype(jnp.float32).reshape(3, 3, C, C), b2)

    assert out.shape == (N, C, H, W)
    err = jnp.max(jnp.abs(out - ref))
    # Tolerance covers the in-kernel bf16 activation cast (weights share rounding).
    assert jnp.allclose(out, ref, atol=2e-2, rtol=2e-2), f"max err {err}"
    print("KERNEL_OK")
</pallas_src>

<mosaic_0001>
module attributes {stable_mosaic.version = 11 : i64} {
  func.func @_rcu_kernel(%arg0: i32, %arg1: memref<1x16x16x4xf32, #tpu.memory_space<vmem>>, %arg2: memref<36x4xbf16, #tpu.memory_space<vmem>>, %arg3: memref<1x4xf32, #tpu.memory_space<vmem>>, %arg4: memref<36x4xbf16, #tpu.memory_space<vmem>>, %arg5: memref<1x4xf32, #tpu.memory_space<vmem>>, %arg6: memref<1x16x16x4xf32, #tpu.memory_space<vmem>>, %arg7: memref<18x18x4xf32, #tpu.memory_space<vmem>>, %arg8: memref<16x16x36xf32, #tpu.memory_space<vmem>>) attributes {dimension_semantics = [#tpu.dimension_semantics<parallel>], iteration_bounds = array<i64: 2>, scalar_prefetch = 0 : i64, scratch_operands = 2 : i64, tpu.core_type = #tpu.core_type<tc>, window_params = [{transform_indices = @transform_0, window_bounds = array<i64: 1, 16, 16, 4>}, {pipeline_mode = #tpu.pipeline_mode<synchronous>, transform_indices = @transform_1, window_bounds = array<i64: 36, 4>}, {pipeline_mode = #tpu.pipeline_mode<synchronous>, transform_indices = @transform_2, window_bounds = array<i64: 1, 4>}, {pipeline_mode = #tpu.pipeline_mode<synchronous>, transform_indices = @transform_3, window_bounds = array<i64: 36, 4>}, {pipeline_mode = #tpu.pipeline_mode<synchronous>, transform_indices = @transform_4, window_bounds = array<i64: 1, 4>}, {transform_indices = @transform_5, window_bounds = array<i64: 1, 16, 16, 4>}]} {
    %cst = arith.constant 0.000000e+00 : f32
    %0 = vector.broadcast %cst : f32 to vector<1x18x4xf32>
    %c0 = arith.constant 0 : index
    %c0_0 = arith.constant 0 : index
    %c0_1 = arith.constant 0 : index
    %1 = vector.load %arg7[%c0, %c0_0, %c0_1] : memref<18x18x4xf32, #tpu.memory_space<vmem>>, vector<1x18x4xf32>
    tpu.vector_store %arg7[%c0, %c0_0, %c0_1], %0 {strides = array<i32>} : memref<18x18x4xf32, #tpu.memory_space<vmem>>, vector<1x18x4xf32>,
    %cst_2 = arith.constant 0.000000e+00 : f32
    %2 = vector.broadcast %cst_2 : f32 to vector<1x18x4xf32>
    %c17 = arith.constant 17 : index
    %c0_3 = arith.constant 0 : index
    %c0_4 = arith.constant 0 : index
    %3 = vector.load %arg7[%c17, %c0_3, %c0_4] : memref<18x18x4xf32, #tpu.memory_space<vmem>>, vector<1x18x4xf32>
    tpu.vector_store %arg7[%c17, %c0_3, %c0_4], %2 {strides = array<i32>} : memref<18x18x4xf32, #tpu.memory_space<vmem>>, vector<1x18x4xf32>,
    %cst_5 = arith.constant 0.000000e+00 : f32
    %4 = vector.broadcast %cst_5 : f32 to vector<16x1x4xf32>
    %c1 = arith.constant 1 : index
    %c0_6 = arith.constant 0 : index
    %c0_7 = arith.constant 0 : index
    %5 = vector.load %arg7[%c1, %c0_6, %c0_7] : memref<18x18x4xf32, #tpu.memory_space<vmem>>, vector<16x1x4xf32>
    tpu.vector_store %arg7[%c1, %c0_6, %c0_7], %4 {strides = array<i32>} : memref<18x18x4xf32, #tpu.memory_space<vmem>>, vector<16x1x4xf32>,
    %cst_8 = arith.constant 0.000000e+00 : f32
    %6 = vector.broadcast %cst_8 : f32 to vector<16x1x4xf32>
    %c1_9 = arith.constant 1 : index
    %c17_10 = arith.constant 17 : index
    %c0_11 = arith.constant 0 : index
    %7 = vector.load %arg7[%c1_9, %c17_10, %c0_11] : memref<18x18x4xf32, #tpu.memory_space<vmem>>, vector<16x1x4xf32>
    tpu.vector_store %arg7[%c1_9, %c17_10, %c0_11], %6 {strides = array<i32>} : memref<18x18x4xf32, #tpu.memory_space<vmem>>, vector<16x1x4xf32>,
    %c0_12 = arith.constant 0 : index
    %c0_13 = arith.constant 0 : index
    %c0_14 = arith.constant 0 : index
    %c0_15 = arith.constant 0 : index
    %8 = vector.load %arg1[%c0_12, %c0_13, %c0_14, %c0_15] : memref<1x16x16x4xf32, #tpu.memory_space<vmem>>, vector<1x16x16x4xf32>
    %9 = vector.shape_cast %8 : vector<1x16x16x4xf32> to vector<16x16x4xf32>
    %cst_16 = arith.constant 0.000000e+00 : f32
    %10 = vector.broadcast %cst_16 : f32 to vector<16x16x4xf32>
    %11 = arith.maximumf %9, %10 : vector<16x16x4xf32>
    %c1_17 = arith.constant 1 : index
    %c1_18 = arith.constant 1 : index
    %c0_19 = arith.constant 0 : index
    %12 = vector.load %arg7[%c1_17, %c1_18, %c0_19] : memref<18x18x4xf32, #tpu.memory_space<vmem>>, vector<16x16x4xf32>
    tpu.vector_store %arg7[%c1_17, %c1_18, %c0_19], %11 {strides = array<i32>} : memref<18x18x4xf32, #tpu.memory_space<vmem>>, vector<16x16x4xf32>,
    %c0_20 = arith.constant 0 : index
    %c0_21 = arith.constant 0 : index
    %c0_22 = arith.constant 0 : index
    %13 = vector.load %arg7[%c0_20, %c0_21, %c0_22] : memref<18x18x4xf32, #tpu.memory_space<vmem>>, vector<16x16x4xf32>
    %c0_23 = arith.constant 0 : index
    %c0_24 = arith.constant 0 : index
    %c0_25 = arith.constant 0 : index
    %14 = vector.load %arg8[%c0_23, %c0_24, %c0_25] : memref<16x16x36xf32, #tpu.memory_space<vmem>>, vector<16x16x4xf32>
    tpu.vector_store %arg8[%c0_23, %c0_24, %c0_25], %13 {strides = array<i32>} : memref<16x16x36xf32, #tpu.memory_space<vmem>>, vector<16x16x4xf32>,
    %c0_26 = arith.constant 0 : index
    %c1_27 = arith.constant 1 : index
    %c0_28 = arith.constant 0 : index
    %15 = vector.load %arg7[%c0_26, %c1_27, %c0_28] : memref<18x18x4xf32, #tpu.memory_space<vmem>>, vector<16x16x4xf32>
    %c0_29 = arith.constant 0 : index
    %c0_30 = arith.constant 0 : index
    %c4 = arith.constant 4 : index
    %16 = vector.load %arg8[%c0_29, %c0_30, %c4] : memref<16x16x36xf32, #tpu.memory_space<vmem>>, vector<16x16x4xf32>
    tpu.vector_store %arg8[%c0_29, %c0_30, %c4], %15 {strides = array<i32>} : memref<16x16x36xf32, #tpu.memory_space<vmem>>, vector<16x16x4xf32>,
    %c0_31 = arith.constant 0 : index
    %c2 = arith.constant 2 : index
    %c0_32 = arith.constant 0 : index
    %17 = vector.load %arg7[%c0_31, %c2, %c0_32] : memref<18x18x4xf32, #tpu.memory_space<vmem>>, vector<16x16x4xf32>
    %c0_33 = arith.constant 0 : index
    %c0_34 = arith.constant 0 : index
    %c8 = arith.constant 8 : index
    %18 = vector.load %arg8[%c0_33, %c0_34, %c8] : memref<16x16x36xf32, #tpu.memory_space<vmem>>, vector<16x16x4xf32>
    tpu.vector_store %arg8[%c0_33, %c0_34, %c8], %17 {strides = array<i32>} : memref<16x16x36xf32, #tpu.memory_space<vmem>>, vector<16x16x4xf32>,
    %c1_35 = arith.constant 1 : index
    %c0_36 = arith.constant 0 : index
    %c0_37 = arith.constant 0 : index
    %19 = vector.load %arg7[%c1_35, %c0_36, %c0_37] : memref<18x18x4xf32, #tpu.memory_space<vmem>>, vector<16x16x4xf32>
    %c0_38 = arith.constant 0 : index
    %c0_39 = arith.constant 0 : index
    %c12 = arith.constant 12 : index
    %20 = vector.load %arg8[%c0_38, %c0_39, %c12] : memref<16x16x36xf32, #tpu.memory_space<vmem>>, vector<16x16x4xf32>
    tpu.vector_store %arg8[%c0_38, %c0_39, %c12], %19 {strides = array<i32>} : memref<16x16x36xf32, #tpu.memory_space<vmem>>, vector<16x16x4xf32>,
    %c1_40 = arith.constant 1 : index
    %c1_41 = arith.constant 1 : index
    %c0_42 = arith.constant 0 : index
    %21 = vector.load %arg7[%c1_40, %c1_41, %c0_42] : memref<18x18x4xf32, #tpu.memory_space<vmem>>, vector<16x16x4xf32>
    %c0_43 = arith.constant 0 : index
    %c0_44 = arith.constant 0 : index
    %c16 = arith.constant 16 : index
    %22 = vector.load %arg8[%c0_43, %c0_44, %c16] : memref<16x16x36xf32, #tpu.memory_space<vmem>>, vector<16x16x4xf32>
    tpu.vector_store %arg8[%c0_43, %c0_44, %c16], %21 {strides = array<i32>} : memref<16x16x36xf32, #tpu.memory_space<vmem>>, vector<16x16x4xf32>,
    %c1_45 = arith.constant 1 : index
    %c2_46 = arith.constant 2 : index
    %c0_47 = arith.constant 0 : index
    %23 = vector.load %arg7[%c1_45, %c2_46, %c0_47] : memref<18x18x4xf32, #tpu.memory_space<vmem>>, vector<16x16x4xf32>
    %c0_48 = arith.constant 0 : index
    %c0_49 = arith.constant 0 : index
    %c20 = arith.constant 20 : index
    %24 = vector.load %arg8[%c0_48, %c0_49, %c20] : memref<16x16x36xf32, #tpu.memory_space<vmem>>, vector<16x16x4xf32>
    tpu.vector_store %arg8[%c0_48, %c0_49, %c20], %23 {strides = array<i32>} : memref<16x16x36xf32, #tpu.memory_space<vmem>>, vector<16x16x4xf32>,
    %c2_50 = arith.constant 2 : index
    %c0_51 = arith.constant 0 : index
    %c0_52 = arith.constant 0 : index
    %25 = vector.load %arg7[%c2_50, %c0_51, %c0_52] : memref<18x18x4xf32, #tpu.memory_space<vmem>>, vector<16x16x4xf32>
    %c0_53 = arith.constant 0 : index
    %c0_54 = arith.constant 0 : index
    %c24 = arith.constant 24 : index
    %26 = vector.load %arg8[%c0_53, %c0_54, %c24] : memref<16x16x36xf32, #tpu.memory_space<vmem>>, vector<16x16x4xf32>
    tpu.vector_store %arg8[%c0_53, %c0_54, %c24], %25 {strides = array<i32>} : memref<16x16x36xf32, #tpu.memory_space<vmem>>, vector<16x16x4xf32>,
    %c2_55 = arith.constant 2 : index
    %c1_56 = arith.constant 1 : index
    %c0_57 = arith.constant 0 : index
    %27 = vector.load %arg7[%c2_55, %c1_56, %c0_57] : memref<18x18x4xf32, #tpu.memory_space<vmem>>, vector<16x16x4xf32>
    %c0_58 = arith.constant 0 : index
    %c0_59 = arith.constant 0 : index
    %c28 = arith.constant 28 : index
    %28 = vector.load %arg8[%c0_58, %c0_59, %c28] : memref<16x16x36xf32, #tpu.memory_space<vmem>>, vector<16x16x4xf32>
    tpu.vector_store %arg8[%c0_58, %c0_59, %c28], %27 {strides = array<i32>} : memref<16x16x36xf32, #tpu.memory_space<vmem>>, vector<16x16x4xf32>,
    %c2_60 = arith.constant 2 : index
    %c2_61 = arith.constant 2 : index
    %c0_62 = arith.constant 0 : index
    %29 = vector.load %arg7[%c2_60, %c2_61, %c0_62] : memref<18x18x4xf32, #tpu.memory_space<vmem>>, vector<16x16x4xf32>
    %c0_63 = arith.constant 0 : index
    %c0_64 = arith.constant 0 : index
    %c32 = arith.constant 32 : index
    %30 = vector.load %arg8[%c0_63, %c0_64, %c32] : memref<16x16x36xf32, #tpu.memory_space<vmem>>, vector<16x16x4xf32>
    tpu.vector_store %arg8[%c0_63, %c0_64, %c32], %29 {strides = array<i32>} : memref<16x16x36xf32, #tpu.memory_space<vmem>>, vector<16x16x4xf32>,
    %c0_65 = arith.constant 0 : index
    %c0_66 = arith.constant 0 : index
    %c0_67 = arith.constant 0 : index
    %31 = vector.load %arg8[%c0_65, %c0_66, %c0_67] : memref<16x16x36xf32, #tpu.memory_space<vmem>>, vector<16x16x36xf32>
    %32 = vector.shape_cast %31 : vector<16x16x36xf32> to vector<256x36xf32>
    %33 = arith.truncf %32 : vector<256x36xf32> to vector<256x36xbf16>
    %c0_68 = arith.constant 0 : index
    %c0_69 = arith.constant 0 : index
    %34 = vector.load %arg2[%c0_68, %c0_69] : memref<36x4xbf16, #tpu.memory_space<vmem>>, vector<36x4xbf16>
    %cst_70 = arith.constant dense<0.000000e+00> : vector<256x4xf32>
    %35 = tpu.matmul %33, %34, %cst_70 {dimension_numbers = #tpu.dot_dimension_numbers<[1], [0], [0], [1], [0, 0, 1, 1], [], []>} : vector<256x36xbf16>, vector<36x4xbf16>, vector<256x4xf32> -> vector<256x4xf32>
    %c0_71 = arith.constant 0 : index
    %c0_72 = arith.constant 0 : index
    %36 = vector.load %arg3[%c0_71, %c0_72] : memref<1x4xf32, #tpu.memory_space<vmem>>, vector<1x4xf32>
    %37 = vector.broadcast %36 : vector<1x4xf32> to vector<256x4xf32>
    %38 = arith.addf %35, %37 : vector<256x4xf32>
    %cst_73 = arith.constant 0.000000e+00 : f32
    %39 = vector.broadcast %cst_73 : f32 to vector<256x4xf32>
    %40 = arith.maximumf %38, %39 : vector<256x4xf32>
    %41 = vector.shape_cast %40 : vector<256x4xf32> to vector<16x16x4xf32>
    %c1_74 = arith.constant 1 : index
    %c1_75 = arith.constant 1 : index
    %c0_76 = arith.constant 0 : index
    %42 = vector.load %arg7[%c1_74, %c1_75, %c0_76] : memref<18x18x4xf32, #tpu.memory_space<vmem>>, vector<16x16x4xf32>
    tpu.vector_store %arg7[%c1_74, %c1_75, %c0_76], %41 {strides = array<i32>} : memref<18x18x4xf32, #tpu.memory_space<vmem>>, vector<16x16x4xf32>,
    %c0_77 = arith.constant 0 : index
    %c0_78 = arith.constant 0 : index
    %c0_79 = arith.constant 0 : index
    %43 = vector.load %arg7[%c0_77, %c0_78, %c0_79] : memref<18x18x4xf32, #tpu.memory_space<vmem>>, vector<16x16x4xf32>
    %c0_80 = arith.constant 0 : index
    %c0_81 = arith.constant 0 : index
    %c0_82 = arith.constant 0 : index
    %44 = vector.load %arg8[%c0_80, %c0_81, %c0_82] : memref<16x16x36xf32, #tpu.memory_space<vmem>>, vector<16x16x4xf32>
    tpu.vector_store %arg8[%c0_80, %c0_81, %c0_82], %43 {strides = array<i32>} : memref<16x16x36xf32, #tpu.memory_space<vmem>>, vector<16x16x4xf32>,
    %c0_83 = arith.constant 0 : index
    %c1_84 = arith.constant 1 : index
    %c0_85 = arith.constant 0 : index
    %45 = vector.load %arg7[%c0_83, %c1_84, %c0_85] : memref<18x18x4xf32, #tpu.memory_space<vmem>>, vector<16x16x4xf32>
    %c0_86 = arith.constant 0 : index
    %c0_87 = arith.constant 0 : index
    %c4_88 = arith.constant 4 : index
    %46 = vector.load %arg8[%c0_86, %c0_87, %c4_88] : memref<16x16x36xf32, #tpu.memory_space<vmem>>, vector<16x16x4xf32>
    tpu.vector_store %arg8[%c0_86, %c0_87, %c4_88], %45 {strides = array<i32>} : memref<16x16x36xf32, #tpu.memory_space<vmem>>, vector<16x16x4xf32>,
    %c0_89 = arith.constant 0 : index
    %c2_90 = arith.constant 2 : index
    %c0_91 = arith.constant 0 : index
    %47 = vector.load %arg7[%c0_89, %c2_90, %c0_91] : memref<18x18x4xf32, #tpu.memory_space<vmem>>, vector<16x16x4xf32>
    %c0_92 = arith.constant 0 : index
    %c0_93 = arith.constant 0 : index
    %c8_94 = arith.constant 8 : index
    %48 = vector.load %arg8[%c0_92, %c0_93, %c8_94] : memref<16x16x36xf32, #tpu.memory_space<vmem>>, vector<16x16x4xf32>
    tpu.vector_store %arg8[%c0_92, %c0_93, %c8_94], %47 {strides = array<i32>} : memref<16x16x36xf32, #tpu.memory_space<vmem>>, vector<16x16x4xf32>,
    %c1_95 = arith.constant 1 : index
    %c0_96 = arith.constant 0 : index
    %c0_97 = arith.constant 0 : index
    %49 = vector.load %arg7[%c1_95, %c0_96, %c0_97] : memref<18x18x4xf32, #tpu.memory_space<vmem>>, vector<16x16x4xf32>
    %c0_98 = arith.constant 0 : index
    %c0_99 = arith.constant 0 : index
    %c12_100 = arith.constant 12 : index
    %50 = vector.load %arg8[%c0_98, %c0_99, %c12_100] : memref<16x16x36xf32, #tpu.memory_space<vmem>>, vector<16x16x4xf32>
    tpu.vector_store %arg8[%c0_98, %c0_99, %c12_100], %49 {strides = array<i32>} : memref<16x16x36xf32, #tpu.memory_space<vmem>>, vector<16x16x4xf32>,
    %c1_101 = arith.constant 1 : index
    %c1_102 = arith.constant 1 : index
    %c0_103 = arith.constant 0 : index
    %51 = vector.load %arg7[%c1_101, %c1_102, %c0_103] : memref<18x18x4xf32, #tpu.memory_space<vmem>>, vector<16x16x4xf32>
    %c0_104 = arith.constant 0 : index
    %c0_105 = arith.constant 0 : index
    %c16_106 = arith.constant 16 : index
    %52 = vector.load %arg8[%c0_104, %c0_105, %c16_106] : memref<16x16x36xf32, #tpu.memory_space<vmem>>, vector<16x16x4xf32>
    tpu.vector_store %arg8[%c0_104, %c0_105, %c16_106], %51 {strides = array<i32>} : memref<16x16x36xf32, #tpu.memory_space<vmem>>, vector<16x16x4xf32>,
    %c1_107 = arith.constant 1 : index
    %c2_108 = arith.constant 2 : index
    %c0_109 = arith.constant 0 : index
    %53 = vector.load %arg7[%c1_107, %c2_108, %c0_109] : memref<18x18x4xf32, #tpu.memory_space<vmem>>, vector<16x16x4xf32>
    %c0_110 = arith.constant 0 : index
    %c0_111 = arith.constant 0 : index
    %c20_112 = arith.constant 20 : index
    %54 = vector.load %arg8[%c0_110, %c0_111, %c20_112] : memref<16x16x36xf32, #tpu.memory_space<vmem>>, vector<16x16x4xf32>
    tpu.vector_store %arg8[%c0_110, %c0_111, %c20_112], %53 {strides = array<i32>} : memref<16x16x36xf32, #tpu.memory_space<vmem>>, vector<16x16x4xf32>,
    %c2_113 = arith.constant 2 : index
    %c0_114 = arith.constant 0 : index
    %c0_115 = arith.constant 0 : index
    %55 = vector.load %arg7[%c2_113, %c0_114, %c0_115] : memref<18x18x4xf32, #tpu.memory_space<vmem>>, vector<16x16x4xf32>
    %c0_116 = arith.constant 0 : index
    %c0_117 = arith.constant 0 : index
    %c24_118 = arith.constant 24 : index
    %56 = vector.load %arg8[%c0_116, %c0_117, %c24_118] : memref<16x16x36xf32, #tpu.memory_space<vmem>>, vector<16x16x4xf32>
    tpu.vector_store %arg8[%c0_116, %c0_117, %c24_118], %55 {strides = array<i32>} : memref<16x16x36xf32, #tpu.memory_space<vmem>>, vector<16x16x4xf32>,
    %c2_119 = arith.constant 2 : index
    %c1_120 = arith.constant 1 : index
    %c0_121 = arith.constant 0 : index
    %57 = vector.load %arg7[%c2_119, %c1_120, %c0_121] : memref<18x18x4xf32, #tpu.memory_space<vmem>>, vector<16x16x4xf32>
    %c0_122 = arith.constant 0 : index
    %c0_123 = arith.constant 0 : index
    %c28_124 = arith.constant 28 : index
    %58 = vector.load %arg8[%c0_122, %c0_123, %c28_124] : memref<16x16x36xf32, #tpu.memory_space<vmem>>, vector<16x16x4xf32>
    tpu.vector_store %arg8[%c0_122, %c0_123, %c28_124], %57 {strides = array<i32>} : memref<16x16x36xf32, #tpu.memory_space<vmem>>, vector<16x16x4xf32>,
    %c2_125 = arith.constant 2 : index
    %c2_126 = arith.constant 2 : index
    %c0_127 = arith.constant 0 : index
    %59 = vector.load %arg7[%c2_125, %c2_126, %c0_127] : memref<18x18x4xf32, #tpu.memory_space<vmem>>, vector<16x16x4xf32>
    %c0_128 = arith.constant 0 : index
    %c0_129 = arith.constant 0 : index
    %c32_130 = arith.constant 32 : index
    %60 = vector.load %arg8[%c0_128, %c0_129, %c32_130] : memref<16x16x36xf32, #tpu.memory_space<vmem>>, vector<16x16x4xf32>
    tpu.vector_store %arg8[%c0_128, %c0_129, %c32_130], %59 {strides = array<i32>} : memref<16x16x36xf32, #tpu.memory_space<vmem>>, vector<16x16x4xf32>,
    %c0_131 = arith.constant 0 : index
    %c0_132 = arith.constant 0 : index
    %c0_133 = arith.constant 0 : index
    %61 = vector.load %arg8[%c0_131, %c0_132, %c0_133] : memref<16x16x36xf32, #tpu.memory_space<vmem>>, vector<16x16x36xf32>
    %62 = vector.shape_cast %61 : vector<16x16x36xf32> to vector<256x36xf32>
    %63 = arith.truncf %62 : vector<256x36xf32> to vector<256x36xbf16>
    %c0_134 = arith.constant 0 : index
    %c0_135 = arith.constant 0 : index
    %64 = vector.load %arg4[%c0_134, %c0_135] : memref<36x4xbf16, #tpu.memory_space<vmem>>, vector<36x4xbf16>
    %cst_136 = arith.constant dense<0.000000e+00> : vector<256x4xf32>
    %65 = tpu.matmul %63, %64, %cst_136 {dimension_numbers = #tpu.dot_dimension_numbers<[1], [0], [0], [1], [0, 0, 1, 1], [], []>} : vector<256x36xbf16>, vector<36x4xbf16>, vector<256x4xf32> -> vector<256x4xf32>
    %c0_137 = arith.constant 0 : index
    %c0_138 = arith.constant 0 : index
    %66 = vector.load %arg5[%c0_137, %c0_138] : memref<1x4xf32, #tpu.memory_space<vmem>>, vector<1x4xf32>
    %67 = vector.broadcast %66 : vector<1x4xf32> to vector<256x4xf32>
    %68 = arith.addf %65, %67 : vector<256x4xf32>
    %69 = vector.shape_cast %68 : vector<256x4xf32> to vector<16x16x4xf32>
    %c0_139 = arith.constant 0 : index
    %c0_140 = arith.constant 0 : index
    %c0_141 = arith.constant 0 : index
    %c0_142 = arith.constant 0 : index
    %70 = vector.load %arg1[%c0_139, %c0_140, %c0_141, %c0_142] : memref<1x16x16x4xf32, #tpu.memory_space<vmem>>, vector<1x16x16x4xf32>
    %71 = vector.shape_cast %70 : vector<1x16x16x4xf32> to vector<16x16x4xf32>
    %72 = arith.addf %69, %71 : vector<16x16x4xf32>
    %c0_143 = arith.constant 0 : index
    %c0_144 = arith.constant 0 : index
    %c0_145 = arith.constant 0 : index
    %c0_146 = arith.constant 0 : index
    %73 = vector.load %arg6[%c0_143, %c0_144, %c0_145, %c0_146] : memref<1x16x16x4xf32, #tpu.memory_space<vmem>>, vector<1x16x16x4xf32>
    %74 = vector.shape_cast %73 : vector<1x16x16x4xf32> to vector<16x16x4xf32>
    %75 = vector.shape_cast %72 : vector<16x16x4xf32> to vector<1x16x16x4xf32>
    tpu.vector_store %arg6[%c0_143, %c0_144, %c0_145, %c0_146], %75 {strides = array<i32>} : memref<1x16x16x4xf32, #tpu.memory_space<vmem>>, vector<1x16x16x4xf32>,
    return
  }
  func.func @transform_0(%arg0: i32) -> (i32, i32, i32, i32) {
    %c0_i32 = arith.constant 0 : i32
    %c0_i32_0 = arith.constant 0 : i32
    %c0_i32_1 = arith.constant 0 : i32
    %c0_i32_2 = arith.constant 0 : i32
    return %arg0, %c0_i32, %c0_i32_0, %c0_i32_1 : i32, i32, i32, i32
  }
  func.func @transform_1(%arg0: i32) -> (i32, i32) {
    %c0_i32 = arith.constant 0 : i32
    %c0_i32_0 = arith.constant 0 : i32
    %c0_i32_1 = arith.constant 0 : i32
    return %c0_i32, %c0_i32_0 : i32, i32
  }
  func.func @transform_2(%arg0: i32) -> (i32, i32) {
    %c0_i32 = arith.constant 0 : i32
    %c0_i32_0 = arith.constant 0 : i32
    %c0_i32_1 = arith.constant 0 : i32
    return %c0_i32, %c0_i32_0 : i32, i32
  }
  func.func @transform_3(%arg0: i32) -> (i32, i32) {
    %c0_i32 = arith.constant 0 : i32
    %c0_i32_0 = arith.constant 0 : i32
    %c0_i32_1 = arith.constant 0 : i32
    return %c0_i32, %c0_i32_0 : i32, i32
  }
  func.func @transform_4(%arg0: i32) -> (i32, i32) {
    %c0_i32 = arith.constant 0 : i32
    %c0_i32_0 = arith.constant 0 : i32
    %c0_i32_1 = arith.constant 0 : i32
    return %c0_i32, %c0_i32_0 : i32, i32
  }
  func.func @transform_5(%arg0: i32) -> (i32, i32, i32, i32) {
    %c0_i32 = arith.constant 0 : i32
    %c0_i32_0 = arith.constant 0 : i32
    %c0_i32_1 = arith.constant 0 : i32
    %c0_i32_2 = arith.constant 0 : i32
    return %arg0, %c0_i32, %c0_i32_0, %c0_i32_1 : i32, i32, i32, i32
  }
}

</mosaic_0001>

<bundles_post_ra>
// kernel: residual_conv_unit.1
= control target key start
LH: loop header
LB: loop body
LE: loop exit
PB: predicated region body
PF: predicated region fallthrough
CT: control target
= control target key end

     0   :  { %s4604_s18 = smov 0   ;;  %s6757_s0 = inlined_call_operand.vmem [shape: f32[2,16,16,4], index: 0, kind: input, shape index: {}]   ;;  %s6758_s1 = inlined_call_operand.vmem [shape: bf16[36,4], index: 1, kind: input, shape index: {}]   ;;  %s6759_s2 = inlined_call_operand.vmem [shape: f32[1,4], index: 2, kind: input, shape index: {}]   ;;  %s6760_s3 = inlined_call_operand.vmem [shape: bf16[36,4], index: 3, kind: input, shape index: {}]   ;;  %s6761_s4 = inlined_call_operand.vmem [shape: f32[1,4], index: 4, kind: input, shape index: {}]   ;;  %s6762_s5 = inlined_call_operand.vmem [shape: f32[2,16,16,4], index: 5, kind: output, shape index: {}]  }
   0x1 LB: > { %s4365_s19 = sadd.s32 4294967295, %s4563_s18   ;;  %p4369_p0 = scmp.ge.s32.totalorder %s4563_s18, 1  ;;  %s4563_s18 = sphi %s4604_s18, %s15_s18  }
   0x2   : > { %p187_p1 = scmp.lt.s32.totalorder %s4563_s18, 3 }
   0x4   : > { %p188_p2 = pnand %p4369_p0, %p187_p1 }
   0x6   : > { %191 = sbr.rel (%p188_p2) target bundleno = 1696 (0x6a0), region = 40 }
   0xd   : > { %vm226_vm0 = vcmask 31744   ;;  %vm229_vm1 = vcmask 25600   ;;  %p4614_p3 = scmp.lt.s32.totalorder %s4365_s19, 1  ;;  %vm236_vm2 = vcmask 24576   ;;  %v4565_v0 = vmov 0.0   ;;  %s4566_s25 = smov 4  }
   0xe   : > { %227 = vst.msk [vmem:[#allocation2] sm:$0xff] %vm226_vm0, %v4565_v0  ;;  %228 = vst.msk [vmem:[#allocation2 + $0x8] sm:$0xff] %vm226_vm0, %v4565_v0  ;;  %s4567_s26 = smov 8   ;;  %vm589_vm3 = vcmask 64544   ;;  %s4568_s27 = smov 12   ;;  %vm782_vm4 = vcmask 97344  }
   0xf   : > { %232 = vst.msk [vmem:[#allocation2 + $0x198] sm:$0xff] %vm226_vm0, %v4565_v0  ;;  %233 = vst.msk [vmem:[#allocation2 + $0x1a0] sm:$0xff] %vm226_vm0, %v4565_v0  ;;  %s6855_s19 = smov (!%p4614_p3, %s4365_s19), 1  ;;  %s4569_s28 = smov 16   ;;  %vm975_vm5 = vcmask 130144   ;;  %vm1168_vm6 = vcmask 162944  }
  0x10   : > { %230 = vst.msk [vmem:[#allocation2 + $0x10] sm:$0x3] %vm229_vm1, %v4565_v0  ;;  %234 = vst.msk [vmem:[#allocation2 + $0x1a8] sm:$0x3] %vm229_vm1, %v4565_v0  ;;  %s4416_s21 = sshll.u32 %s6855_s19, 8  ;;  %s4570_s29 = smov 20  }
  0x11   : > { %253 = vst.msk [vmem:[#allocation2 + $0x29] sm:$0x1] %vm236_vm2, %v4565_v0  ;;  %237 = vst.msk [vmem:[#allocation2 + $0x18] sm:$0x1] %vm236_vm2, %v4565_v0  ;;  %s4666_s24 = scalar_lea.vmem %s6757_s0, %s4416_s21  ;;  %s4571_s30 = smov 24   ;;  %vm1361_vm7 = vcmask 195744  }
  0x12   : > { %238 = vst.msk [vmem:[#allocation2 + $0x30] sm:$0x1] %vm236_vm2, %v4565_v0  ;;  %239 = vst.msk [vmem:[#allocation2 + $0x48] sm:$0x1] %vm236_vm2, %v4565_v0  ;;  %v269_v1 = vld [vmem:[%s4666_s24] sm:$0xff]  ;;  %v271_v2 = vld [vmem:[%s4666_s24 + $0x10] sm:$0xff] }
  0x13   : > { %240 = vst.msk [vmem:[#allocation2 + $0x60] sm:$0x1] %vm236_vm2, %v4565_v0  ;;  %241 = vst.msk [vmem:[#allocation2 + $0x78] sm:$0x1] %vm236_vm2, %v4565_v0  ;;  %v270_v3 = vld [vmem:[%s4666_s24 + $0x8] sm:$0xff]  ;;  %v301_v4 = vmax.f32 %v269_v1, 0.0 }
  0x14   : > { %242 = vst.msk [vmem:[#allocation2 + $0x90] sm:$0x1] %vm236_vm2, %v4565_v0  ;;  %243 = vst.msk [vmem:[#allocation2 + $0xa8] sm:$0x1] %vm236_vm2, %v4565_v0  ;;  %v303_v5 = vmax.f32 %v271_v2, 0.0  ;;  %v302_v6 = vmax.f32 %v270_v3, 0.0 }
  0x15   : > { %244 = vst.msk [vmem:[#allocation2 + $0xc0] sm:$0x1] %vm236_vm2, %v4565_v0  ;;  %245 = vst.msk [vmem:[#allocation2 + $0xd8] sm:$0x1] %vm236_vm2, %v4565_v0  ;;  %v273_v7 = vld [vmem:[%s4666_s24 + $0x20] sm:$0xff]  ;;  %v272_v8 = vld [vmem:[%s4666_s24 + $0x18] sm:$0xff] }
  0x16   : > { %246 = vst.msk [vmem:[#allocation2 + $0xf0] sm:$0x1] %vm236_vm2, %v4565_v0  ;;  %247 = vst.msk [vmem:[#allocation2 + $0x108] sm:$0x1] %vm236_vm2, %v4565_v0  ;;  %v275_v9 = vld [vmem:[%s4666_s24 + $0x30] sm:$0xff]  ;;  %v429_v10 = vld [vmem:[#allocation2 + $0x1] sm:$0xff] }
  0x17   : > { %248 = vst.msk [vmem:[#allocation2 + $0x120] sm:$0x1] %vm236_vm2, %v4565_v0  ;;  %249 = vst.msk [vmem:[#allocation2 + $0x138] sm:$0x1] %vm236_vm2, %v4565_v0  ;;  %v430_v11 = vld [vmem:[#allocation2 + $0x9] sm:$0xff]  ;;  %v305_v12 = vmax.f32 %v273_v7, 0.0  ;;  %493 = vrot.lane.b32.xlu0 %v429_v10, %s4566_s25 }
  0x18   : > { %250 = vst.msk [vmem:[#allocation2 + $0x150] sm:$0x1] %vm236_vm2, %v4565_v0  ;;  %251 = vst.msk [vmem:[#allocation2 + $0x168] sm:$0x1] %vm236_vm2, %v4565_v0  ;;  %v304_v13 = vmax.f32 %v272_v8, 0.0  ;;  %v307_v14 = vmax.f32 %v275_v9, 0.0 }
  0x19   : > { %252 = vst.msk [vmem:[#allocation2 + $0x180] sm:$0x1] %vm236_vm2, %v4565_v0  ;;  %254 = vst.msk [vmem:[#allocation2 + $0x41] sm:$0x1] %vm236_vm2, %v4565_v0  ;;  %v274_v15 = vld [vmem:[%s4666_s24 + $0x28] sm:$0xff]  ;;  %v277_v17 = vld [vmem:[%s4666_s24 + $0x40] sm:$0xff] }
  0x1a   : > { %255 = vst.msk [vmem:[#allocation2 + $0x59] sm:$0x1] %vm236_vm2, %v4565_v0  ;;  %256 = vst.msk [vmem:[#allocation2 + $0x71] sm:$0x1] %vm236_vm2, %v4565_v0  ;;  %v306_v16 = vmax.f32 %v274_v15, 0.0  ;;  %v276_v18 = vld [vmem:[%s4666_s24 + $0x38] sm:$0xff] }
  0x1b   : > { %257 = vst.msk [vmem:[#allocation2 + $0x89] sm:$0x1] %vm236_vm2, %v4565_v0  ;;  %258 = vst.msk [vmem:[#allocation2 + $0xa1] sm:$0x1] %vm236_vm2, %v4565_v0  ;;  %v279_v19 = vld [vmem:[%s4666_s24 + $0x50] sm:$0xff]  ;;  %v309_v20 = vmax.f32 %v277_v17, 0.0  ;;  %495 = vrot.lane.b32.xlu0 %v430_v11, %s4566_s25 }
  0x1c   : > { %259 = vst.msk [vmem:[#allocation2 + $0xb9] sm:$0x1] %vm236_vm2, %v4565_v0  ;;  %260 = vst.msk [vmem:[#allocation2 + $0xd1] sm:$0x1] %vm236_vm2, %v4565_v0  ;;  %v308_v21 = vmax.f32 %v276_v18, 0.0  ;;  %v311_v22 = vmax.f32 %v279_v19, 0.0 }
  0x1d   : > { %261 = vst.msk [vmem:[#allocation2 + $0xe9] sm:$0x1] %vm236_vm2, %v4565_v0  ;;  %262 = vst.msk [vmem:[#allocation2 + $0x101] sm:$0x1] %vm236_vm2, %v4565_v0  ;;  %v278_v23 = vld [vmem:[%s4666_s24 + $0x48] sm:$0xff]  ;;  %v281_v24 = vld [vmem:[%s4666_s24 + $0x60] sm:$0xff] }
  0x1e   : > { %263 = vst.msk [vmem:[#allocation2 + $0x119] sm:$0x1] %vm236_vm2, %v4565_v0  ;;  %264 = vst.msk [vmem:[#allocation2 + $0x131] sm:$0x1] %vm236_vm2, %v4565_v0  ;;  %v280_v25 = vld [vmem:[%s4666_s24 + $0x58] sm:$0xff]  ;;  %v310_v26 = vmax.f32 %v278_v23, 0.0 }
  0x1f   : > { %265 = vst.msk [vmem:[#allocation2 + $0x149] sm:$0x1] %vm236_vm2, %v4565_v0  ;;  %266 = vst.msk [vmem:[#allocation2 + $0x161] sm:$0x1] %vm236_vm2, %v4565_v0  ;;  %v313_v27 = vmax.f32 %v281_v24, 0.0  ;;  %v312_v28 = vmax.f32 %v280_v25, 0.0 }
  0x20   : > { %267 = vst.msk [vmem:[#allocation2 + $0x179] sm:$0x1] %vm236_vm2, %v4565_v0  ;;  %268 = vst.msk [vmem:[#allocation2 + $0x191] sm:$0x1] %vm236_vm2, %v4565_v0  ;;  %v283_v29 = vld [vmem:[%s4666_s24 + $0x70] sm:$0xff]  ;;  %v282_v30 = vld [vmem:[%s4666_s24 + $0x68] sm:$0xff] }
  0x21   : > { %333 = vst.msk [vmem:[#allocation2 + $0x19] sm:$0xff] %vm226_vm0, %v301_v4  ;;  %335 = vst.msk [vmem:[#allocation2 + $0x31] sm:$0xff] %vm226_vm0, %v303_v5  ;;  %v285_v31 = vld [vmem:[%s4666_s24 + $0x80] sm:$0xff]  ;;  %v315_v32 = vmax.f32 %v283_v29, 0.0  ;;  %v314_v33 = vmax.f32 %v282_v30, 0.0  ;;  %v284_v35 = vld [vmem:[%s4666_s24 + $0x78] sm:$0xff] }
  0x22   : > { %334 = vst.msk [vmem:[#allocation2 + $0x21] sm:$0xff] %vm226_vm0, %v302_v6  ;;  %337 = vst.msk [vmem:[#allocation2 + $0x49] sm:$0xff] %vm226_vm0, %v305_v12  ;;  %v317_v34 = vmax.f32 %v285_v31, 0.0  ;;  %v287_v36 = vld [vmem:[%s4666_s24 + $0x90] sm:$0xff]  ;;  %v286_v37 = vld [vmem:[%s4666_s24 + $0x88] sm:$0xff]  ;;  %v316_v38 = vmax.f32 %v284_v35, 0.0 }
  0x23   : > { %336 = vst.msk [vmem:[#allocation2 + $0x39] sm:$0xff] %vm226_vm0, %v304_v13  ;;  %339 = vst.msk [vmem:[#allocation2 + $0x61] sm:$0xff] %vm226_vm0, %v307_v14  ;;  %v319_v39 = vmax.f32 %v287_v36, 0.0  ;;  %v318_v40 = vmax.f32 %v286_v37, 0.0  ;;  %v289_v41 = vld [vmem:[%s4666_s24 + $0xa0] sm:$0xff]  ;;  %v288_v42 = vld [vmem:[%s4666_s24 + $0x98] sm:$0xff] }
  0x24   : > { %338 = vst.msk [vmem:[#allocation2 + $0x51] sm:$0xff] %vm226_vm0, %v306_v16  ;;  %341 = vst.msk [vmem:[#allocation2 + $0x79] sm:$0xff] %vm226_vm0, %v309_v20  ;;  %v291_v43 = vld [vmem:[%s4666_s24 + $0xb0] sm:$0xff]  ;;  %v321_v44 = vmax.f32 %v289_v41, 0.0  ;;  %v320_v45 = vmax.f32 %v288_v42, 0.0  ;;  %v290_v47 = vld [vmem:[%s4666_s24 + $0xa8] sm:$0xff] }
  0x25   : > { %340 = vst.msk [vmem:[#allocation2 + $0x69] sm:$0xff] %vm226_vm0, %v308_v21  ;;  %343 = vst.msk [vmem:[#allocation2 + $0x91] sm:$0xff] %vm226_vm0, %v311_v22  ;;  %v323_v46 = vmax.f32 %v291_v43, 0.0  ;;  %v293_v48 = vld [vmem:[%s4666_s24 + $0xc0] sm:$0xff]  ;;  %v292_v49 = vld [vmem:[%s4666_s24 + $0xb8] sm:$0xff]  ;;  %v322_v50 = vmax.f32 %v290_v47, 0.0 }
  0x26   : > { %342 = vst.msk [vmem:[#allocation2 + $0x81] sm:$0xff] %vm226_vm0, %v310_v26  ;;  %345 = vst.msk [vmem:[#allocation2 + $0xa9] sm:$0xff] %vm226_vm0, %v313_v27  ;;  %v325_v51 = vmax.f32 %v293_v48, 0.0  ;;  %v324_v52 = vmax.f32 %v292_v49, 0.0  ;;  %v295_v53 = vld [vmem:[%s4666_s24 + $0xd0] sm:$0xff]  ;;  %v294_v54 = vld [vmem:[%s4666_s24 + $0xc8] sm:$0xff] }
  0x27   : > { %344 = vst.msk [vmem:[#allocation2 + $0x99] sm:$0xff] %vm226_vm0, %v312_v28  ;;  %347 = vst.msk [vmem:[#allocation2 + $0xc1] sm:$0xff] %vm226_vm0, %v315_v32  ;;  %v297_v55 = vld [vmem:[%s4666_s24 + $0xe0] sm:$0xff]  ;;  %v327_v58 = vmax.f32 %v295_v53, 0.0  ;;  %v326_v59 = vmax.f32 %v294_v54, 0.0  ;;  %v296_v63 = vld [vmem:[%s4666_s24 + $0xd8] sm:$0xff] }
  0x28   : > { %346 = vst.msk [vmem:[#allocation2 + $0xb1] sm:$0xff] %vm226_vm0, %v314_v33  ;;  %349 = vst.msk [vmem:[#allocation2 + $0xd9] sm:$0xff] %vm226_vm0, %v317_v34  ;;  %v4717_v56 = vld [vmem:[#allocation2 + $0x19] sm:$0xff]  ;;  %v4719_v57 = vld [vmem:[#allocation2 + $0x31] sm:$0xff]  ;;  %v329_v60 = vmax.f32 %v297_v55, 0.0  ;;  %v328_v0 = vmax.f32 %v296_v63, 0.0 }
  0x29   : > { %348 = vst.msk [vmem:[#allocation2 + $0xc9] sm:$0xff] %vm226_vm0, %v316_v38  ;;  %351 = vst.msk [vmem:[#allocation2 + $0xf1] sm:$0xff] %vm226_vm0, %v319_v39  ;;  %497 = vrot.lane.b32.xlu1 %v4717_v56, %s4566_s25  ;;  %501 = vrot.lane.b32.xlu0 %v4719_v57, %s4566_s25  ;;  %v4731_v61 = vld [vmem:[#allocation2 + $0x21] sm:$0xff]  ;;  %v4733_v62 = vld [vmem:[#allocation2 + $0x49] sm:$0xff]  ;;  %s4572_s8 = smov 28   ;;  %s4573_s13 = smov 32  }
  0x2a   : > { %350 = vst.msk [vmem:[#allocation2 + $0xe1] sm:$0xff] %vm226_vm0, %v318_v40  ;;  %353 = vst.msk [vmem:[#allocation2 + $0x109] sm:$0xff] %vm226_vm0, %v321_v44  ;;  %v4744_v1 = vld [vmem:[#allocation2 + $0x39] sm:$0xff]  ;;  %v4746_v2 = vld [vmem:[#allocation2 + $0x61] sm:$0xff]  ;;  %vm2098_vm8 = vcmask 1041408   ;;  %vm1555_vm9 = vcmask 228544  }
  0x2b   : > { %352 = vst.msk [vmem:[#allocation2 + $0xf9] sm:$0xff] %vm226_vm0, %v320_v45  ;;  %355 = vst.msk [vmem:[#allocation2 + $0x121] sm:$0xff] %vm226_vm0, %v323_v46  ;;  %v4752_v3 = vld [vmem:[#allocation2 + $0x51] sm:$0xff]  ;;  %v4754_v4 = vld [vmem:[#allocation2 + $0x79] sm:$0xff]  ;;  %vm1748_vm10 = vcmask 261344   ;;  %vm1941_vm11 = vcmask 294144  }
  0x2c   : > { %354 = vst.msk [vmem:[#allocation2 + $0x111] sm:$0xff] %vm226_vm0, %v322_v50  ;;  %357 = vst.msk [vmem:[#allocation2 + $0x139] sm:$0xff] %vm226_vm0, %v325_v51  ;;  %v298_v5 = vld [vmem:[%s4666_s24 + $0xe8] sm:$0xff]  ;;  %v4764_v8 = vld [vmem:[#allocation2 + $0x91] sm:$0xff]  ;;  %vm2049_vm12 = vcmask 293888  }
  0x2d   : > { %356 = vst.msk [vmem:[#allocation2 + $0x129] sm:$0xff] %vm226_vm0, %v324_v52  ;;  %359 = vst.msk [vmem:[#allocation2 + $0x151] sm:$0xff] %vm226_vm0, %v327_v58  ;;  %499 = vrot.lane.b32.xlu1 %v4731_v61, %s4566_s25  ;;  %505 = vrot.lane.b32.xlu0 %v4733_v62, %s4566_s25  ;;  %v330_v6 = vmax.f32 %v298_v5, 0.0  ;;  %v4762_v7 = vld [vmem:[#allocation2 + $0x69] sm:$0xff]  ;;  %v4770_v9 = vld [vmem:[#allocation2 + $0x81] sm:$0xff] }
  0x2e   : > { %358 = vst.msk [vmem:[#allocation2 + $0x141] sm:$0xff] %vm226_vm0, %v326_v59  ;;  %361 = vst.msk [vmem:[#allocation2 + $0x169] sm:$0xff] %vm226_vm0, %v329_v60  ;;  %v4772_v10 = vld [vmem:[#allocation2 + $0xa9] sm:$0xff]  ;;  %v365_v11 = vld [vmem:[#allocation2] sm:$0xff] }
  0x2f   : > { %360 = vst.msk [vmem:[#allocation2 + $0x159] sm:$0xff] %vm226_vm0, %v328_v0  ;;  %362 = vst.msk [vmem:[#allocation2 + $0x171] sm:$0xff] %vm226_vm0, %v330_v6  ;;  %v366_v12 = vld [vmem:[#allocation2 + $0x8] sm:$0xff]  ;;  %v4776_v13 = vld [vmem:[#allocation2 + $0x18] sm:$0xff] }
  0x30   : > { %397 = vst.msk [vmem:[#allocation3] sm:$0xff] %vm226_vm0, %v365_v11  ;;  %398 = vst.msk [vmem:[#allocation3 + $0x8] sm:$0xff] %vm226_vm0, %v366_v12  ;;  %v4784_v14 = vld [vmem:[#allocation2 + $0x30] sm:$0xff]  ;;  %v4786_v15 = vld [vmem:[#allocation2 + $0x20] sm:$0xff] }
  0x31   : > { %503 = vrot.lane.b32.xlu1 %v4744_v1, %s4566_s25  ;;  %509 = vrot.lane.b32.xlu0 %v4746_v2, %s4566_s25  ;;  %399 = vst.msk [vmem:[#allocation3 + $0x10] sm:$0xff] %vm226_vm0, %v4776_v13  ;;  %v4788_v16 = vld [vmem:[#allocation2 + $0x99] sm:$0xff]  ;;  %v4790_v17 = vld [vmem:[#allocation2 + $0xc1] sm:$0xff]  ;;  %401 = vst.msk [vmem:[#allocation3 + $0x20] sm:$0xff] %vm226_vm0, %v4784_v14 }
  0x32   : > { %400 = vst.msk [vmem:[#allocation3 + $0x18] sm:$0xff] %vm226_vm0, %v4786_v15  ;;  %v4796_v18 = vld [vmem:[#allocation2 + $0x48] sm:$0xff]  ;;  %v4800_v19 = vld [vmem:[#allocation2 + $0x38] sm:$0xff]  ;;  %v4802_v20 = vld [vmem:[#allocation2 + $0x60] sm:$0xff] }
  0x33   : > { %403 = vst.msk [vmem:[#allocation3 + $0x30] sm:$0xff] %vm226_vm0, %v4796_v18  ;;  %v4804_v21 = vld [vmem:[#allocation2 + $0xb1] sm:$0xff]  ;;  %v4806_v22 = vld [vmem:[#allocation2 + $0xd9] sm:$0xff]  ;;  %402 = vst.msk [vmem:[#allocation3 + $0x28] sm:$0xff] %vm226_vm0, %v4800_v19 }
  0x34   : > { %405 = vst.msk [vmem:[#allocation3 + $0x40] sm:$0xff] %vm226_vm0, %v4802_v20  ;;  %v4812_v23 = vld [vmem:[#allocation2 + $0x50] sm:$0xff]  ;;  %v4814_v24 = vld [vmem:[#allocation2 + $0x78] sm:$0xff]  ;;  %v4816_v25 = vld [vmem:[#allocation2 + $0x68] sm:$0xff] }
  0x35   : > { %507 = vrot.lane.b32.xlu1 %v4752_v3, %s4566_s25  ;;  %513 = vrot.lane.b32.xlu0 %v4754_v4, %s4566_s25  ;;  %404 = vst.msk [vmem:[#allocation3 + $0x38] sm:$0xff] %vm226_vm0, %v4812_v23  ;;  %407 = vst.msk [vmem:[#allocation3 + $0x50] sm:$0xff] %vm226_vm0, %v4814_v24  ;;  %v4828_v26 = vld [vmem:[#allocation2 + $0x90] sm:$0xff]  ;;  %v4830_v27 = vld [vmem:[#allocation2 + $0x80] sm:$0xff] }
  0x36   : > { %406 = vst.msk [vmem:[#allocation3 + $0x48] sm:$0xff] %vm226_vm0, %v4816_v25  ;;  %v4832_v28 = vld [vmem:[#allocation2 + $0xa8] sm:$0xff]  ;;  %409 = vst.msk [vmem:[#allocation3 + $0x60] sm:$0xff] %vm226_vm0, %v4828_v26  ;;  %v4840_v29 = vld [vmem:[#allocation2 + $0x98] sm:$0xff] }
  0x37   : > { %408 = vst.msk [vmem:[#allocation3 + $0x58] sm:$0xff] %vm226_vm0, %v4830_v27  ;;  %411 = vst.msk [vmem:[#allocation3 + $0x70] sm:$0xff] %vm226_vm0, %v4832_v28  ;;  %v4842_v30 = vld [vmem:[#allocation2 + $0xc0] sm:$0xff]  ;;  %v4844_v31 = vld [vmem:[#allocation2 + $0xb0] sm:$0xff] }
  0x38   : > { %410 = vst.msk [vmem:[#allocation3 + $0x68] sm:$0xff] %vm226_vm0, %v4840_v29  ;;  %413 = vst.msk [vmem:[#allocation3 + $0x80] sm:$0xff] %vm226_vm0, %v4842_v30  ;;  %v4852_v32 = vld [vmem:[#allocation2 + $0xd8] sm:$0xff]  ;;  %v4854_v33 = vld [vmem:[#allocation2 + $0xc8] sm:$0xff] }
  0x39   : > { %511 = vrot.lane.b32.xlu1 %v4762_v7, %s4566_s25  ;;  %517 = vrot.lane.b32.xlu0 %v4764_v8, %s4566_s25  ;;  %412 = vst.msk [vmem:[#allocation3 + $0x78] sm:$0xff] %vm226_vm0, %v4844_v31  ;;  %v4856_v34 = vld [vmem:[#allocation2 + $0xf0] sm:$0xff]  ;;  %415 = vst.msk [vmem:[#allocation3 + $0x90] sm:$0xff] %vm226_vm0, %v4852_v32  ;;  %v4864_v35 = vld [vmem:[#allocation2 + $0xe0] sm:$0xff] }
  0x3a   : > { %414 = vst.msk [vmem:[#allocation3 + $0x88] sm:$0xff] %vm226_vm0, %v4854_v33  ;;  %417 = vst.msk [vmem:[#allocation3 + $0xa0] sm:$0xff] %vm226_vm0, %v4856_v34  ;;  %v4866_v36 = vld [vmem:[#allocation2 + $0x108] sm:$0xff]  ;;  %v4868_v37 = vld [vmem:[#allocation2 + $0xf8] sm:$0xff] }
  0x3b   : > { %416 = vst.msk [vmem:[#allocation3 + $0x98] sm:$0xff] %vm226_vm0, %v4864_v35  ;;  %419 = vst.msk [vmem:[#allocation3 + $0xb0] sm:$0xff] %vm226_vm0, %v4866_v36  ;;  %v4880_v38 = vld [vmem:[#allocation2 + $0x120] sm:$0xff]  ;;  %v4882_v39 = vld [vmem:[#allocation2 + $0x110] sm:$0xff] }
  0x3c   : > { %418 = vst.msk [vmem:[#allocation3 + $0xa8] sm:$0xff] %vm226_vm0, %v4868_v37  ;;  %v4884_v40 = vld [vmem:[#allocation2 + $0xc9] sm:$0xff]  ;;  %v4886_v41 = vld [vmem:[#allocation2 + $0xf1] sm:$0xff]  ;;  %421 = vst.msk [vmem:[#allocation3 + $0xc0] sm:$0xff] %vm226_vm0, %v4880_v38 }
  0x3d   : > { %515 = vrot.lane.b32.xlu1 %v4770_v9, %s4566_s25  ;;  %521 = vrot.lane.b32.xlu0 %v4772_v10, %s4566_s25  ;;  %420 = vst.msk [vmem:[#allocation3 + $0xb8] sm:$0xff] %vm226_vm0, %v4882_v39  ;;  %v4896_v42 = vld [vmem:[#allocation2 + $0x138] sm:$0xff]  ;;  %v4898_v43 = vld [vmem:[#allocation2 + $0x128] sm:$0xff]  ;;  %v4912_v46 = vld [vmem:[#allocation2 + $0x150] sm:$0xff] }
  0x3e   : > { %v4900_v44 = vld [vmem:[#allocation2 + $0xe1] sm:$0xff]  ;;  %v4902_v45 = vld [vmem:[#allocation2 + $0x109] sm:$0xff]  ;;  %423 = vst.msk [vmem:[#allocation3 + $0xd0] sm:$0xff] %vm226_vm0, %v4896_v42  ;;  %422 = vst.msk [vmem:[#allocation3 + $0xc8] sm:$0xff] %vm226_vm0, %v4898_v43 }
  0x3f   : > { %v4914_v47 = vld [vmem:[#allocation2 + $0x140] sm:$0xff]  ;;  %425 = vst.msk [vmem:[#allocation3 + $0xe0] sm:$0xff] %vm226_vm0, %v4912_v46  ;;  %v4928_v50 = vld [vmem:[#allocation2 + $0x168] sm:$0xff]  ;;  %v4930_v51 = vld [vmem:[#allocation2 + $0x158] sm:$0xff] }
  0x40   : > { %v4916_v48 = vld [vmem:[#allocation2 + $0xf9] sm:$0xff]  ;;  %v4918_v49 = vld [vmem:[#allocation2 + $0x121] sm:$0xff]  ;;  %424 = vst.msk [vmem:[#allocation3 + $0xd8] sm:$0xff] %vm226_vm0, %v4914_v47  ;;  %v4932_v52 = vld [vmem:[#allocation2 + $0x111] sm:$0xff] }
  0x41   : > { %519 = vrot.lane.b32.xlu1 %v4788_v16, %s4566_s25  ;;  %525 = vrot.lane.b32.xlu0 %v4790_v17, %s4566_s25  ;;  %v4934_v53 = vld [vmem:[#allocation2 + $0x139] sm:$0xff]  ;;  %427 = vst.msk [vmem:[#allocation3 + $0xf0] sm:$0xff] %vm226_vm0, %v4928_v50  ;;  %426 = vst.msk [vmem:[#allocation3 + $0xe8] sm:$0xff] %vm226_vm0, %v4930_v51  ;;  %v4944_v54 = vld [vmem:[#allocation2 + $0x170] sm:$0xff] }
  0x42   : > { %v4946_v55 = vld [vmem:[#allocation2 + $0x129] sm:$0xff]  ;;  %v4948_v58 = vld [vmem:[#allocation2 + $0x151] sm:$0xff]  ;;  %428 = vst.msk [vmem:[#allocation3 + $0xf8] sm:$0xff] %vm226_vm0, %v4944_v54  ;;  %v4958_v63 = vld [vmem:[#allocation2 + $0x141] sm:$0xff] }
  0x43   : > { %v299_v59 = vld [vmem:[%s4666_s24 + $0xf0] sm:$0xff]  ;;  %6794 = vst [vmem:[#allocation4_spill] sm:$0xff] %v4958_v63  ;;  %v300_v5 = vld [vmem:[%s4666_s24 + $0xf8] sm:$0xff]  ;;  %v622_v12 = vld [vmem:[#allocation2 + $0x2] sm:$0xff] }
  0x44   : > { %v331_v60 = vmax.f32 %v299_v59, 0.0  ;;  %v4960_v0 = vld [vmem:[#allocation2 + $0x169] sm:$0xff]  ;;  %v332_v6 = vmax.f32 %v300_v5, 0.0  ;;  %v4968_v11 = vld [vmem:[#allocation2 + $0x159] sm:$0xff]  ;;  %v4973_v59 = vld [vmem:[#allocation2 + $0x171] sm:$0xff] }
  0x45   : > { %523 = vrot.lane.b32.xlu1 %v4804_v21, %s4566_s25  ;;  %529 = vrot.lane.b32.xlu0 %v4806_v22, %s4566_s25  ;;  %6795 = vst [vmem:[#allocation5_spill] sm:$0xff] %v4960_v0  ;;  %6796 = vst [vmem:[#allocation6_spill] sm:$0xff] %v4968_v11  ;;  %v623_v5 = vld [vmem:[#allocation2 + $0xa] sm:$0xff] }
  0x46   : > { %363 = vst.msk [vmem:[#allocation2 + $0x181] sm:$0xff] %vm226_vm0, %v331_v60  ;;  %364 = vst.msk [vmem:[#allocation2 + $0x189] sm:$0xff] %vm226_vm0, %v332_v6  ;;  %v4975_v60 = vld [vmem:[#allocation2 + $0x1a] sm:$0xff]  ;;  %v4981_v6 = vld [vmem:[#allocation2 + $0x32] sm:$0xff] }
  0x47   : > { %6797 = vst [vmem:[#allocation7_spill] sm:$0xff] %v4973_v59  ;;  %6798 = vst [vmem:[#allocation8_spill] sm:$0xff] %v4975_v60 }
  0x48   : > { %6799 = vst [vmem:[#allocation9_spill] sm:$0xff] %v4981_v6 }
  0x49   : > { %527 = vrot.lane.b32.xlu1 %v4884_v40, %s4566_s25  ;;  %533 = vrot.lane.b32.xlu0 %v4886_v41, %s4566_s25 }
  0x4d   : > { %531 = vrot.lane.b32.xlu1 %v4900_v44, %s4566_s25  ;;  %537 = vrot.lane.b32.xlu0 %v4902_v45, %s4566_s25 }
  0x51   : > { %535 = vrot.lane.b32.xlu1 %v4916_v48, %s4566_s25  ;;  %541 = vrot.lane.b32.xlu0 %v4918_v49, %s4566_s25 }
  0x55   : > { %539 = vrot.lane.b32.xlu1 %v4932_v52, %s4566_s25  ;;  %545 = vrot.lane.b32.xlu0 %v4934_v53, %s4566_s25 }
  0x59   : > { %543 = vrot.lane.b32.xlu1 %v4946_v55, %s4566_s25  ;;  %549 = vrot.lane.b32.xlu0 %v4948_v58, %s4566_s25 }
  0x5d   : > { %547 = vrot.lane.b32.xlu1 %v4958_v63, %s4566_s25  ;;  %553 = vrot.lane.b32.xlu0 %v4960_v0, %s4566_s25 }
  0x61   : > { %551 = vrot.lane.b32.xlu1 %v4968_v11, %s4566_s25  ;;  %686 = vrot.lane.b32.xlu0 %v622_v12, %s4567_s26  ;;  %v4986_v11 = vld [vmem:[#allocation2 + $0x22] sm:$0xff]  ;;  %v4988_v12 = vld [vmem:[#allocation2 + $0x4a] sm:$0xff] }
  0x62   : > { %6800 = vst [vmem:[#allocation10_spill] sm:$0xff] %v4986_v11  ;;  %6801 = vst [vmem:[#allocation11_spill] sm:$0xff] %v4988_v12 }
  0x65   : > { %555 = vrot.lane.b32.xlu1 %v4973_v59, %s4566_s25  ;;  %690 = vrot.lane.b32.xlu0 %v4975_v60, %s4567_s26  ;;  %v4994_v59 = vld [vmem:[#allocation2 + $0x3a] sm:$0xff]  ;;  %v4996_v60 = vld [vmem:[#allocation2 + $0x62] sm:$0xff] }
  0x66   : > { %6802 = vst [vmem:[#allocation12_spill] sm:$0xff] %v4994_v59  ;;  %6803 = vst [vmem:[#allocation13_spill] sm:$0xff] %v4996_v60 }
  0x69   : > { %688 = vrot.lane.b32.xlu1 %v623_v5, %s4567_s26  ;;  %694 = vrot.lane.b32.xlu0 %v4981_v6, %s4567_s26  ;;  %v5002_v5 = vld [vmem:[#allocation2 + $0x52] sm:$0xff]  ;;  %v5004_v6 = vld [vmem:[#allocation2 + $0x7a] sm:$0xff] }
  0x6a   : > { %6804 = vst [vmem:[#allocation14_spill] sm:$0xff] %v5002_v5  ;;  %6805 = vst [vmem:[#allocation15_spill] sm:$0xff] %v5004_v6 }
  0x6d   : > { %692 = vrot.lane.b32.xlu1 %v4986_v11, %s4567_s26  ;;  %698 = vrot.lane.b32.xlu0 %v4988_v12, %s4567_s26  ;;  %v5010_v12 = vld [vmem:[#allocation2 + $0x6a] sm:$0xff]  ;;  %v5012_v11 = vld [vmem:[#allocation2 + $0x92] sm:$0xff] }
  0x6e   : > { %6806 = vst [vmem:[#allocation16_spill] sm:$0xff] %v5010_v12  ;;  %6807 = vst [vmem:[#allocation17_spill] sm:$0xff] %v5012_v11 }
  0x71   : > { %696 = vrot.lane.b32.xlu1 %v4994_v59, %s4567_s26  ;;  %702 = vrot.lane.b32.xlu0 %v4996_v60, %s4567_s26  ;;  %v5018_v60 = vld [vmem:[#allocation2 + $0x82] sm:$0xff]  ;;  %v5020_v59 = vld [vmem:[#allocation2 + $0xaa] sm:$0xff] }
  0x72   : > { %6808 = vst [vmem:[#allocation18_spill] sm:$0xff] %v5018_v60  ;;  %6809 = vst [vmem:[#allocation19_spill] sm:$0xff] %v5020_v59 }
  0x75   : > { %700 = vrot.lane.b32.xlu1 %v5002_v5, %s4567_s26  ;;  %706 = vrot.lane.b32.xlu0 %v5004_v6, %s4567_s26  ;;  %v5026_v6 = vld [vmem:[#allocation2 + $0x9a] sm:$0xff]  ;;  %v5028_v5 = vld [vmem:[#allocation2 + $0xc2] sm:$0xff] }
  0x76   : > { %6810 = vst [vmem:[#allocation20_spill] sm:$0xff] %v5026_v6  ;;  %6811 = vst [vmem:[#allocation21_spill] sm:$0xff] %v5028_v5 }
  0x79   : > { %704 = vrot.lane.b32.xlu1 %v5010_v12, %s4567_s26  ;;  %710 = vrot.lane.b32.xlu0 %v5012_v11, %s4567_s26  ;;  %v5034_v11 = vld [vmem:[#allocation2 + $0xb2] sm:$0xff]  ;;  %v5036_v12 = vld [vmem:[#allocation2 + $0xda] sm:$0xff] }
  0x7a   : > { %6812 = vst [vmem:[#allocation22_spill] sm:$0xff] %v5034_v11  ;;  %6813 = vst [vmem:[#allocation23_spill] sm:$0xff] %v5036_v12 }
  0x7d   : > { %708 = vrot.lane.b32.xlu1 %v5018_v60, %s4567_s26  ;;  %714 = vrot.lane.b32.xlu0 %v5020_v59, %s4567_s26  ;;  %v5042_v59 = vld [vmem:[#allocation2 + $0xca] sm:$0xff]  ;;  %v5044_v60 = vld [vmem:[#allocation2 + $0xf2] sm:$0xff] }
  0x7e   : > { %6814 = vst [vmem:[#allocation24_spill] sm:$0xff] %v5042_v59  ;;  %6815 = vst [vmem:[#allocation25_spill] sm:$0xff] %v5044_v60 }
  0x81   : > { %712 = vrot.lane.b32.xlu1 %v5026_v6, %s4567_s26  ;;  %718 = vrot.lane.b32.xlu0 %v5028_v5, %s4567_s26  ;;  %v5050_v5 = vld [vmem:[#allocation2 + $0xe2] sm:$0xff]  ;;  %v5052_v6 = vld [vmem:[#allocation2 + $0x10a] sm:$0xff] }
  0x82   : > { %6816 = vst [vmem:[#allocation26_spill] sm:$0xff] %v5050_v5  ;;  %6817 = vst [vmem:[#allocation27_spill] sm:$0xff] %v5052_v6 }
  0x85   : > { %716 = vrot.lane.b32.xlu1 %v5034_v11, %s4567_s26  ;;  %722 = vrot.lane.b32.xlu0 %v5036_v12, %s4567_s26  ;;  %v5058_v12 = vld [vmem:[#allocation2 + $0xfa] sm:$0xff]  ;;  %v5060_v11 = vld [vmem:[#allocation2 + $0x122] sm:$0xff] }
  0x86   : > { %6818 = vst [vmem:[#allocation28_spill] sm:$0xff] %v5058_v12  ;;  %6819 = vst [vmem:[#allocation29_spill] sm:$0xff] %v5060_v11 }
  0x89   : > { %720 = vrot.lane.b32.xlu1 %v5042_v59, %s4567_s26  ;;  %726 = vrot.lane.b32.xlu0 %v5044_v60, %s4567_s26  ;;  %v5066_v60 = vld [vmem:[#allocation2 + $0x112] sm:$0xff]  ;;  %v5068_v59 = vld [vmem:[#allocation2 + $0x13a] sm:$0xff]  ;;  %v494_v0 = vpop.permute.xlu0 %493 }
  0x8a   : > { %6820 = vst [vmem:[#allocation30_spill] sm:$0xff] %v5066_v60  ;;  %590 = vst.msk [vmem:[#allocation3] sm:$0xff] %vm589_vm3, %v494_v0  ;;  %v5084_v0 = vld [vmem:[#allocation2 + $0x142] sm:$0xff] }
  0x8b   : > { %6823 = vst [vmem:[#allocation33_spill] sm:$0xff] %v5084_v0 }
  0x8d   : > { %724 = vrot.lane.b32.xlu1 %v5050_v5, %s4567_s26  ;;  %730 = vrot.lane.b32.xlu0 %v5052_v6, %s4567_s26  ;;  %v5075_v6 = vld [vmem:[#allocation2 + $0x12a] sm:$0xff]  ;;  %v496_v5 = vpop.permute.xlu0 %495 }
  0x8e   : > { %6821 = vst [vmem:[#allocation31_spill] sm:$0xff] %v5075_v6  ;;  %591 = vst.msk [vmem:[#allocation3 + $0x8] sm:$0xff] %vm589_vm3, %v496_v5  ;;  %v5094_v5 = vld [vmem:[#allocation2 + $0x15a] sm:$0xff] }
  0x91   : > { %728 = vrot.lane.b32.xlu1 %v5058_v12, %s4567_s26  ;;  %734 = vrot.lane.b32.xlu0 %v5060_v11, %s4567_s26  ;;  %v5077_v12 = vld [vmem:[#allocation2 + $0x152] sm:$0xff]  ;;  %v5086_v11 = vld [vmem:[#allocation2 + $0x16a] sm:$0xff] }
  0x92   : > { %6822 = vst [vmem:[#allocation32_spill] sm:$0xff] %v5077_v12 }
  0x95   : > { %732 = vrot.lane.b32.xlu1 %v5066_v60, %s4567_s26  ;;  %738 = vrot.lane.b32.xlu0 %v5068_v59, %s4567_s26 }
  0x99   : > { %736 = vrot.lane.b32.xlu1 %v5075_v6, %s4567_s26  ;;  %742 = vrot.lane.b32.xlu0 %v5077_v12, %s4567_s26 }
  0x9b   : > { %v498_v60 = vpop.permute.xlu1 %497  ;;  %v502_v63 = vpop.permute.xlu0 %501 }
  0x9c   : > { %592 = vst.msk [vmem:[#allocation3 + $0x10] sm:$0xff] %vm589_vm3, %v498_v60  ;;  %594 = vst.msk [vmem:[#allocation3 + $0x20] sm:$0xff] %vm589_vm3, %v502_v63  ;;  %v5102_v63 = vld [vmem:[#allocation2 + $0x172] sm:$0xff] }
  0x9d   : > { %740 = vrot.lane.b32.xlu1 %v5084_v0, %s4567_s26  ;;  %746 = vrot.lane.b32.xlu0 %v5086_v11, %s4567_s26 }
  0x9f   : > { %v500_v6 = vpop.permute.xlu1 %499  ;;  %v506_v12 = vpop.permute.xlu0 %505 }
  0xa0   : > { %593 = vst.msk [vmem:[#allocation3 + $0x18] sm:$0xff] %vm589_vm3, %v500_v6  ;;  %596 = vst.msk [vmem:[#allocation3 + $0x30] sm:$0xff] %vm589_vm3, %v506_v12 }
  0xa1   : > { %744 = vrot.lane.b32.xlu1 %v5094_v5, %s4567_s26  ;;  %879 = vrot.lane.b32.xlu0 %v4776_v13, %s4568_s27 }
  0xa3   : > { %v504_v60 = vpop.permute.xlu1 %503  ;;  %v510_v0 = vpop.permute.xlu0 %509 }
  0xa4   : > { %595 = vst.msk [vmem:[#allocation3 + $0x28] sm:$0xff] %vm589_vm3, %v504_v60  ;;  %598 = vst.msk [vmem:[#allocation3 + $0x40] sm:$0xff] %vm589_vm3, %v510_v0 }
  0xa5   : > { %748 = vrot.lane.b32.xlu1 %v5102_v63, %s4567_s26  ;;  %883 = vrot.lane.b32.xlu0 %v4784_v14, %s4568_s27 }
  0xa7   : > { %v508_v6 = vpop.permute.xlu1 %507  ;;  %v514_v12 = vpop.permute.xlu0 %513 }
  0xa8   : > { %597 = vst.msk [vmem:[#allocation3 + $0x38] sm:$0xff] %vm589_vm3, %v508_v6  ;;  %600 = vst.msk [vmem:[#allocation3 + $0x50] sm:$0xff] %vm589_vm3, %v514_v12 }
  0xa9   : > { %881 = vrot.lane.b32.xlu1 %v4786_v15, %s4568_s27  ;;  %887 = vrot.lane.b32.xlu0 %v4796_v18, %s4568_s27 }
  0xab   : > { %v512_v13 = vpop.permute.xlu1 %511  ;;  %v518_v0 = vpop.permute.xlu0 %517 }
  0xac   : > { %599 = vst.msk [vmem:[#allocation3 + $0x48] sm:$0xff] %vm589_vm3, %v512_v13  ;;  %602 = vst.msk [vmem:[#allocation3 + $0x60] sm:$0xff] %vm589_vm3, %v518_v0 }
  0xad   : > { %885 = vrot.lane.b32.xlu1 %v4800_v19, %s4568_s27  ;;  %891 = vrot.lane.b32.xlu0 %v4802_v20, %s4568_s27 }
  0xaf   : > { %v516_v60 = vpop.permute.xlu1 %515  ;;  %v522_v6 = vpop.permute.xlu0 %521 }
  0xb0   : > { %601 = vst.msk [vmem:[#allocation3 + $0x58] sm:$0xff] %vm589_vm3, %v516_v60  ;;  %604 = vst.msk [vmem:[#allocation3 + $0x70] sm:$0xff] %vm589_vm3, %v522_v6 }
  0xb1   : > { %889 = vrot.lane.b32.xlu1 %v4812_v23, %s4568_s27  ;;  %895 = vrot.lane.b32.xlu0 %v4814_v24, %s4568_s27 }
  0xb3   : > { %v520_v15 = vpop.permute.xlu1 %519  ;;  %v526_v12 = vpop.permute.xlu0 %525 }
  0xb4   : > { %603 = vst.msk [vmem:[#allocation3 + $0x68] sm:$0xff] %vm589_vm3, %v520_v15  ;;  %606 = vst.msk [vmem:[#allocation3 + $0x80] sm:$0xff] %vm589_vm3, %v526_v12 }
  0xb5   : > { %893 = vrot.lane.b32.xlu1 %v4816_v25, %s4568_s27  ;;  %899 = vrot.lane.b32.xlu0 %v4828_v26, %s4568_s27 }
  0xb7   : > { %v524_v13 = vpop.permute.xlu1 %523  ;;  %v530_v0 = vpop.permute.xlu0 %529 }
  0xb8   : > { %605 = vst.msk [vmem:[#allocation3 + $0x78] sm:$0xff] %vm589_vm3, %v524_v13  ;;  %608 = vst.msk [vmem:[#allocation3 + $0x90] sm:$0xff] %vm589_vm3, %v530_v0 }
  0xb9   : > { %897 = vrot.lane.b32.xlu1 %v4830_v27, %s4568_s27  ;;  %903 = vrot.lane.b32.xlu0 %v4832_v28, %s4568_s27 }
  0xbb   : > { %v528_v60 = vpop.permute.xlu1 %527  ;;  %v534_v6 = vpop.permute.xlu0 %533 }
  0xbc   : > { %607 = vst.msk [vmem:[#allocation3 + $0x88] sm:$0xff] %vm589_vm3, %v528_v60  ;;  %610 = vst.msk [vmem:[#allocation3 + $0xa0] sm:$0xff] %vm589_vm3, %v534_v6 }
  0xbd   : > { %901 = vrot.lane.b32.xlu1 %v4840_v29, %s4568_s27  ;;  %907 = vrot.lane.b32.xlu0 %v4842_v30, %s4568_s27 }
  0xbf   : > { %v532_v15 = vpop.permute.xlu1 %531  ;;  %v538_v12 = vpop.permute.xlu0 %537 }
  0xc0   : > { %609 = vst.msk [vmem:[#allocation3 + $0x98] sm:$0xff] %vm589_vm3, %v532_v15  ;;  %612 = vst.msk [vmem:[#allocation3 + $0xb0] sm:$0xff] %vm589_vm3, %v538_v12 }
  0xc1   : > { %905 = vrot.lane.b32.xlu1 %v4844_v31, %s4568_s27  ;;  %911 = vrot.lane.b32.xlu0 %v4852_v32, %s4568_s27 }
  0xc3   : > { %v536_v13 = vpop.permute.xlu1 %535  ;;  %v542_v0 = vpop.permute.xlu0 %541 }
  0xc4   : > { %611 = vst.msk [vmem:[#allocation3 + $0xa8] sm:$0xff] %vm589_vm3, %v536_v13  ;;  %614 = vst.msk [vmem:[#allocation3 + $0xc0] sm:$0xff] %vm589_vm3, %v542_v0 }
  0xc5   : > { %909 = vrot.lane.b32.xlu1 %v4854_v33, %s4568_s27  ;;  %915 = vrot.lane.b32.xlu0 %v4856_v34, %s4568_s27 }
  0xc7   : > { %v540_v60 = vpop.permute.xlu1 %539  ;;  %v546_v6 = vpop.permute.xlu0 %545 }
  0xc8   : > { %613 = vst.msk [vmem:[#allocation3 + $0xb8] sm:$0xff] %vm589_vm3, %v540_v60  ;;  %616 = vst.msk [vmem:[#allocation3 + $0xd0] sm:$0xff] %vm589_vm3, %v546_v6 }
  0xc9   : > { %913 = vrot.lane.b32.xlu1 %v4864_v35, %s4568_s27  ;;  %919 = vrot.lane.b32.xlu0 %v4866_v36, %s4568_s27 }
  0xcb   : > { %v544_v15 = vpop.permute.xlu1 %543  ;;  %v550_v12 = vpop.permute.xlu0 %549 }
  0xcc   : > { %615 = vst.msk [vmem:[#allocation3 + $0xc8] sm:$0xff] %vm589_vm3, %v544_v15  ;;  %618 = vst.msk [vmem:[#allocation3 + $0xe0] sm:$0xff] %vm589_vm3, %v550_v12 }
  0xcd   : > { %917 = vrot.lane.b32.xlu1 %v4868_v37, %s4568_s27  ;;  %923 = vrot.lane.b32.xlu0 %v4880_v38, %s4568_s27 }
  0xcf   : > { %v548_v13 = vpop.permute.xlu1 %547  ;;  %v554_v0 = vpop.permute.xlu0 %553 }
  0xd0   : > { %617 = vst.msk [vmem:[#allocation3 + $0xd8] sm:$0xff] %vm589_vm3, %v548_v13  ;;  %620 = vst.msk [vmem:[#allocation3 + $0xf0] sm:$0xff] %vm589_vm3, %v554_v0  ;;  %v845_v13 = vld [vmem:[#allocation2 + $0x180] sm:$0xff] }
  0xd1   : > { %921 = vrot.lane.b32.xlu1 %v4882_v39, %s4568_s27  ;;  %927 = vrot.lane.b32.xlu0 %v4896_v42, %s4568_s27 }
  0xd3   : > { %v552_v60 = vpop.permute.xlu1 %551  ;;  %v687_v6 = vpop.permute.xlu0 %686 }
  0xd4   : > { %619 = vst.msk [vmem:[#allocation3 + $0xe8] sm:$0xff] %vm589_vm3, %v552_v60 }
  0xd5   : > { %783 = vst.msk [vmem:[#allocation3] sm:$0xff] %vm782_vm4, %v687_v6  ;;  %925 = vrot.lane.b32.xlu1 %v4898_v43, %s4568_s27  ;;  %931 = vrot.lane.b32.xlu0 %v4912_v46, %s4568_s27 }
  0xd7   : > { %v556_v15 = vpop.permute.xlu1 %555  ;;  %v691_v12 = vpop.permute.xlu0 %690 }
  0xd8   : > { %621 = vst.msk [vmem:[#allocation3 + $0xf8] sm:$0xff] %vm589_vm3, %v556_v15 }
  0xd9   : > { %785 = vst.msk [vmem:[#allocation3 + $0x10] sm:$0xff] %vm782_vm4, %v691_v12  ;;  %929 = vrot.lane.b32.xlu1 %v4914_v47, %s4568_s27  ;;  %935 = vrot.lane.b32.xlu0 %v4928_v50, %s4568_s27  ;;  %v846_v12 = vld [vmem:[#allocation2 + $0x188] sm:$0xff] }
  0xdb   : > { %v689_v0 = vpop.permute.xlu1 %688  ;;  %v695_v60 = vpop.permute.xlu0 %694 }
  0xdc   : > { %784 = vst.msk [vmem:[#allocation3 + $0x8] sm:$0xff] %vm782_vm4, %v689_v0  ;;  %787 = vst.msk [vmem:[#allocation3 + $0x20] sm:$0xff] %vm782_vm4, %v695_v60 }
  0xdd   : > { %933 = vrot.lane.b32.xlu1 %v4930_v51, %s4568_s27  ;;  %939 = vrot.lane.b32.xlu0 %v845_v13, %s4568_s27 }
  0xdf   : > { %v693_v6 = vpop.permute.xlu1 %692  ;;  %v699_v15 = vpop.permute.xlu0 %698 }
  0xe0   : > { %786 = vst.msk [vmem:[#allocation3 + $0x18] sm:$0xff] %vm782_vm4, %v693_v6  ;;  %789 = vst.msk [vmem:[#allocation3 + $0x30] sm:$0xff] %vm782_vm4, %v699_v15 }
  0xe1   : > { %937 = vrot.lane.b32.xlu1 %v4944_v54, %s4568_s27  ;;  %1072 = vrot.lane.b32.xlu0 %v4717_v56, %s4569_s28 }
  0xe3   : > { %v697_v0 = vpop.permute.xlu1 %696  ;;  %v703_v60 = vpop.permute.xlu0 %702 }
  0xe4   : > { %788 = vst.msk [vmem:[#allocation3 + $0x28] sm:$0xff] %vm782_vm4, %v697_v0  ;;  %791 = vst.msk [vmem:[#allocation3 + $0x40] sm:$0xff] %vm782_vm4, %v703_v60 }
  0xe5   : > { %941 = vrot.lane.b32.xlu1 %v846_v12, %s4568_s27  ;;  %1076 = vrot.lane.b32.xlu0 %v4719_v57, %s4569_s28  ;;  %v5282_v12 = vld [vmem:[#allocation2 + $0x181] sm:$0xff] }
  0xe7   : > { %v701_v13 = vpop.permute.xlu1 %700  ;;  %v707_v6 = vpop.permute.xlu0 %706 }
  0xe8   : > { %790 = vst.msk [vmem:[#allocation3 + $0x38] sm:$0xff] %vm782_vm4, %v701_v13  ;;  %793 = vst.msk [vmem:[#allocation3 + $0x50] sm:$0xff] %vm782_vm4, %v707_v6  ;;  %v6827_v6 = vld [vmem:[#allocation7_spill] sm:$0xff] }
  0xe9   : > { %1074 = vrot.lane.b32.xlu1 %v4731_v61, %s4569_s28  ;;  %1080 = vrot.lane.b32.xlu0 %v4733_v62, %s4569_s28 }
  0xeb   : > { %v705_v56 = vpop.permute.xlu1 %704  ;;  %v711_v54 = vpop.permute.xlu0 %710 }
  0xec   : > { %792 = vst.msk [vmem:[#allocation3 + $0x48] sm:$0xff] %vm782_vm4, %v705_v56  ;;  %795 = vst.msk [vmem:[#allocation3 + $0x60] sm:$0xff] %vm782_vm4, %v711_v54  ;;  %v6828_v56 = vld [vmem:[#allocation8_spill] sm:$0xff] }
  0xed   : > { %1078 = vrot.lane.b32.xlu1 %v4744_v1, %s4569_s28  ;;  %1084 = vrot.lane.b32.xlu0 %v4746_v2, %s4569_s28  ;;  %v5296_v54 = vld [vmem:[#allocation2 + $0x189] sm:$0xff] }
  0xef   : > { %v709_v57 = vpop.permute.xlu1 %708  ;;  %v715_v15 = vpop.permute.xlu0 %714 }
  0xf0   : > { %794 = vst.msk [vmem:[#allocation3 + $0x58] sm:$0xff] %vm782_vm4, %v709_v57  ;;  %797 = vst.msk [vmem:[#allocation3 + $0x70] sm:$0xff] %vm782_vm4, %v715_v15 }
  0xf1   : > { %1082 = vrot.lane.b32.xlu1 %v4752_v3, %s4569_s28  ;;  %1088 = vrot.lane.b32.xlu0 %v4754_v4, %s4569_s28 }
  0xf3   : > { %v713_v61 = vpop.permute.xlu1 %712  ;;  %v719_v62 = vpop.permute.xlu0 %718 }
  0xf4   : > { %796 = vst.msk [vmem:[#allocation3 + $0x68] sm:$0xff] %vm782_vm4, %v713_v61  ;;  %799 = vst.msk [vmem:[#allocation3 + $0x80] sm:$0xff] %vm782_vm4, %v719_v62  ;;  %v6829_v61 = vld [vmem:[#allocation9_spill] sm:$0xff] }
  0xf5   : > { %1086 = vrot.lane.b32.xlu1 %v4762_v7, %s4569_s28  ;;  %1092 = vrot.lane.b32.xlu0 %v4764_v8, %s4569_s28 }
  0xf7   : > { %v717_v1 = vpop.permute.xlu1 %716  ;;  %v723_v2 = vpop.permute.xlu0 %722 }
  0xf8   : > { %798 = vst.msk [vmem:[#allocation3 + $0x78] sm:$0xff] %vm782_vm4, %v717_v1  ;;  %801 = vst.msk [vmem:[#allocation3 + $0x90] sm:$0xff] %vm782_vm4, %v723_v2  ;;  %v6830_v2 = vld [vmem:[#allocation10_spill] sm:$0xff] }
  0xf9   : > { %1090 = vrot.lane.b32.xlu1 %v4770_v9, %s4569_s28  ;;  %1096 = vrot.lane.b32.xlu0 %v4772_v10, %s4569_s28 }
  0xfb   : > { %v721_v3 = vpop.permute.xlu1 %720  ;;  %v727_v4 = vpop.permute.xlu0 %726 }
  0xfc   : > { %800 = vst.msk [vmem:[#allocation3 + $0x88] sm:$0xff] %vm782_vm4, %v721_v3  ;;  %803 = vst.msk [vmem:[#allocation3 + $0xa0] sm:$0xff] %vm782_vm4, %v727_v4  ;;  %v6831_v3 = vld [vmem:[#allocation11_spill] sm:$0xff] }
  0xfd   : > { %1094 = vrot.lane.b32.xlu1 %v4788_v16, %s4569_s28  ;;  %1100 = vrot.lane.b32.xlu0 %v4790_v17, %s4569_s28 }
  0xff   : > { %v725_v7 = vpop.permute.xlu1 %724  ;;  %v731_v8 = vpop.permute.xlu0 %730 }
 0x100   : > { %802 = vst.msk [vmem:[#allocation3 + $0x98] sm:$0xff] %vm782_vm4, %v725_v7  ;;  %805 = vst.msk [vmem:[#allocation3 + $0xb0] sm:$0xff] %vm782_vm4, %v731_v8  ;;  %v6832_v8 = vld [vmem:[#allocation12_spill] sm:$0xff] }
 0x101   : > { %1098 = vrot.lane.b32.xlu1 %v4804_v21, %s4569_s28  ;;  %1104 = vrot.lane.b32.xlu0 %v4806_v22, %s4569_s28 }
 0x103   : > { %v729_v9 = vpop.permute.xlu1 %728  ;;  %v735_v10 = vpop.permute.xlu0 %734 }
 0x104   : > { %804 = vst.msk [vmem:[#allocation3 + $0xa8] sm:$0xff] %vm782_vm4, %v729_v9  ;;  %807 = vst.msk [vmem:[#allocation3 + $0xc0] sm:$0xff] %vm782_vm4, %v735_v10  ;;  %v6833_v9 = vld [vmem:[#allocation13_spill] sm:$0xff] }
 0x105   : > { %1102 = vrot.lane.b32.xlu1 %v4884_v40, %s4569_s28  ;;  %1108 = vrot.lane.b32.xlu0 %v4886_v41, %s4569_s28 }
 0x107   : > { %v733_v16 = vpop.permute.xlu1 %732  ;;  %v739_v17 = vpop.permute.xlu0 %738 }
 0x108   : > { %806 = vst.msk [vmem:[#allocation3 + $0xb8] sm:$0xff] %vm782_vm4, %v733_v16  ;;  %809 = vst.msk [vmem:[#allocation3 + $0xd0] sm:$0xff] %vm782_vm4, %v739_v17  ;;  %v6834_v17 = vld [vmem:[#allocation14_spill] sm:$0xff] }
 0x109   : > { %1106 = vrot.lane.b32.xlu1 %v4900_v44, %s4569_s28  ;;  %1112 = vrot.lane.b32.xlu0 %v4902_v45, %s4569_s28 }
 0x10b   : > { %v737_v21 = vpop.permute.xlu1 %736  ;;  %v743_v22 = vpop.permute.xlu0 %742 }
 0x10c   : > { %808 = vst.msk [vmem:[#allocation3 + $0xc8] sm:$0xff] %vm782_vm4, %v737_v21  ;;  %811 = vst.msk [vmem:[#allocation3 + $0xe0] sm:$0xff] %vm782_vm4, %v743_v22  ;;  %v6835_v21 = vld [vmem:[#allocation15_spill] sm:$0xff] }
 0x10d   : > { %1110 = vrot.lane.b32.xlu1 %v4916_v48, %s4569_s28  ;;  %1116 = vrot.lane.b32.xlu0 %v4918_v49, %s4569_s28 }
 0x10f   : > { %v741_v40 = vpop.permute.xlu1 %740  ;;  %v747_v41 = vpop.permute.xlu0 %746 }
 0x110   : > { %810 = vst.msk [vmem:[#allocation3 + $0xd8] sm:$0xff] %vm782_vm4, %v741_v40  ;;  %813 = vst.msk [vmem:[#allocation3 + $0xf0] sm:$0xff] %vm782_vm4, %v747_v41  ;;  %v6836_v41 = vld [vmem:[#allocation16_spill] sm:$0xff] }
 0x111   : > { %1114 = vrot.lane.b32.xlu1 %v4932_v52, %s4569_s28  ;;  %1120 = vrot.lane.b32.xlu0 %v4934_v53, %s4569_s28  ;;  %v6824_v52 = vld [vmem:[#allocation4_spill] sm:$0xff]  ;;  %v6825_v53 = vld [vmem:[#allocation5_spill] sm:$0xff] }
 0x113   : > { %v745_v44 = vpop.permute.xlu1 %744  ;;  %v880_v45 = vpop.permute.xlu0 %879 }
 0x114   : > { %812 = vst.msk [vmem:[#allocation3 + $0xe8] sm:$0xff] %vm782_vm4, %v745_v44  ;;  %v6837_v44 = vld [vmem:[#allocation17_spill] sm:$0xff] }
 0x115   : > { %976 = vst.msk [vmem:[#allocation3] sm:$0xff] %vm975_vm5, %v880_v45  ;;  %1118 = vrot.lane.b32.xlu1 %v4946_v55, %s4569_s28  ;;  %1124 = vrot.lane.b32.xlu0 %v4948_v58, %s4569_s28  ;;  %v6826_v55 = vld [vmem:[#allocation6_spill] sm:$0xff] }
 0x117   : > { %v749_v48 = vpop.permute.xlu1 %748  ;;  %v884_v49 = vpop.permute.xlu0 %883 }
 0x118   : > { %814 = vst.msk [vmem:[#allocation3 + $0xf8] sm:$0xff] %vm782_vm4, %v749_v48 }
 0x119   : > { %978 = vst.msk [vmem:[#allocation3 + $0x10] sm:$0xff] %vm975_vm5, %v884_v49  ;;  %1122 = vrot.lane.b32.xlu1 %v6824_v52, %s4569_s28  ;;  %1128 = vrot.lane.b32.xlu0 %v6825_v53, %s4569_s28  ;;  %v6838_v49 = vld [vmem:[#allocation18_spill] sm:$0xff]  ;;  %v6839_v52 = vld [vmem:[#allocation19_spill] sm:$0xff] }
 0x11b   : > { %v882_v0 = vpop.permute.xlu1 %881  ;;  %v888_v60 = vpop.permute.xlu0 %887 }
 0x11c   : > { %977 = vst.msk [vmem:[#allocation3 + $0x8] sm:$0xff] %vm975_vm5, %v882_v0  ;;  %980 = vst.msk [vmem:[#allocation3 + $0x20] sm:$0xff] %vm975_vm5, %v888_v60  ;;  %v6840_v60 = vld [vmem:[#allocation20_spill] sm:$0xff] }
 0x11d   : > { %1126 = vrot.lane.b32.xlu1 %v6826_v55, %s4569_s28  ;;  %1132 = vrot.lane.b32.xlu0 %v5282_v12, %s4569_s28  ;;  %v6841_v55 = vld [vmem:[#allocation21_spill] sm:$0xff] }
 0x11f   : > { %v886_v58 = vpop.permute.xlu1 %885  ;;  %v892_v13 = vpop.permute.xlu0 %891 }
 0x120   : > { %979 = vst.msk [vmem:[#allocation3 + $0x18] sm:$0xff] %vm975_vm5, %v886_v58  ;;  %982 = vst.msk [vmem:[#allocation3 + $0x30] sm:$0xff] %vm975_vm5, %v892_v13 }
 0x121   : > { %1130 = vrot.lane.b32.xlu1 %v6827_v6, %s4569_s28  ;;  %1265 = vrot.lane.b32.xlu0 %v6828_v56, %s4570_s29  ;;  %v6842_v6 = vld [vmem:[#allocation22_spill] sm:$0xff]  ;;  %v6843_v56 = vld [vmem:[#allocation23_spill] sm:$0xff] }
 0x123   : > { %v890_v57 = vpop.permute.xlu1 %889  ;;  %v896_v15 = vpop.permute.xlu0 %895 }
 0x124   : > { %981 = vst.msk [vmem:[#allocation3 + $0x28] sm:$0xff] %vm975_vm5, %v890_v57  ;;  %984 = vst.msk [vmem:[#allocation3 + $0x40] sm:$0xff] %vm975_vm5, %v896_v15 }
 0x125   : > { %1134 = vrot.lane.b32.xlu1 %v5296_v54, %s4569_s28  ;;  %1269 = vrot.lane.b32.xlu0 %v6829_v61, %s4570_s29  ;;  %v6844_v61 = vld [vmem:[#allocation24_spill] sm:$0xff] }
 0x127   : > { %v894_v62 = vpop.permute.xlu1 %893  ;;  %v900_v1 = vpop.permute.xlu0 %899 }
 0x128   : > { %983 = vst.msk [vmem:[#allocation3 + $0x38] sm:$0xff] %vm975_vm5, %v894_v62  ;;  %986 = vst.msk [vmem:[#allocation3 + $0x50] sm:$0xff] %vm975_vm5, %v900_v1  ;;  %v6845_v62 = vld [vmem:[#allocation25_spill] sm:$0xff] }
 0x129   : > { %1267 = vrot.lane.b32.xlu1 %v6830_v2, %s4570_s29  ;;  %1273 = vrot.lane.b32.xlu0 %v6831_v3, %s4570_s29  ;;  %v6846_v3 = vld [vmem:[#allocation26_spill] sm:$0xff] }
 0x12b   : > { %v898_v4 = vpop.permute.xlu1 %897  ;;  %v904_v7 = vpop.permute.xlu0 %903 }
 0x12c   : > { %985 = vst.msk [vmem:[#allocation3 + $0x48] sm:$0xff] %vm975_vm5, %v898_v4  ;;  %988 = vst.msk [vmem:[#allocation3 + $0x60] sm:$0xff] %vm975_vm5, %v904_v7  ;;  %v6847_v4 = vld [vmem:[#allocation27_spill] sm:$0xff] }
 0x12d   : > { %1271 = vrot.lane.b32.xlu1 %v6832_v8, %s4570_s29  ;;  %1277 = vrot.lane.b32.xlu0 %v6833_v9, %s4570_s29  ;;  %v6848_v9 = vld [vmem:[#allocation28_spill] sm:$0xff] }
 0x12f   : > { %v902_v10 = vpop.permute.xlu1 %901  ;;  %v908_v16 = vpop.permute.xlu0 %907 }
 0x130   : > { %987 = vst.msk [vmem:[#allocation3 + $0x58] sm:$0xff] %vm975_vm5, %v902_v10  ;;  %990 = vst.msk [vmem:[#allocation3 + $0x70] sm:$0xff] %vm975_vm5, %v908_v16  ;;  %v6849_v10 = vld [vmem:[#allocation29_spill] sm:$0xff] }
 0x131   : > { %1275 = vrot.lane.b32.xlu1 %v6834_v17, %s4570_s29  ;;  %1281 = vrot.lane.b32.xlu0 %v6835_v21, %s4570_s29  ;;  %v6850_v21 = vld [vmem:[#allocation30_spill] sm:$0xff] }
 0x133   : > { %v906_v22 = vpop.permute.xlu1 %905  ;;  %v912_v40 = vpop.permute.xlu0 %911 }
 0x134   : > { %989 = vst.msk [vmem:[#allocation3 + $0x68] sm:$0xff] %vm975_vm5, %v906_v22  ;;  %992 = vst.msk [vmem:[#allocation3 + $0x80] sm:$0xff] %vm975_vm5, %v912_v40 }
 0x135   : > { %1279 = vrot.lane.b32.xlu1 %v6836_v41, %s4570_s29  ;;  %1285 = vrot.lane.b32.xlu0 %v6837_v44, %s4570_s29  ;;  %v6851_v41 = vld [vmem:[#allocation31_spill] sm:$0xff]  ;;  %v6852_v44 = vld [vmem:[#allocation32_spill] sm:$0xff] }
 0x137   : > { %v910_v45 = vpop.permute.xlu1 %909  ;;  %v916_v48 = vpop.permute.xlu0 %915 }
 0x138   : > { %991 = vst.msk [vmem:[#allocation3 + $0x78] sm:$0xff] %vm975_vm5, %v910_v45  ;;  %994 = vst.msk [vmem:[#allocation3 + $0x90] sm:$0xff] %vm975_vm5, %v916_v48 }
 0x139   : > { %1283 = vrot.lane.b32.xlu1 %v6838_v49, %s4570_s29  ;;  %1289 = vrot.lane.b32.xlu0 %v6839_v52, %s4570_s29  ;;  %v5382_v49 = vld [vmem:[#allocation2 + $0x182] sm:$0xff] }
 0x13b   : > { %v914_v53 = vpop.permute.xlu1 %913  ;;  %v920_v0 = vpop.permute.xlu0 %919 }
 0x13c   : > { %993 = vst.msk [vmem:[#allocation3 + $0x88] sm:$0xff] %vm975_vm5, %v914_v53  ;;  %996 = vst.msk [vmem:[#allocation3 + $0xa0] sm:$0xff] %vm975_vm5, %v920_v0 }
 0x13d   : > { %1287 = vrot.lane.b32.xlu1 %v6840_v60, %s4570_s29  ;;  %1293 = vrot.lane.b32.xlu0 %v6841_v55, %s4570_s29 }
 0x13f   : > { %v918_v58 = vpop.permute.xlu1 %917  ;;  %v924_v13 = vpop.permute.xlu0 %923 }
 0x140   : > { %995 = vst.msk [vmem:[#allocation3 + $0x98] sm:$0xff] %vm975_vm5, %v918_v58  ;;  %998 = vst.msk [vmem:[#allocation3 + $0xb0] sm:$0xff] %vm975_vm5, %v924_v13 }
 0x141   : > { %1291 = vrot.lane.b32.xlu1 %v6842_v6, %s4570_s29  ;;  %1297 = vrot.lane.b32.xlu0 %v6843_v56, %s4570_s29 }
 0x143   : > { %v922_v57 = vpop.permute.xlu1 %921  ;;  %v928_v15 = vpop.permute.xlu0 %927 }
 0x144   : > { %997 = vst.msk [vmem:[#allocation3 + $0xa8] sm:$0xff] %vm975_vm5, %v922_v57  ;;  %1000 = vst.msk [vmem:[#allocation3 + $0xc0] sm:$0xff] %vm975_vm5, %v928_v15  ;;  %v4552_v15 = vld [vmem:[%s6758_s1 + $0x8] sm:$0xff]  }
 0x145   : > { %1295 = vrot.lane.b32.xlu1 %v6844_v61, %s4570_s29  ;;  %1301 = vrot.lane.b32.xlu0 %v6845_v62, %s4570_s29  ;;  %v1782_v61 = vld [vmem:[#allocation2 + $0x3a] sm:$0xff] }
 0x147   : > { %v926_v1 = vpop.permute.xlu1 %925  ;;  %v932_v2 = vpop.permute.xlu0 %931 }
 0x148   : > { %999 = vst.msk [vmem:[#allocation3 + $0xb8] sm:$0xff] %vm975_vm5, %v926_v1  ;;  %1002 = vst.msk [vmem:[#allocation3 + $0xd0] sm:$0xff] %vm975_vm5, %v932_v2  ;;  %v4553_v2 = vld [vmem:[%s6758_s1 + $0x10] ss:$0 sps:$4 sm:$0x33]  }
 0x149   : > { %1299 = vrot.lane.b32.xlu1 %v6846_v3, %s4570_s29  ;;  %1305 = vrot.lane.b32.xlu0 %v6847_v4, %s4570_s29  ;;  %v1781_v3 = vld [vmem:[#allocation2 + $0x32] sm:$0xff] }
 0x14a   : > { %v1784_v4 = vld [vmem:[#allocation2 + $0x52] sm:$0xff] }
 0x14b   : > { %v930_v7 = vpop.permute.xlu1 %929  ;;  %v936_v8 = vpop.permute.xlu0 %935 }
 0x14c   : > { %1001 = vst.msk [vmem:[#allocation3 + $0xc8] sm:$0xff] %vm975_vm5, %v930_v7  ;;  %1004 = vst.msk [vmem:[#allocation3 + $0xe0] sm:$0xff] %vm975_vm5, %v936_v8  ;;  %v2100_v7 = vsel %vm2098_vm8, %v4553_v2, 0 }
 0x14d   : > { %1303 = vrot.lane.b32.xlu1 %v6848_v9, %s4570_s29  ;;  %1309 = vrot.lane.b32.xlu0 %v6849_v10, %s4570_s29  ;;  %v1783_v10 = vld [vmem:[#allocation2 + $0x4a] sm:$0xff] }
 0x14f   : > { %v934_v16 = vpop.permute.xlu1 %933  ;;  %v940_v17 = vpop.permute.xlu0 %939 }
 0x150   : > { %1003 = vst.msk [vmem:[#allocation3 + $0xd8] sm:$0xff] %vm975_vm5, %v934_v16  ;;  %1006 = vst.msk [vmem:[#allocation3 + $0xf0] sm:$0xff] %vm975_vm5, %v940_v17  ;;  %v1593_v16 = vld [vmem:[#allocation2 + $0x69] sm:$0xff] }
 0x151   : > { %1307 = vrot.lane.b32.xlu1 %v6850_v21, %s4570_s29  ;;  %1313 = vrot.lane.b32.xlu0 %v5068_v59, %s4570_s29  ;;  %v6853_v59 = vld [vmem:[#allocation33_spill] sm:$0xff] }
 0x153   : > { %v938_v22 = vpop.permute.xlu1 %937  ;;  %v1073_v40 = vpop.permute.xlu0 %1072 }
 0x154   : > { %1005 = vst.msk [vmem:[#allocation3 + $0xe8] sm:$0xff] %vm975_vm5, %v938_v22  ;;  %v1592_v22 = vld [vmem:[#allocation2 + $0x61] sm:$0xff] }
 0x155   : > { %1169 = vst.msk [vmem:[#allocation3] sm:$0xff] %vm1168_vm6, %v1073_v40  ;;  %1311 = vrot.lane.b32.xlu1 %v6851_v41, %s4570_s29  ;;  %1317 = vrot.lane.b32.xlu0 %v6852_v44, %s4570_s29  ;;  %v1595_v40 = vld [vmem:[#allocation2 + $0x81] sm:$0xff] }
 0x157   : > { %v942_v45 = vpop.permute.xlu1 %941  ;;  %v1077_v48 = vpop.permute.xlu0 %1076 }
 0x158   : > { %1007 = vst.msk [vmem:[#allocation3 + $0xf8] sm:$0xff] %vm975_vm5, %v942_v45  ;;  %v1594_v45 = vld [vmem:[#allocation2 + $0x79] sm:$0xff] }
 0x159   : > { %1171 = vst.msk [vmem:[#allocation3 + $0x10] sm:$0xff] %vm1168_vm6, %v1077_v48  ;;  %1315 = vrot.lane.b32.xlu1 %v6853_v59, %s4570_s29  ;;  %1321 = vrot.lane.b32.xlu0 %v5086_v11, %s4570_s29  ;;  %v5396_v11 = vld [vmem:[#allocation2 + $0x18a] sm:$0xff] }
 0x15a   : > { %v1786_v48 = vld [vmem:[#allocation2 + $0x6a] sm:$0xff] }
 0x15b   : > { %v1075_v52 = vpop.permute.xlu1 %1074  ;;  %v1081_v53 = vpop.permute.xlu0 %1080 }
 0x15c   : > { %1170 = vst.msk [vmem:[#allocation3 + $0x8] sm:$0xff] %vm1168_vm6, %v1075_v52  ;;  %1173 = vst.msk [vmem:[#allocation3 + $0x20] sm:$0xff] %vm1168_vm6, %v1081_v53  ;;  %v1785_v53 = vld [vmem:[#allocation2 + $0x62] sm:$0xff] }
 0x15d   : > { %1319 = vrot.lane.b32.xlu1 %v5094_v5, %s4570_s29  ;;  %1325 = vrot.lane.b32.xlu0 %v5382_v49, %s4570_s29 }
 0x15f   : > { %v1079_v0 = vpop.permute.xlu1 %1078  ;;  %v1085_v60 = vpop.permute.xlu0 %1084 }
 0x160   : > { %1172 = vst.msk [vmem:[#allocation3 + $0x18] sm:$0xff] %vm1168_vm6, %v1079_v0  ;;  %1175 = vst.msk [vmem:[#allocation3 + $0x30] sm:$0xff] %vm1168_vm6, %v1085_v60  ;;  %v1788_v0 = vld [vmem:[#allocation2 + $0x82] sm:$0xff] }
 0x161   : > { %1323 = vrot.lane.b32.xlu1 %v5102_v63, %s4570_s29  ;;  %1459 = vrot.lane.b32.xlu0 %v4784_v14, %s4571_s30 }
 0x163   : > { %v1083_v55 = vpop.permute.xlu1 %1082  ;;  %v1089_v5 = vpop.permute.xlu0 %1088 }
 0x164   : > { %1174 = vst.msk [vmem:[#allocation3 + $0x28] sm:$0xff] %vm1168_vm6, %v1083_v55  ;;  %1177 = vst.msk [vmem:[#allocation3 + $0x40] sm:$0xff] %vm1168_vm6, %v1089_v5  ;;  %v1787_v5 = vld [vmem:[#allocation2 + $0x7a] sm:$0xff] }
 0x165   : > { %1327 = vrot.lane.b32.xlu1 %v5396_v11, %s4570_s29  ;;  %1463 = vrot.lane.b32.xlu0 %v4796_v18, %s4571_s30 }
 0x167   : > { %v1087_v58 = vpop.permute.xlu1 %1086  ;;  %v1093_v63 = vpop.permute.xlu0 %1092 }
 0x168   : > { %1176 = vst.msk [vmem:[#allocation3 + $0x38] sm:$0xff] %vm1168_vm6, %v1087_v58  ;;  %1179 = vst.msk [vmem:[#allocation3 + $0x50] sm:$0xff] %vm1168_vm6, %v1093_v63  ;;  %v1597_v58 = vld [vmem:[#allocation2 + $0x99] sm:$0xff] }
 0x169   : > { %1461 = vrot.lane.b32.xlu1 %v4800_v19, %s4571_s30  ;;  %1467 = vrot.lane.b32.xlu0 %v4802_v20, %s4571_s30 }
 0x16b   : > { %v1091_v14 = vpop.permute.xlu1 %1090  ;;  %v1097_v13 = vpop.permute.xlu0 %1096 }
 0x16c   : > { %1178 = vst.msk [vmem:[#allocation3 + $0x48] sm:$0xff] %vm1168_vm6, %v1091_v14  ;;  %1181 = vst.msk [vmem:[#allocation3 + $0x60] sm:$0xff] %vm1168_vm6, %v1097_v13  ;;  %v1596_v13 = vld [vmem:[#allocation2 + $0x91] sm:$0xff] }
 0x16d   : > { %1465 = vrot.lane.b32.xlu1 %v4812_v23, %s4571_s30  ;;  %1471 = vrot.lane.b32.xlu0 %v4814_v24, %s4571_s30 }
 0x16f   : > { %v1095_v18 = vpop.permute.xlu1 %1094  ;;  %v1101_v6 = vpop.permute.xlu0 %1100 }
 0x170   : > { %1180 = vst.msk [vmem:[#allocation3 + $0x58] sm:$0xff] %vm1168_vm6, %v1095_v18  ;;  %1183 = vst.msk [vmem:[#allocation3 + $0x70] sm:$0xff] %vm1168_vm6, %v1101_v6  ;;  %v1599_v18 = vld [vmem:[#allocation2 + $0xb1] sm:$0xff] }
 0x171   : > { %1469 = vrot.lane.b32.xlu1 %v4816_v25, %s4571_s30  ;;  %1475 = vrot.lane.b32.xlu0 %v4828_v26, %s4571_s30 }
 0x173   : > { %v1099_v19 = vpop.permute.xlu1 %1098  ;;  %v1105_v20 = vpop.permute.xlu0 %1104 }
 0x174   : > { %1182 = vst.msk [vmem:[#allocation3 + $0x68] sm:$0xff] %vm1168_vm6, %v1099_v19  ;;  %1185 = vst.msk [vmem:[#allocation3 + $0x80] sm:$0xff] %vm1168_vm6, %v1105_v20  ;;  %v1598_v20 = vld [vmem:[#allocation2 + $0xa9] sm:$0xff] }
 0x175   : > { %1473 = vrot.lane.b32.xlu1 %v4830_v27, %s4571_s30  ;;  %1479 = vrot.lane.b32.xlu0 %v4832_v28, %s4571_s30 }
 0x177   : > { %v1103_v23 = vpop.permute.xlu1 %1102  ;;  %v1109_v24 = vpop.permute.xlu0 %1108 }
 0x178   : > { %1184 = vst.msk [vmem:[#allocation3 + $0x78] sm:$0xff] %vm1168_vm6, %v1103_v23  ;;  %1187 = vst.msk [vmem:[#allocation3 + $0x90] sm:$0xff] %vm1168_vm6, %v1109_v24  ;;  %v1790_v23 = vld [vmem:[#allocation2 + $0x9a] sm:$0xff] }
 0x179   : > { %1477 = vrot.lane.b32.xlu1 %v4840_v29, %s4571_s30  ;;  %1483 = vrot.lane.b32.xlu0 %v4842_v30, %s4571_s30 }
 0x17b   : > { %v1107_v25 = vpop.permute.xlu1 %1106  ;;  %v1113_v26 = vpop.permute.xlu0 %1112 }
 0x17c   : > { %1186 = vst.msk [vmem:[#allocation3 + $0x88] sm:$0xff] %vm1168_vm6, %v1107_v25  ;;  %1189 = vst.msk [vmem:[#allocation3 + $0xa0] sm:$0xff] %vm1168_vm6, %v1113_v26  ;;  %v1789_v26 = vld [vmem:[#allocation2 + $0x92] sm:$0xff] }
 0x17d   : > { %1481 = vrot.lane.b32.xlu1 %v4844_v31, %s4571_s30  ;;  %1487 = vrot.lane.b32.xlu0 %v4852_v32, %s4571_s30 }
 0x17f   : > { %v1111_v27 = vpop.permute.xlu1 %1110  ;;  %v1117_v28 = vpop.permute.xlu0 %1116 }
 0x180   : > { %1188 = vst.msk [vmem:[#allocation3 + $0x98] sm:$0xff] %vm1168_vm6, %v1111_v27  ;;  %1191 = vst.msk [vmem:[#allocation3 + $0xb0] sm:$0xff] %vm1168_vm6, %v1117_v28  ;;  %v1792_v27 = vld [vmem:[#allocation2 + $0xb2] sm:$0xff] }
 0x181   : > { %1485 = vrot.lane.b32.xlu1 %v4854_v33, %s4571_s30  ;;  %1491 = vrot.lane.b32.xlu0 %v4856_v34, %s4571_s30 }
 0x183   : > { %v1115_v29 = vpop.permute.xlu1 %1114  ;;  %v1121_v30 = vpop.permute.xlu0 %1120 }
 0x184   : > { %1190 = vst.msk [vmem:[#allocation3 + $0xa8] sm:$0xff] %vm1168_vm6, %v1115_v29  ;;  %1193 = vst.msk [vmem:[#allocation3 + $0xc0] sm:$0xff] %vm1168_vm6, %v1121_v30  ;;  %v1791_v30 = vld [vmem:[#allocation2 + $0xaa] sm:$0xff] }
 0x185   : > { %1489 = vrot.lane.b32.xlu1 %v4864_v35, %s4571_s30  ;;  %1495 = vrot.lane.b32.xlu0 %v4866_v36, %s4571_s30 }
 0x187   : > { %v1119_v31 = vpop.permute.xlu1 %1118  ;;  %v1125_v32 = vpop.permute.xlu0 %1124 }
 0x188   : > { %1192 = vst.msk [vmem:[#allocation3 + $0xb8] sm:$0xff] %vm1168_vm6, %v1119_v31  ;;  %1195 = vst.msk [vmem:[#allocation3 + $0xd0] sm:$0xff] %vm1168_vm6, %v1125_v32  ;;  %v1601_v31 = vld [vmem:[#allocation2 + $0xc9] sm:$0xff] }
 0x189   : > { %1493 = vrot.lane.b32.xlu1 %v4868_v37, %s4571_s30  ;;  %1499 = vrot.lane.b32.xlu0 %v4880_v38, %s4571_s30 }
 0x18b   : > { %v1123_v33 = vpop.permute.xlu1 %1122  ;;  %v1129_v34 = vpop.permute.xlu0 %1128 }
 0x18c   : > { %1194 = vst.msk [vmem:[#allocation3 + $0xc8] sm:$0xff] %vm1168_vm6, %v1123_v33  ;;  %1197 = vst.msk [vmem:[#allocation3 + $0xe0] sm:$0xff] %vm1168_vm6, %v1129_v34  ;;  %v1600_v34 = vld [vmem:[#allocation2 + $0xc1] sm:$0xff] }
 0x18d   : > { %1497 = vrot.lane.b32.xlu1 %v4882_v39, %s4571_s30  ;;  %1503 = vrot.lane.b32.xlu0 %v4896_v42, %s4571_s30  ;;  %v1589_v39 = vld [vmem:[#allocation2 + $0x39] sm:$0xff] }
 0x18f   : > { %v1127_v35 = vpop.permute.xlu1 %1126  ;;  %v1133_v36 = vpop.permute.xlu0 %1132 }
 0x190   : > { %1196 = vst.msk [vmem:[#allocation3 + $0xd8] sm:$0xff] %vm1168_vm6, %v1127_v35  ;;  %1199 = vst.msk [vmem:[#allocation3 + $0xf0] sm:$0xff] %vm1168_vm6, %v1133_v36  ;;  %v1603_v35 = vld [vmem:[#allocation2 + $0xe1] sm:$0xff] }
 0x191   : > { %1501 = vrot.lane.b32.xlu1 %v4898_v43, %s4571_s30  ;;  %1507 = vrot.lane.b32.xlu0 %v4912_v46, %s4571_s30  ;;  %v4551_v43 = vld [vmem:[%s6758_s1] sm:$0xff]   ;;  %v1588_v46 = vld [vmem:[#allocation2 + $0x31] sm:$0xff] }
 0x192   : > { %4456 = vmatprep.subr.bf16.mxu0 %v4551_v43 }
 0x193   : > { %v1131_v37 = vpop.permute.xlu1 %1130  ;;  %v1266_v38 = vpop.permute.xlu0 %1265  ;;  %4457 = vmatpush3.bf16.msra.mxu0 %v4551_v43  ;;  %v1793_v43 = vld [vmem:[#allocation2 + $0xc2] sm:$0xff] }
 0x194   : > { %1198 = vst.msk [vmem:[#allocation3 + $0xe8] sm:$0xff] %vm1168_vm6, %v1131_v37  ;;  %4458 = vmatprep.subr.bf16.mxu0 %v4552_v15 }
 0x195   : > { %1362 = vst.msk [vmem:[#allocation3] sm:$0xff] %vm1361_vm7, %v1266_v38  ;;  %1505 = vrot.lane.b32.xlu1 %v4914_v47, %s4571_s30  ;;  %1511 = vrot.lane.b32.xlu0 %v4928_v50, %s4571_s30  ;;  %v1591_v47 = vld [vmem:[#allocation2 + $0x51] sm:$0xff]  ;;  %v1602_v38 = vld [vmem:[#allocation2 + $0xd9] sm:$0xff] }
 0x197   : > { %v1135_v42 = vpop.permute.xlu1 %1134  ;;  %v1270_v56 = vpop.permute.xlu0 %1269  ;;  %4459 = vmatpush3.bf16.msra.mxu0 %v4552_v15  ;;  %v1605_v15 = vld [vmem:[#allocation2 + $0xf9] sm:$0xff] }
 0x198   : > { %1200 = vst.msk [vmem:[#allocation3 + $0xf8] sm:$0xff] %vm1168_vm6, %v1135_v42  ;;  %4532 = vmatprep.subr.msk.bf16.mxu0 %vm2098_vm8, %v4553_v2 }
 0x199   : > { %1364 = vst.msk [vmem:[#allocation3 + $0x10] sm:$0xff] %vm1361_vm7, %v1270_v56  ;;  %1509 = vrot.lane.b32.xlu1 %v4930_v51, %s4571_s30  ;;  %1654 = vrot.lane.b32.xlu0 %v1589_v39, %s4572_s8  ;;  %v1590_v51 = vld [vmem:[#allocation2 + $0x49] sm:$0xff] }
 0x19a   : > { %v1794_v39 = vld [vmem:[#allocation2 + $0xca] sm:$0xff] }
 0x19b   : > { %v1268_v50 = vpop.permute.xlu1 %1267  ;;  %v1274_v57 = vpop.permute.xlu0 %1273  ;;  %4461 = vmatpush3.bf16.msra.mxu0 %v2100_v7  ;;  %v1798_v7 = vld [vmem:[#allocation2 + $0xfa] sm:$0xff] }
 0x19c   : > { %1363 = vst.msk [vmem:[#allocation3 + $0x8] sm:$0xff] %vm1361_vm7, %v1268_v50  ;;  %1366 = vst.msk [vmem:[#allocation3 + $0x20] sm:$0xff] %vm1361_vm7, %v1274_v57  ;;  %v1795_v57 = vld [vmem:[#allocation2 + $0xda] sm:$0xff] }
 0x19d   : > { %1652 = vrot.lane.b32.xlu1 %v1588_v46, %s4572_s8  ;;  %1658 = vrot.lane.b32.xlu0 %v1591_v47, %s4572_s8  ;;  %v1796_v46 = vld [vmem:[#allocation2 + $0xe2] sm:$0xff] }
 0x19f   : > { %v1272_v62 = vpop.permute.xlu1 %1271  ;;  %v1278_v1 = vpop.permute.xlu0 %1277 }
 0x1a0   : > { %1365 = vst.msk [vmem:[#allocation3 + $0x18] sm:$0xff] %vm1361_vm7, %v1272_v62  ;;  %1368 = vst.msk [vmem:[#allocation3 + $0x30] sm:$0xff] %vm1361_vm7, %v1278_v1  ;;  %v1604_v62 = vld [vmem:[#allocation2 + $0xf1] sm:$0xff] }
 0x1a1   : > { %1656 = vrot.lane.b32.xlu1 %v1590_v51, %s4572_s8  ;;  %1847 = vrot.lane.b32.xlu0 %v1782_v61, %s4573_s13  ;;  %v1607_v1 = vld [vmem:[#allocation2 + $0x111] sm:$0xff] }
 0x1a3   : > { %v1276_v8 = vpop.permute.xlu1 %1275  ;;  %v1282_v9 = vpop.permute.xlu0 %1281 }
 0x1a4   : > { %1367 = vst.msk [vmem:[#allocation3 + $0x28] sm:$0xff] %vm1361_vm7, %v1276_v8  ;;  %1370 = vst.msk [vmem:[#allocation3 + $0x40] sm:$0xff] %vm1361_vm7, %v1282_v9 }
 0x1a5   : > { %1845 = vrot.lane.b32.xlu1 %v1781_v3, %s4573_s13  ;;  %1851 = vrot.lane.b32.xlu0 %v1784_v4, %s4573_s13  ;;  %v1606_v4 = vld [vmem:[#allocation2 + $0x109] sm:$0xff] }
 0x1a7   : > { %v1280_v17 = vpop.permute.xlu1 %1279  ;;  %v1286_v21 = vpop.permute.xlu0 %1285 }
 0x1a8   : > { %1369 = vst.msk [vmem:[#allocation3 + $0x38] sm:$0xff] %vm1361_vm7, %v1280_v17  ;;  %1372 = vst.msk [vmem:[#allocation3 + $0x50] sm:$0xff] %vm1361_vm7, %v1286_v21 }
 0x1a9   : > { %1849 = vrot.lane.b32.xlu1 %v1783_v10, %s4573_s13  ;;  %1662 = vrot.lane.b32.xlu0 %v1593_v16, %s4572_s8  ;;  %v1797_v10 = vld [vmem:[#allocation2 + $0xf2] sm:$0xff] }
 0x1aa   : > { %v1800_v16 = vld [vmem:[#allocation2 + $0x112] sm:$0xff] }
 0x1ab   : > { %v1284_v41 = vpop.permute.xlu1 %1283  ;;  %v1290_v44 = vpop.permute.xlu0 %1289 }
 0x1ac   : > { %1371 = vst.msk [vmem:[#allocation3 + $0x48] sm:$0xff] %vm1361_vm7, %v1284_v41  ;;  %1374 = vst.msk [vmem:[#allocation3 + $0x60] sm:$0xff] %vm1361_vm7, %v1290_v44 }
 0x1ad   : > { %1660 = vrot.lane.b32.xlu1 %v1592_v22, %s4572_s8  ;;  %1666 = vrot.lane.b32.xlu0 %v1595_v40, %s4572_s8  ;;  %v1799_v22 = vld [vmem:[#allocation2 + $0x10a] sm:$0xff] }
 0x1ae   : > { %v1609_v40 = vld [vmem:[#allocation2 + $0x129] sm:$0xff] }
 0x1af   : > { %v1288_v59 = vpop.permute.xlu1 %1287  ;;  %v1294_v52 = vpop.permute.xlu0 %1293 }
 0x1b0   : > { %1373 = vst.msk [vmem:[#allocation3 + $0x58] sm:$0xff] %vm1361_vm7, %v1288_v59  ;;  %1376 = vst.msk [vmem:[#allocation3 + $0x70] sm:$0xff] %vm1361_vm7, %v1294_v52 }
 0x1b1   : > { %1664 = vrot.lane.b32.xlu1 %v1594_v45, %s4572_s8  ;;  %1855 = vrot.lane.b32.xlu0 %v1786_v48, %s4573_s13  ;;  %v1608_v45 = vld [vmem:[#allocation2 + $0x121] sm:$0xff] }
 0x1b2   : > { %v1611_v48 = vld [vmem:[#allocation2 + $0x141] sm:$0xff] }
 0x1b3   : > { %v1292_v60 = vpop.permute.xlu1 %1291  ;;  %v1298_v55 = vpop.permute.xlu0 %1297 }
 0x1b4   : > { %1375 = vst.msk [vmem:[#allocation3 + $0x68] sm:$0xff] %vm1361_vm7, %v1292_v60  ;;  %1378 = vst.msk [vmem:[#allocation3 + $0x80] sm:$0xff] %vm1361_vm7, %v1298_v55 }
 0x1b5   : > { %1853 = vrot.lane.b32.xlu1 %v1785_v53, %s4573_s13  ;;  %1859 = vrot.lane.b32.xlu0 %v1788_v0, %s4573_s13  ;;  %v1610_v53 = vld [vmem:[#allocation2 + $0x139] sm:$0xff]  ;;  %v1802_v0 = vld [vmem:[#allocation2 + $0x12a] sm:$0xff] }
 0x1b7   : > { %v1296_v63 = vpop.permute.xlu1 %1295  ;;  %v1302_v14 = vpop.permute.xlu0 %1301 }
 0x1b8   : > { %1377 = vst.msk [vmem:[#allocation3 + $0x78] sm:$0xff] %vm1361_vm7, %v1296_v63  ;;  %1380 = vst.msk [vmem:[#allocation3 + $0x90] sm:$0xff] %vm1361_vm7, %v1302_v14 }
 0x1b9   : > { %1857 = vrot.lane.b32.xlu1 %v1787_v5, %s4573_s13  ;;  %1670 = vrot.lane.b32.xlu0 %v1597_v58, %s4572_s8  ;;  %v1801_v5 = vld [vmem:[#allocation2 + $0x122] sm:$0xff] }
 0x1ba   : > { %v1804_v58 = vld [vmem:[#allocation2 + $0x142] sm:$0xff] }
 0x1bb   : > { %v1300_v6 = vpop.permute.xlu1 %1299  ;;  %v1306_v19 = vpop.permute.xlu0 %1305 }
 0x1bc   : > { %1379 = vst.msk [vmem:[#allocation3 + $0x88] sm:$0xff] %vm1361_vm7, %v1300_v6  ;;  %1382 = vst.msk [vmem:[#allocation3 + $0xa0] sm:$0xff] %vm1361_vm7, %v1306_v19 }
 0x1bd   : > { %1668 = vrot.lane.b32.xlu1 %v1596_v13, %s4572_s8  ;;  %1674 = vrot.lane.b32.xlu0 %v1599_v18, %s4572_s8  ;;  %v1803_v13 = vld [vmem:[#allocation2 + $0x13a] sm:$0xff]  ;;  %v1612_v18 = vld [vmem:[#allocation2 + $0x151] sm:$0xff] }
 0x1bf   : > { %v1304_v24 = vpop.permute.xlu1 %1303  ;;  %v1310_v25 = vpop.permute.xlu0 %1309 }
 0x1c0   : > { %1381 = vst.msk [vmem:[#allocation3 + $0x98] sm:$0xff] %vm1361_vm7, %v1304_v24  ;;  %1384 = vst.msk [vmem:[#allocation3 + $0xb0] sm:$0xff] %vm1361_vm7, %v1310_v25 }
 0x1c1   : > { %1672 = vrot.lane.b32.xlu1 %v1598_v20, %s4572_s8  ;;  %1863 = vrot.lane.b32.xlu0 %v1790_v23, %s4573_s13  ;;  %v1422_v20 = vld [vmem:[#allocation2 + $0x170] sm:$0xff] }
 0x1c2   : > { %v1614_v23 = vld [vmem:[#allocation2 + $0x169] sm:$0xff] }
 0x1c3   : > { %v1308_v28 = vpop.permute.xlu1 %1307  ;;  %v1314_v29 = vpop.permute.xlu0 %1313 }
 0x1c4   : > { %1383 = vst.msk [vmem:[#allocation3 + $0xa8] sm:$0xff] %vm1361_vm7, %v1308_v28  ;;  %1386 = vst.msk [vmem:[#allocation3 + $0xc0] sm:$0xff] %vm1361_vm7, %v1314_v29 }
 0x1c5   : > { %1861 = vrot.lane.b32.xlu1 %v1789_v26, %s4573_s13  ;;  %1867 = vrot.lane.b32.xlu0 %v1792_v27, %s4573_s13  ;;  %v1613_v26 = vld [vmem:[#allocation2 + $0x159] sm:$0xff] }
 0x1c6   : > { %v1805_v27 = vld [vmem:[#allocation2 + $0x152] sm:$0xff] }
 0x1c7   : > { %v1312_v32 = vpop.permute.xlu1 %1311  ;;  %v1318_v33 = vpop.permute.xlu0 %1317 }
 0x1c8   : > { %1385 = vst.msk [vmem:[#allocation3 + $0xb8] sm:$0xff] %vm1361_vm7, %v1312_v32  ;;  %1388 = vst.msk [vmem:[#allocation3 + $0xd0] sm:$0xff] %vm1361_vm7, %v1318_v33 }
 0x1c9   : > { %1865 = vrot.lane.b32.xlu1 %v1791_v30, %s4573_s13  ;;  %1678 = vrot.lane.b32.xlu0 %v1601_v31, %s4572_s8  ;;  %v1615_v30 = vld [vmem:[#allocation2 + $0x171] sm:$0xff] }
 0x1ca   : > { %v1807_v31 = vld [vmem:[#allocation2 + $0x16a] sm:$0xff] }
 0x1cb   : > { %v1316_v36 = vpop.permute.xlu1 %1315  ;;  %v1322_v37 = vpop.permute.xlu0 %1321 }
 0x1cc   : > { %1387 = vst.msk [vmem:[#allocation3 + $0xc8] sm:$0xff] %vm1361_vm7, %v1316_v36  ;;  %1390 = vst.msk [vmem:[#allocation3 + $0xe0] sm:$0xff] %vm1361_vm7, %v1322_v37 }
 0x1cd   : > { %1676 = vrot.lane.b32.xlu1 %v1600_v34, %s4572_s8  ;;  %1682 = vrot.lane.b32.xlu0 %v1603_v35, %s4572_s8  ;;  %v1806_v34 = vld [vmem:[#allocation2 + $0x15a] sm:$0xff] }
 0x1ce   : > { %v1423_v35 = vld [vmem:[#allocation2 + $0x180] sm:$0xff] }
 0x1cf   : > { %v1320_v42 = vpop.permute.xlu1 %1319  ;;  %v1326_v56 = vpop.permute.xlu0 %1325 }
 0x1d0   : > { %1389 = vst.msk [vmem:[#allocation3 + $0xd8] sm:$0xff] %vm1361_vm7, %v1320_v42  ;;  %1392 = vst.msk [vmem:[#allocation3 + $0xf0] sm:$0xff] %vm1361_vm7, %v1326_v56 }
 0x1d1   : > { %1680 = vrot.lane.b32.xlu1 %v1602_v38, %s4572_s8  ;;  %1871 = vrot.lane.b32.xlu0 %v1794_v39, %s4573_s13  ;;  %v1808_v38 = vld [vmem:[#allocation2 + $0x172] sm:$0xff] }
 0x1d2   : > { %v1425_v39 = vld [vmem:[#allocation2 + $0x198] sm:$0xff] }
 0x1d3   : > { %v1324_v47 = vpop.permute.xlu1 %1323  ;;  %v1460_v50 = vpop.permute.xlu0 %1459 }
 0x1d4   : > { %1391 = vst.msk [vmem:[#allocation3 + $0xe8] sm:$0xff] %vm1361_vm7, %v1324_v47 }
 0x1d5   : > { %1556 = vst.msk [vmem:[#allocation3] sm:$0xff] %vm1555_vm9, %v1460_v50  ;;  %1869 = vrot.lane.b32.xlu1 %v1793_v43, %s4573_s13  ;;  %1875 = vrot.lane.b32.xlu0 %v1796_v46, %s4573_s13  ;;  %v1424_v43 = vld [vmem:[#allocation2 + $0x188] sm:$0xff]  ;;  %v1426_v50 = vld [vmem:[#allocation2 + $0x1a0] sm:$0xff] }
 0x1d7   : > { %v1328_v51 = vpop.permute.xlu1 %1327  ;;  %v1464_v61 = vpop.permute.xlu0 %1463 }
 0x1d8   : > { %1393 = vst.msk [vmem:[#allocation3 + $0xf8] sm:$0xff] %vm1361_vm7, %v1328_v51 }
 0x1d9   : > { %1558 = vst.msk [vmem:[#allocation3 + $0x10] sm:$0xff] %vm1555_vm9, %v1464_v61  ;;  %1873 = vrot.lane.b32.xlu1 %v1795_v57, %s4573_s13  ;;  %1686 = vrot.lane.b32.xlu0 %v1605_v15, %s4572_s8  ;;  %v1618_v57 = vld [vmem:[#allocation2 + $0x199] sm:$0xff] }
 0x1db   : > { %v1462_v2 = vpop.permute.xlu1 %1461  ;;  %v1468_v3 = vpop.permute.xlu0 %1467 }
 0x1dc   : > { %1557 = vst.msk [vmem:[#allocation3 + $0x8] sm:$0xff] %vm1555_vm9, %v1462_v2  ;;  %1560 = vst.msk [vmem:[#allocation3 + $0x20] sm:$0xff] %vm1555_vm9, %v1468_v3 }
 0x1dd   : > { %1684 = vrot.lane.b32.xlu1 %v1604_v62, %s4572_s8  ;;  %1690 = vrot.lane.b32.xlu0 %v1607_v1, %s4572_s8  ;;  %v1811_v1 = vld [vmem:[#allocation2 + $0x19a] sm:$0xff] }
 0x1df   : > { %v1466_v8 = vpop.permute.xlu1 %1465  ;;  %v1472_v9 = vpop.permute.xlu0 %1471 }
 0x1e0   : > { %1559 = vst.msk [vmem:[#allocation3 + $0x18] sm:$0xff] %vm1555_vm9, %v1466_v8  ;;  %1562 = vst.msk [vmem:[#allocation3 + $0x30] sm:$0xff] %vm1555_vm9, %v1472_v9 }
 0x1e1   : > { %1688 = vrot.lane.b32.xlu1 %v1606_v4, %s4572_s8  ;;  %1879 = vrot.lane.b32.xlu0 %v1798_v7, %s4573_s13 }
 0x1e3   : > { %v1470_v17 = vpop.permute.xlu1 %1469  ;;  %v1476_v21 = vpop.permute.xlu0 %1475 }
 0x1e4   : > { %1561 = vst.msk [vmem:[#allocation3 + $0x28] sm:$0xff] %vm1555_vm9, %v1470_v17  ;;  %1564 = vst.msk [vmem:[#allocation3 + $0x40] sm:$0xff] %vm1555_vm9, %v1476_v21 }
 0x1e5   : > { %1877 = vrot.lane.b32.xlu1 %v1797_v10, %s4573_s13  ;;  %1883 = vrot.lane.b32.xlu0 %v1800_v16, %s4573_s13  ;;  %v1812_v10 = vld [vmem:[#allocation2 + $0x1a2] sm:$0xff] }
 0x1e7   : > { %v1474_v41 = vpop.permute.xlu1 %1473  ;;  %v1480_v44 = vpop.permute.xlu0 %1479 }
 0x1e8   : > { %1563 = vst.msk [vmem:[#allocation3 + $0x38] sm:$0xff] %vm1555_vm9, %v1474_v41  ;;  %1566 = vst.msk [vmem:[#allocation3 + $0x50] sm:$0xff] %vm1555_vm9, %v1480_v44 }
 0x1e9   : > { %1881 = vrot.lane.b32.xlu1 %v1799_v22, %s4573_s13  ;;  %1694 = vrot.lane.b32.xlu0 %v1609_v40, %s4572_s8 }
 0x1eb   : > { %v1478_v59 = vpop.permute.xlu1 %1477  ;;  %v1484_v52 = vpop.permute.xlu0 %1483 }
 0x1ec   : > { %1565 = vst.msk [vmem:[#allocation3 + $0x48] sm:$0xff] %vm1555_vm9, %v1478_v59  ;;  %1568 = vst.msk [vmem:[#allocation3 + $0x60] sm:$0xff] %vm1555_vm9, %v1484_v52 }
 0x1ed   : > { %1692 = vrot.lane.b32.xlu1 %v1608_v45, %s4572_s8  ;;  %1698 = vrot.lane.b32.xlu0 %v1611_v48, %s4572_s8 }
 0x1ef   : > { %v1482_v60 = vpop.permute.xlu1 %1481  ;;  %v1488_v55 = vpop.permute.xlu0 %1487 }
 0x1f0   : > { %1567 = vst.msk [vmem:[#allocation3 + $0x58] sm:$0xff] %vm1555_vm9, %v1482_v60  ;;  %1570 = vst.msk [vmem:[#allocation3 + $0x70] sm:$0xff] %vm1555_vm9, %v1488_v55 }
 0x1f1   : > { %1696 = vrot.lane.b32.xlu1 %v1610_v53, %s4572_s8  ;;  %1887 = vrot.lane.b32.xlu0 %v1802_v0, %s4573_s13 }
 0x1f3   : > { %v1486_v63 = vpop.permute.xlu1 %1485  ;;  %v1492_v14 = vpop.permute.xlu0 %1491 }
 0x1f4   : > { %1569 = vst.msk [vmem:[#allocation3 + $0x68] sm:$0xff] %vm1555_vm9, %v1486_v63  ;;  %1572 = vst.msk [vmem:[#allocation3 + $0x80] sm:$0xff] %vm1555_vm9, %v1492_v14 }
 0x1f5   : > { %1885 = vrot.lane.b32.xlu1 %v1801_v5, %s4573_s13  ;;  %1891 = vrot.lane.b32.xlu0 %v1804_v58, %s4573_s13 }
 0x1f7   : > { %v1490_v6 = vpop.permute.xlu1 %1489  ;;  %v1496_v19 = vpop.permute.xlu0 %1495 }
 0x1f8   : > { %1571 = vst.msk [vmem:[#allocation3 + $0x78] sm:$0xff] %vm1555_vm9, %v1490_v6  ;;  %1574 = vst.msk [vmem:[#allocation3 + $0x90] sm:$0xff] %vm1555_vm9, %v1496_v19 }
 0x1f9   : > { %1889 = vrot.lane.b32.xlu1 %v1803_v13, %s4573_s13  ;;  %1700 = vrot.lane.b32.xlu0 %v1612_v18, %s4572_s8 }
 0x1fb   : > { %v1494_v24 = vpop.permute.xlu1 %1493  ;;  %v1500_v25 = vpop.permute.xlu0 %1499 }
 0x1fc   : > { %1573 = vst.msk [vmem:[#allocation3 + $0x88] sm:$0xff] %vm1555_vm9, %v1494_v24  ;;  %1576 = vst.msk [vmem:[#allocation3 + $0xa0] sm:$0xff] %vm1555_vm9, %v1500_v25 }
 0x1fd   : > { %1513 = vrot.lane.b32.xlu1 %v1422_v20, %s4571_s30  ;;  %1704 = vrot.lane.b32.xlu0 %v1614_v23, %s4572_s8 }
 0x1ff   : > { %v1498_v28 = vpop.permute.xlu1 %1497  ;;  %v1504_v29 = vpop.permute.xlu0 %1503 }
 0x200   : > { %1575 = vst.msk [vmem:[#allocation3 + $0x98] sm:$0xff] %vm1555_vm9, %v1498_v28  ;;  %1578 = vst.msk [vmem:[#allocation3 + $0xb0] sm:$0xff] %vm1555_vm9, %v1504_v29 }
 0x201   : > { %1702 = vrot.lane.b32.xlu1 %v1613_v26, %s4572_s8  ;;  %1893 = vrot.lane.b32.xlu0 %v1805_v27, %s4573_s13 }
 0x203   : > { %v1502_v32 = vpop.permute.xlu1 %1501  ;;  %v1508_v33 = vpop.permute.xlu0 %1507 }
 0x204   : > { %1577 = vst.msk [vmem:[#allocation3 + $0xa8] sm:$0xff] %vm1555_vm9, %v1502_v32  ;;  %1580 = vst.msk [vmem:[#allocation3 + $0xc0] sm:$0xff] %vm1555_vm9, %v1508_v33 }
 0x205   : > { %1706 = vrot.lane.b32.xlu1 %v1615_v30, %s4572_s8  ;;  %1897 = vrot.lane.b32.xlu0 %v1807_v31, %s4573_s13 }
 0x207   : > { %v1506_v36 = vpop.permute.xlu1 %1505  ;;  %v1512_v37 = vpop.permute.xlu0 %1511 }
 0x208   : > { %1579 = vst.msk [vmem:[#allocation3 + $0xb8] sm:$0xff] %vm1555_vm9, %v1506_v36  ;;  %1582 = vst.msk [vmem:[#allocation3 + $0xd0] sm:$0xff] %vm1555_vm9, %v1512_v37 }
 0x209   : > { %1895 = vrot.lane.b32.xlu1 %v1806_v34, %s4573_s13  ;;  %1515 = vrot.lane.b32.xlu0 %v1423_v35, %s4571_s30 }
 0x20b   : > { %v1510_v42 = vpop.permute.xlu1 %1509  ;;  %v1655_v56 = vpop.permute.xlu0 %1654 }
 0x20c   : > { %1581 = vst.msk [vmem:[#allocation3 + $0xc8] sm:$0xff] %vm1555_vm9, %v1510_v42 }
 0x20d   : > { %1750 = vst.msk [vmem:[#allocation3 + $0x8] sm:$0xff] %vm1748_vm10, %v1655_v56  ;;  %1899 = vrot.lane.b32.xlu1 %v1808_v38, %s4573_s13  ;;  %1519 = vrot.lane.b32.xlu0 %v1425_v39, %s4571_s30 }
 0x20f   : > { %v1653_v46 = vpop.permute.xlu1 %1652  ;;  %v1659_v47 = vpop.permute.xlu0 %1658 }
 0x210   : > { %1749 = vst.msk [vmem:[#allocation3] sm:$0xff] %vm1748_vm10, %v1653_v46  ;;  %1752 = vst.msk [vmem:[#allocation3 + $0x18] sm:$0xff] %vm1748_vm10, %v1659_v47 }
 0x211   : > { %1517 = vrot.lane.b32.xlu1 %v1424_v43, %s4571_s30  ;;  %1708 = vrot.lane.b32.xlu0 %v5282_v12, %s4572_s8  ;;  %v1619_v12 = vld [vmem:[#allocation2 + $0x1a1] sm:$0xff] }
 0x213   : > { %v1657_v15 = vpop.permute.xlu1 %1656  ;;  %v1848_v51 = vpop.permute.xlu0 %1847 }
 0x214   : > { %1751 = vst.msk [vmem:[#allocation3 + $0x10] sm:$0xff] %vm1748_vm10, %v1657_v15 }
 0x215   : > { %1943 = vst.msk [vmem:[#allocation3 + $0x8] sm:$0xff] %vm1941_vm11, %v1848_v51  ;;  %1521 = vrot.lane.b32.xlu1 %v1426_v50, %s4571_s30  ;;  %1712 = vrot.lane.b32.xlu0 %v1618_v57, %s4572_s8 }
 0x217   : > { %v1846_v61 = vpop.permute.xlu1 %1845  ;;  %v1852_v62 = vpop.permute.xlu0 %1851 }
 0x218   : > { %1942 = vst.msk [vmem:[#allocation3] sm:$0xff] %vm1941_vm11, %v1846_v61  ;;  %1945 = vst.msk [vmem:[#allocation3 + $0x18] sm:$0xff] %vm1941_vm11, %v1852_v62 }
 0x219   : > { %1710 = vrot.lane.b32.xlu1 %v5296_v54, %s4572_s8  ;;  %1901 = vrot.lane.b32.xlu0 %v5382_v49, %s4573_s13 }
 0x21b   : > { %v1850_v2 = vpop.permute.xlu1 %1849  ;;  %v1663_v3 = vpop.permute.xlu0 %1662 }
 0x21c   : > { %1944 = vst.msk [vmem:[#allocation3 + $0x10] sm:$0xff] %vm1941_vm11, %v1850_v2  ;;  %v1975_v4 = vld [vmem:[#allocation3 + $0x8] sm:$0xff] }
 0x21d   : > { %1754 = vst.msk [vmem:[#allocation3 + $0x28] sm:$0xff] %vm1748_vm10, %v1663_v3  ;;  %1714 = vrot.lane.b32.xlu1 %v1619_v12, %s4572_s8  ;;  %1905 = vrot.lane.b32.xlu0 %v1811_v1, %s4573_s13 }
 0x21f   : > { %v1661_v7 = vpop.permute.xlu1 %1660  ;;  %v1974_v8 = vld [vmem:[#allocation3] sm:$0xff]  ;;  %v1667_v54 = vpop.permute.xlu0 %1666  ;;  %v1977_v9 = vld [vmem:[#allocation3 + $0x18] sm:$0xff] }
 0x220   : > { %1753 = vst.msk [vmem:[#allocation3 + $0x20] sm:$0xff] %vm1748_vm10, %v1661_v7  ;;  %v2006_v49 = vpack.c.bf16 %v1975_v4, %v1974_v8  ;;  %1756 = vst.msk [vmem:[#allocation3 + $0x38] sm:$0xff] %vm1748_vm10, %v1667_v54 }
 0x221   : > { %1903 = vrot.lane.b32.xlu1 %v5396_v11, %s4573_s13 }
 0x222   : > { %4462 = vmatprep.mubr.msk.bf16.mxu0 %vm2049_vm12, %v2006_v49 }
 0x223   : > { %v1665_v16 = vpop.permute.xlu1 %1664  ;;  %v1976_v17 = vld [vmem:[#allocation3 + $0x10] sm:$0xff]  ;;  %v1856_v21 = vpop.permute.xlu0 %1855 }
 0x224   : > { %1755 = vst.msk [vmem:[#allocation3 + $0x30] sm:$0xff] %vm1748_vm10, %v1665_v16  ;;  %v2007_v22 = vpack.c.bf16 %v1977_v9, %v1976_v17 }
 0x225   : > { %1947 = vst.msk [vmem:[#allocation3 + $0x28] sm:$0xff] %vm1941_vm11, %v1856_v21  ;;  %1907 = vrot.lane.b32.xlu1 %v1812_v10, %s4573_s13 }
 0x226   : > { %4463 = vmatmul.mubr.msk.bf16.vlgmr.msra.gmra.mrb[0].mxu0 %vm2049_vm12, %v2007_v22 }
 0x227   : > { %v1854_v40 = vpop.permute.xlu1 %1853  ;;  %v1860_v41 = vpop.permute.xlu0 %1859 }
 0x228   : > { %1946 = vst.msk [vmem:[#allocation3 + $0x20] sm:$0xff] %vm1941_vm11, %v1854_v40  ;;  %1949 = vst.msk [vmem:[#allocation3 + $0x38] sm:$0xff] %vm1941_vm11, %v1860_v41 }
 0x22b   : > { %v1858_v11 = vpop.permute.xlu1 %1857  ;;  %v1671_v44 = vpop.permute.xlu0 %1670 }
 0x22c   : > { %1948 = vst.msk [vmem:[#allocation3 + $0x30] sm:$0xff] %vm1941_vm11, %v1858_v11  ;;  %v1979_v45 = vld [vmem:[#allocation3 + $0x28] sm:$0xff] }
 0x22d   : > { %1758 = vst.msk [vmem:[#allocation3 + $0x48] sm:$0xff] %vm1748_vm10, %v1671_v44 }
 0x22f   : > { %v1669_v48 = vpop.permute.xlu1 %1668  ;;  %v1978_v59 = vld [vmem:[#allocation3 + $0x20] sm:$0xff]  ;;  %v1675_v52 = vpop.permute.xlu0 %1674  ;;  %v1981_v0 = vld [vmem:[#allocation3 + $0x38] sm:$0xff] }
 0x230   : > { %1757 = vst.msk [vmem:[#allocation3 + $0x40] sm:$0xff] %vm1748_vm10, %v1669_v48  ;;  %v2008_v53 = vpack.c.bf16 %v1979_v45, %v1978_v59  ;;  %1760 = vst.msk [vmem:[#allocation3 + $0x58] sm:$0xff] %vm1748_vm10, %v1675_v52 }
 0x232   : > { %4466 = vmatprep.mubr.msk.bf16.mxu0 %vm2049_vm12, %v2008_v53 }
 0x233   : > { %v1673_v60 = vpop.permute.xlu1 %1672  ;;  %v1980_v55 = vld [vmem:[#allocation3 + $0x30] sm:$0xff]  ;;  %v1864_v5 = vpop.permute.xlu0 %1863 }
 0x234   : > { %1759 = vst.msk [vmem:[#allocation3 + $0x50] sm:$0xff] %vm1748_vm10, %v1673_v60  ;;  %v2009_v58 = vpack.c.bf16 %v1981_v0, %v1980_v55 }
 0x235   : > { %1951 = vst.msk [vmem:[#allocation3 + $0x48] sm:$0xff] %vm1941_vm11, %v1864_v5 }
 0x236   : > { %4467 = vmatmul.mubr.msk.bf16.gmra.mrb[4].mxu0 %vm2049_vm12, %v2009_v58  ;;  %v2391_v58 = vld [vmem:[#allocation2 + $0x1] sm:$0xff] }
 0x237   : > { %v1862_v63 = vpop.permute.xlu1 %1861  ;;  %v1868_v14 = vpop.permute.xlu0 %1867  ;;  %2455 = vrot.lane.b32.xlu0 %v2391_v58, %s4566_s25 }
 0x238   : > { %1950 = vst.msk [vmem:[#allocation3 + $0x40] sm:$0xff] %vm1941_vm11, %v1862_v63  ;;  %1953 = vst.msk [vmem:[#allocation3 + $0x58] sm:$0xff] %vm1941_vm11, %v1868_v14  ;;  %v2392_v63 = vld [vmem:[#allocation2 + $0x9] sm:$0xff] }
 0x239   : > { %2457 = vrot.lane.b32.xlu1 %v2392_v63, %s4566_s25 }
 0x23b   : > { %v1866_v13 = vpop.permute.xlu1 %1865  ;;  %v1679_v18 = vpop.permute.xlu0 %1678 }
 0x23c   : > { %1952 = vst.msk [vmem:[#allocation3 + $0x50] sm:$0xff] %vm1941_vm11, %v1866_v13  ;;  %v1983_v6 = vld [vmem:[#allocation3 + $0x48] sm:$0xff] }
 0x23d   : > { %1762 = vst.msk [vmem:[#allocation3 + $0x68] sm:$0xff] %vm1748_vm10, %v1679_v18 }
 0x23f   : > { %v1677_v19 = vpop.permute.xlu1 %1676  ;;  %v1982_v20 = vld [vmem:[#allocation3 + $0x40] sm:$0xff]  ;;  %v1683_v23 = vpop.permute.xlu0 %1682  ;;  %v1985_v25 = vld [vmem:[#allocation3 + $0x58] sm:$0xff] }
 0x240   : > { %1761 = vst.msk [vmem:[#allocation3 + $0x60] sm:$0xff] %vm1748_vm10, %v1677_v19  ;;  %v2010_v24 = vpack.c.bf16 %v1983_v6, %v1982_v20  ;;  %1764 = vst.msk [vmem:[#allocation3 + $0x78] sm:$0xff] %vm1748_vm10, %v1683_v23 }
 0x242   : > { %4470 = vmatprep.mubr.msk.bf16.mxu0 %vm2049_vm12, %v2010_v24 }
 0x243   : > { %v1681_v26 = vpop.permute.xlu1 %1680  ;;  %v1984_v27 = vld [vmem:[#allocation3 + $0x50] sm:$0xff]  ;;  %v1872_v28 = vpop.permute.xlu0 %1871 }
 0x244   : > { %1763 = vst.msk [vmem:[#allocation3 + $0x70] sm:$0xff] %vm1748_vm10, %v1681_v26  ;;  %v2011_v29 = vpack.c.bf16 %v1985_v25, %v1984_v27 }
 0x245   : > { %1955 = vst.msk [vmem:[#allocation3 + $0x68] sm:$0xff] %vm1941_vm11, %v1872_v28 }
 0x246   : > { %4471 = vmatmul.mubr.msk.bf16.gmra.mrb[8].mxu0 %vm2049_vm12, %v2011_v29 }
 0x247   : > { %v1870_v30 = vpop.permute.xlu1 %1869  ;;  %v1876_v31 = vpop.permute.xlu0 %1875 }
 0x248   : > { %1954 = vst.msk [vmem:[#allocation3 + $0x60] sm:$0xff] %vm1941_vm11, %v1870_v30  ;;  %1957 = vst.msk [vmem:[#allocation3 + $0x78] sm:$0xff] %vm1941_vm11, %v1876_v31 }
 0x24b   : > { %v1874_v32 = vpop.permute.xlu1 %1873  ;;  %v1687_v33 = vpop.permute.xlu0 %1686 }
 0x24c   : > { %1956 = vst.msk [vmem:[#allocation3 + $0x70] sm:$0xff] %vm1941_vm11, %v1874_v32  ;;  %v1987_v34 = vld [vmem:[#allocation3 + $0x68] sm:$0xff] }
 0x24d   : > { %1766 = vst.msk [vmem:[#allocation3 + $0x88] sm:$0xff] %vm1748_vm10, %v1687_v33 }
 0x24f   : > { %v1685_v35 = vpop.permute.xlu1 %1684  ;;  %v1986_v36 = vld [vmem:[#allocation3 + $0x60] sm:$0xff]  ;;  %v1691_v37 = vpop.permute.xlu0 %1690  ;;  %v1989_v39 = vld [vmem:[#allocation3 + $0x78] sm:$0xff] }
 0x250   : > { %1765 = vst.msk [vmem:[#allocation3 + $0x80] sm:$0xff] %vm1748_vm10, %v1685_v35  ;;  %v2012_v38 = vpack.c.bf16 %v1987_v34, %v1986_v36  ;;  %1768 = vst.msk [vmem:[#allocation3 + $0x98] sm:$0xff] %vm1748_vm10, %v1691_v37 }
 0x252   : > { %4474 = vmatprep.mubr.msk.bf16.mxu0 %vm2049_vm12, %v2012_v38  ;;  %v2327_v38 = vld [vmem:[#allocation2] sm:$0xff] }
 0x253   : > { %v1689_v42 = vpop.permute.xlu1 %1688  ;;  %v1988_v56 = vld [vmem:[#allocation3 + $0x70] sm:$0xff]  ;;  %v1880_v43 = vpop.permute.xlu0 %1879  ;;  %2359 = vst.msk [vmem:[#allocation3] sm:$0xff] %vm226_vm0, %v2327_v38 }
 0x254   : > { %1767 = vst.msk [vmem:[#allocation3 + $0x90] sm:$0xff] %vm1748_vm10, %v1689_v42  ;;  %v2013_v46 = vpack.c.bf16 %v1989_v39, %v1988_v56  ;;  %v5713_v42 = vld [vmem:[%s6759_s2] ss:$0 sm:$0xff] }
 0x255   : > { %1959 = vst.msk [vmem:[#allocation3 + $0x88] sm:$0xff] %vm1941_vm11, %v1880_v43 }
 0x256   : > { %4475 = vmatmul.mubr.msk.bf16.gmra.mrb[12].mxu0 %vm2049_vm12, %v2013_v46 }
 0x257   : > { %v1878_v47 = vpop.permute.xlu1 %1877  ;;  %v1884_v50 = vpop.permute.xlu0 %1883 }
 0x258   : > { %1958 = vst.msk [vmem:[#allocation3 + $0x80] sm:$0xff] %vm1941_vm11, %v1878_v47  ;;  %1961 = vst.msk [vmem:[#allocation3 + $0x98] sm:$0xff] %vm1941_vm11, %v1884_v50 }
 0x25b   : > { %v1882_v57 = vpop.permute.xlu1 %1881  ;;  %v1695_v15 = vpop.permute.xlu0 %1694 }
 0x25c   : > { %1960 = vst.msk [vmem:[#allocation3 + $0x90] sm:$0xff] %vm1941_vm11, %v1882_v57  ;;  %v1991_v51 = vld [vmem:[#allocation3 + $0x88] sm:$0xff]  ;;  %v2328_v57 = vld [vmem:[#allocation2 + $0x8] sm:$0xff] }
 0x25d   : > { %1770 = vst.msk [vmem:[#allocation3 + $0xa8] sm:$0xff] %vm1748_vm10, %v1695_v15 }
 0x25e   : > { %2360 = vst.msk [vmem:[#allocation3 + $0x8] sm:$0xff] %vm226_vm0, %v2328_v57 }
 0x25f   : > { %v1693_v61 = vpop.permute.xlu1 %1692  ;;  %v1990_v62 = vld [vmem:[#allocation3 + $0x80] sm:$0xff]  ;;  %v1699_v12 = vpop.permute.xlu0 %1698  ;;  %v1993_v2 = vld [vmem:[#allocation3 + $0x98] sm:$0xff] }
 0x260   : > { %1769 = vst.msk [vmem:[#allocation3 + $0xa0] sm:$0xff] %vm1748_vm10, %v1693_v61  ;;  %v2014_v1 = vpack.c.bf16 %v1991_v51, %v1990_v62  ;;  %1772 = vst.msk [vmem:[#allocation3 + $0xb8] sm:$0xff] %vm1748_vm10, %v1699_v12 }
 0x262   : > { %4478 = vmatprep.mubr.msk.bf16.mxu0 %vm2049_vm12, %v2014_v1 }
 0x263   : > { %v1697_v3 = vpop.permute.xlu1 %1696  ;;  %v1992_v4 = vld [vmem:[#allocation3 + $0x90] sm:$0xff]  ;;  %v1888_v7 = vpop.permute.xlu0 %1887 }
 0x264   : > { %1771 = vst.msk [vmem:[#allocation3 + $0xb0] sm:$0xff] %vm1748_vm10, %v1697_v3  ;;  %v2015_v8 = vpack.c.bf16 %v1993_v2, %v1992_v4 }
 0x265   : > { %1963 = vst.msk [vmem:[#allocation3 + $0xa8] sm:$0xff] %vm1941_vm11, %v1888_v7 }
 0x266   : > { %4479 = vmatmul.mubr.msk.bf16.gmra.mrb[16].mxu0 %vm2049_vm12, %v2015_v8 }
 0x267   : > { %v1886_v54 = vpop.permute.xlu1 %1885  ;;  %v1892_v49 = vpop.permute.xlu0 %1891 }
 0x268   : > { %1962 = vst.msk [vmem:[#allocation3 + $0xa0] sm:$0xff] %vm1941_vm11, %v1886_v54  ;;  %1965 = vst.msk [vmem:[#allocation3 + $0xb8] sm:$0xff] %vm1941_vm11, %v1892_v49 }
 0x26b   : > { %v1890_v9 = vpop.permute.xlu1 %1889  ;;  %v1701_v10 = vpop.permute.xlu0 %1700 }
 0x26c   : > { %1964 = vst.msk [vmem:[#allocation3 + $0xb0] sm:$0xff] %vm1941_vm11, %v1890_v9  ;;  %v1995_v16 = vld [vmem:[#allocation3 + $0xa8] sm:$0xff] }
 0x26d   : > { %1773 = vst.msk [vmem:[#allocation3 + $0xc0] sm:$0xff] %vm1748_vm10, %v1701_v10 }
 0x26f   : > { %v1514_v17 = vpop.permute.xlu1 %1513  ;;  %v1994_v21 = vld [vmem:[#allocation3 + $0xa0] sm:$0xff]  ;;  %v1705_v22 = vpop.permute.xlu0 %1704  ;;  %v1997_v41 = vld [vmem:[#allocation3 + $0xb8] sm:$0xff] }
 0x270   : > { %1583 = vst.msk [vmem:[#allocation3 + $0xd8] sm:$0xff] %vm1555_vm9, %v1514_v17  ;;  %v2016_v40 = vpack.c.bf16 %v1995_v16, %v1994_v21 }
 0x271   : > { %1775 = vst.msk [vmem:[#allocation3 + $0xd0] sm:$0xff] %vm1748_vm10, %v1705_v22 }
 0x272   : > { %4482 = vmatprep.mubr.msk.bf16.mxu0 %vm2049_vm12, %v2016_v40 }
 0x273   : > { %v1703_v11 = vpop.permute.xlu1 %1702  ;;  %v1996_v44 = vld [vmem:[#allocation3 + $0xb0] sm:$0xff]  ;;  %v1894_v45 = vpop.permute.xlu0 %1893 }
 0x274   : > { %1774 = vst.msk [vmem:[#allocation3 + $0xc8] sm:$0xff] %vm1748_vm10, %v1703_v11  ;;  %v2017_v48 = vpack.c.bf16 %v1997_v41, %v1996_v44 }
 0x275   : > { %1966 = vst.msk [vmem:[#allocation3 + $0xc0] sm:$0xff] %vm1941_vm11, %v1894_v45 }
 0x276   : > { %4483 = vmatmul.mubr.msk.bf16.gmra.mrb[20].mxu0 %vm2049_vm12, %v2017_v48 }
 0x277   : > { %v1707_v59 = vpop.permute.xlu1 %1706  ;;  %v1898_v52 = vpop.permute.xlu0 %1897 }
 0x278   : > { %1776 = vst.msk [vmem:[#allocation3 + $0xd8] sm:$0xff] %vm1748_vm10, %v1707_v59 }
 0x279   : > { %1968 = vst.msk [vmem:[#allocation3 + $0xd0] sm:$0xff] %vm1941_vm11, %v1898_v52 }
 0x27b   : > { %v1896_v53 = vpop.permute.xlu1 %1895  ;;  %v1516_v0 = vpop.permute.xlu0 %1515 }
 0x27c   : > { %1967 = vst.msk [vmem:[#allocation3 + $0xc8] sm:$0xff] %vm1941_vm11, %v1896_v53  ;;  %v1998_v5 = vld [vmem:[#allocation3 + $0xc0] sm:$0xff] }
 0x27d   : > { %1584 = vst.msk [vmem:[#allocation3 + $0xe0] sm:$0xff] %vm1555_vm9, %v1516_v0 }
 0x27f   : > { %v1900_v60 = vpop.permute.xlu1 %1899  ;;  %v1520_v55 = vpop.permute.xlu0 %1519 }
 0x280   : > { %1969 = vst.msk [vmem:[#allocation3 + $0xd8] sm:$0xff] %vm1941_vm11, %v1900_v60  ;;  %v2000_v19 = vld [vmem:[#allocation3 + $0xd0] sm:$0xff] }
 0x281   : > { %1586 = vst.msk [vmem:[#allocation3 + $0xf0] sm:$0xff] %vm1555_vm9, %v1520_v55 }
 0x283   : > { %v1518_v14 = vpop.permute.xlu1 %1517  ;;  %v1999_v13 = vld [vmem:[#allocation3 + $0xc8] sm:$0xff]  ;;  %v1709_v18 = vpop.permute.xlu0 %1708 }
 0x284   : > { %1585 = vst.msk [vmem:[#allocation3 + $0xe8] sm:$0xff] %vm1555_vm9, %v1518_v14  ;;  %v2018_v6 = vpack.c.bf16 %v1999_v13, %v1998_v5 }
 0x285   : > { %1777 = vst.msk [vmem:[#allocation3 + $0xe0] sm:$0xff] %vm1748_vm10, %v1709_v18 }
 0x286   : > { %4486 = vmatprep.mubr.msk.bf16.mxu0 %vm2049_vm12, %v2018_v6 }
 0x287   : > { %v1522_v20 = vpop.permute.xlu1 %1521  ;;  %v2001_v23 = vld [vmem:[#allocation3 + $0xd8] sm:$0xff]  ;;  %v1713_v24 = vpop.permute.xlu0 %1712 }
 0x288   : > { %1587 = vst.msk [vmem:[#allocation3 + $0xf8] sm:$0xff] %vm1555_vm9, %v1522_v20  ;;  %v2019_v25 = vpack.c.bf16 %v2001_v23, %v2000_v19 }
 0x289   : > { %1779 = vst.msk [vmem:[#allocation3 + $0xf0] sm:$0xff] %vm1748_vm10, %v1713_v24 }
 0x28a   : > { %4487 = vmatmul.mubr.msk.bf16.gmra.mrb[24].mxu0 %vm2049_vm12, %v2019_v25 }
 0x28b   : > { %v1711_v26 = vpop.permute.xlu1 %1710  ;;  %v1902_v27 = vpop.permute.xlu0 %1901 }
 0x28c   : > { %1778 = vst.msk [vmem:[#allocation3 + $0xe8] sm:$0xff] %vm1748_vm10, %v1711_v26 }
 0x28d   : > { %1970 = vst.msk [vmem:[#allocation3 + $0xe0] sm:$0xff] %vm1941_vm11, %v1902_v27 }
 0x28f   : > { %v1715_v28 = vpop.permute.xlu1 %1714  ;;  %v1906_v29 = vpop.permute.xlu0 %1905 }
 0x290   : > { %1780 = vst.msk [vmem:[#allocation3 + $0xf8] sm:$0xff] %vm1748_vm10, %v1715_v28 }
 0x291   : > { %1972 = vst.msk [vmem:[#allocation3 + $0xf0] sm:$0xff] %vm1941_vm11, %v1906_v29 }
 0x293   : > { %v1904_v30 = vpop.permute.xlu1 %1903 }
 0x294   : > { %1971 = vst.msk [vmem:[#allocation3 + $0xe8] sm:$0xff] %vm1941_vm11, %v1904_v30  ;;  %v2002_v32 = vld [vmem:[#allocation3 + $0xe0] sm:$0xff] }
 0x297   : > { %v1908_v31 = vpop.permute.xlu1 %1907 }
 0x298   : > { %1973 = vst.msk [vmem:[#allocation3 + $0xf8] sm:$0xff] %vm1941_vm11, %v1908_v31  ;;  %v2004_v35 = vld [vmem:[#allocation3 + $0xf0] sm:$0xff] }
 0x29b   : > { %v2003_v33 = vld [vmem:[#allocation3 + $0xe8] sm:$0xff] }
 0x29c   : > { %v2020_v34 = vpack.c.bf16 %v2003_v33, %v2002_v32 }
 0x29e   : > { %4490 = vmatprep.mubr.msk.bf16.mxu0 %vm2049_vm12, %v2020_v34 }
 0x29f   : > { %v2005_v36 = vld [vmem:[#allocation3 + $0xf8] sm:$0xff] }
 0x2a0   : > { %v2021_v37 = vpack.c.bf16 %v2005_v36, %v2004_v35 }
 0x2a2   : > { %4491 = vmatmul.mubr.msk.bf16.gmra.mrb[28].mxu0 %vm2049_vm12, %v2021_v37 }
 0x2a9   : > { %v2456_v39 = vpop.permute.xlu0 %2455 }
 0x2aa   : > { %2551 = vst.msk [vmem:[#allocation3] sm:$0xff] %vm589_vm3, %v2456_v39 }
 0x2ab   : > { %v2458_v62 = vpop.permute.xlu1 %2457 }
 0x2ac   : > { %2552 = vst.msk [vmem:[#allocation3 + $0x8] sm:$0xff] %vm589_vm3, %v2458_v62 }
 0x2f9   : > { %v4464_v56 = vpop.f32.mrb[0].mxu0 }
 0x2fa   : > { %v2145_v43 = vadd.f32 %v4464_v56, %v5713_v42  ;;  %v2136_v46 = vpop.f32.mrb[1].mxu0 }
 0x2fb   : > { %v2137_v47 = vadd.f32 %v5713_v42, %v2136_v46  ;;  %v4465_v50 = vpop.f32.mrb[2].mxu0 }
 0x2fc   : > { %v2265_v15 = vmax.f32 %v2145_v43, 0.0  ;;  %v2148_v51 = vadd.f32 %v4465_v50, %v5713_v42  ;;  %v2139_v61 = vpop.f32.mrb[3].mxu0 }
 0x2fd   : > { %v2263_v12 = vmax.f32 %v2137_v47, 0.0  ;;  %v2140_v1 = vadd.f32 %v5713_v42, %v2139_v61 }
 0x2fe   : > { %2297 = vst.msk [vmem:[#allocation2 + $0x31] sm:$0xff] %vm226_vm0, %v2265_v15  ;;  %v2266_v2 = vmax.f32 %v2148_v51, 0.0 }
 0x2ff   : > { %2295 = vst.msk [vmem:[#allocation2 + $0x19] sm:$0xff] %vm226_vm0, %v2263_v12  ;;  %v2264_v3 = vmax.f32 %v2140_v1, 0.0 }
 0x300   : > { %2298 = vst.msk [vmem:[#allocation2 + $0x39] sm:$0xff] %vm226_vm0, %v2266_v2 }
 0x301   : > { %2296 = vst.msk [vmem:[#allocation2 + $0x21] sm:$0xff] %vm226_vm0, %v2264_v3 }
 0x305   : > { %v5725_v4 = vld [vmem:[#allocation2 + $0x30] sm:$0xff] }
 0x306   : > { %v5727_v7 = vld [vmem:[#allocation2 + $0x19] sm:$0xff]  ;;  %2363 = vst.msk [vmem:[#allocation3 + $0x20] sm:$0xff] %vm226_vm0, %v5725_v4  ;;  %v5750_v21 = vld [vmem:[#allocation2 + $0x31] sm:$0xff] }
 0x307   : > { %v5729_v8 = vld [vmem:[#allocation2 + $0x18] sm:$0xff]  ;;  %2459 = vrot.lane.b32.xlu0 %v5727_v7, %s4566_s25 }
 0x308   : > { %2361 = vst.msk [vmem:[#allocation3 + $0x10] sm:$0xff] %vm226_vm0, %v5729_v8  ;;  %v5737_v54 = vld [vmem:[#allocation2 + $0x38] sm:$0xff]  ;;  %v5739_v49 = vld [vmem:[#allocation2 + $0x21] sm:$0xff] }
 0x309   : > { %v5741_v9 = vld [vmem:[#allocation2 + $0x20] sm:$0xff]  ;;  %2364 = vst.msk [vmem:[#allocation3 + $0x28] sm:$0xff] %vm226_vm0, %v5737_v54  ;;  %v4468_v10 = vpop.f32.mrb[4].mxu0  ;;  %2461 = vrot.lane.b32.xlu1 %v5739_v49, %s4566_s25 }
 0x30a   : > { %2362 = vst.msk [vmem:[#allocation3 + $0x18] sm:$0xff] %vm226_vm0, %v5741_v9  ;;  %v2161_v16 = vadd.f32 %v4468_v10, %v5713_v42  ;;  %v2152_v17 = vpop.f32.mrb[5].mxu0  ;;  %v5756_v45 = vld [vmem:[#allocation2 + $0x39] sm:$0xff] }
 0x30b   : > { %v2153_v22 = vadd.f32 %v5713_v42, %v2152_v17  ;;  %v4469_v40 = vpop.f32.mrb[6].mxu0  ;;  %2463 = vrot.lane.b32.xlu0 %v5750_v21, %s4566_s25 }
 0x30c   : > { %v2269_v41 = vmax.f32 %v2161_v16, 0.0  ;;  %v2164_v11 = vadd.f32 %v4469_v40, %v5713_v42  ;;  %v2155_v44 = vpop.f32.mrb[7].mxu0 }
 0x30d   : > { %v2267_v48 = vmax.f32 %v2153_v22, 0.0  ;;  %v2156_v59 = vadd.f32 %v5713_v42, %v2155_v44  ;;  %2465 = vrot.lane.b32.xlu1 %v5756_v45, %s4566_s25 }
 0x30e   : > { %2301 = vst.msk [vmem:[#allocation2 + $0x61] sm:$0xff] %vm226_vm0, %v2269_v41  ;;  %v2270_v52 = vmax.f32 %v2164_v11, 0.0 }
 0x30f   : > { %2299 = vst.msk [vmem:[#allocation2 + $0x49] sm:$0xff] %vm226_vm0, %v2267_v48  ;;  %v2268_v53 = vmax.f32 %v2156_v59, 0.0 }
 0x310   : > { %2302 = vst.msk [vmem:[#allocation2 + $0x69] sm:$0xff] %vm226_vm0, %v2270_v52 }
 0x311   : > { %2300 = vst.msk [vmem:[#allocation2 + $0x51] sm:$0xff] %vm226_vm0, %v2268_v53 }
 0x315   : > { %v5765_v0 = vld [vmem:[#allocation2 + $0x60] sm:$0xff] }
 0x316   : > { %v5767_v60 = vld [vmem:[#allocation2 + $0x49] sm:$0xff]  ;;  %2367 = vst.msk [vmem:[#allocation3 + $0x40] sm:$0xff] %vm226_vm0, %v5765_v0  ;;  %v5790_v6 = vld [vmem:[#allocation2 + $0x61] sm:$0xff] }
 0x317   : > { %v5769_v55 = vld [vmem:[#allocation2 + $0x48] sm:$0xff]  ;;  %2467 = vrot.lane.b32.xlu0 %v5767_v60, %s4566_s25 }
 0x318   : > { %2365 = vst.msk [vmem:[#allocation3 + $0x30] sm:$0xff] %vm226_vm0, %v5769_v55  ;;  %v5777_v5 = vld [vmem:[#allocation2 + $0x68] sm:$0xff]  ;;  %v5779_v58 = vld [vmem:[#allocation2 + $0x51] sm:$0xff] }
 0x319   : > { %v5781_v63 = vld [vmem:[#allocation2 + $0x50] sm:$0xff]  ;;  %2368 = vst.msk [vmem:[#allocation3 + $0x48] sm:$0xff] %vm226_vm0, %v5777_v5  ;;  %v4472_v14 = vpop.f32.mrb[8].mxu0  ;;  %2469 = vrot.lane.b32.xlu1 %v5779_v58, %s4566_s25 }
 0x31a   : > { %2366 = vst.msk [vmem:[#allocation3 + $0x38] sm:$0xff] %vm226_vm0, %v5781_v63  ;;  %v2177_v13 = vadd.f32 %v4472_v14, %v5713_v42  ;;  %v2168_v18 = vpop.f32.mrb[9].mxu0  ;;  %v5796_v26 = vld [vmem:[#allocation2 + $0x69] sm:$0xff] }
 0x31b   : > { %v2169_v19 = vadd.f32 %v5713_v42, %v2168_v18  ;;  %v4473_v20 = vpop.f32.mrb[10].mxu0  ;;  %2471 = vrot.lane.b32.xlu0 %v5790_v6, %s4566_s25 }
 0x31c   : > { %v2273_v23 = vmax.f32 %v2177_v13, 0.0  ;;  %v2180_v24 = vadd.f32 %v4473_v20, %v5713_v42  ;;  %v2171_v25 = vpop.f32.mrb[11].mxu0 }
 0x31d   : > { %v2271_v27 = vmax.f32 %v2169_v19, 0.0  ;;  %v2172_v28 = vadd.f32 %v5713_v42, %v2171_v25  ;;  %2473 = vrot.lane.b32.xlu1 %v5796_v26, %s4566_s25 }
 0x31e   : > { %2305 = vst.msk [vmem:[#allocation2 + $0x91] sm:$0xff] %vm226_vm0, %v2273_v23  ;;  %v2274_v29 = vmax.f32 %v2180_v24, 0.0 }
 0x31f   : > { %2303 = vst.msk [vmem:[#allocation2 + $0x79] sm:$0xff] %vm226_vm0, %v2271_v27  ;;  %v2272_v30 = vmax.f32 %v2172_v28, 0.0 }
 0x320   : > { %2306 = vst.msk [vmem:[#allocation2 + $0x99] sm:$0xff] %vm226_vm0, %v2274_v29 }
 0x321   : > { %2304 = vst.msk [vmem:[#allocation2 + $0x81] sm:$0xff] %vm226_vm0, %v2272_v30 }
 0x325   : > { %v5805_v31 = vld [vmem:[#allocation2 + $0x90] sm:$0xff] }
 0x326   : > { %v5807_v32 = vld [vmem:[#allocation2 + $0x79] sm:$0xff]  ;;  %2371 = vst.msk [vmem:[#allocation3 + $0x60] sm:$0xff] %vm226_vm0, %v5805_v31  ;;  %v5830_v56 = vld [vmem:[#allocation2 + $0x91] sm:$0xff] }
 0x327   : > { %v5809_v33 = vld [vmem:[#allocation2 + $0x78] sm:$0xff]  ;;  %2475 = vrot.lane.b32.xlu0 %v5807_v32, %s4566_s25 }
 0x328   : > { %2369 = vst.msk [vmem:[#allocation3 + $0x50] sm:$0xff] %vm226_vm0, %v5809_v33  ;;  %v5817_v34 = vld [vmem:[#allocation2 + $0x98] sm:$0xff]  ;;  %v5819_v35 = vld [vmem:[#allocation2 + $0x81] sm:$0xff] }
 0x329   : > { %v5821_v36 = vld [vmem:[#allocation2 + $0x80] sm:$0xff]  ;;  %2372 = vst.msk [vmem:[#allocation3 + $0x68] sm:$0xff] %vm226_vm0, %v5817_v34  ;;  %v4476_v37 = vpop.f32.mrb[12].mxu0  ;;  %2477 = vrot.lane.b32.xlu1 %v5819_v35, %s4566_s25 }
 0x32a   : > { %2370 = vst.msk [vmem:[#allocation3 + $0x58] sm:$0xff] %vm226_vm0, %v5821_v36  ;;  %v2193_v38 = vadd.f32 %v4476_v37, %v5713_v42  ;;  %v2184_v39 = vpop.f32.mrb[13].mxu0  ;;  %v5836_v15 = vld [vmem:[#allocation2 + $0x99] sm:$0xff] }
 0x32b   : > { %v2185_v43 = vadd.f32 %v5713_v42, %v2184_v39  ;;  %v4477_v46 = vpop.f32.mrb[14].mxu0  ;;  %2479 = vrot.lane.b32.xlu0 %v5830_v56, %s4566_s25 }
 0x32c   : > { %v2277_v47 = vmax.f32 %v2193_v38, 0.0  ;;  %v2196_v50 = vadd.f32 %v4477_v46, %v5713_v42  ;;  %v2187_v57 = vpop.f32.mrb[15].mxu0 }
 0x32d   : > { %v2275_v51 = vmax.f32 %v2185_v43, 0.0  ;;  %v2188_v61 = vadd.f32 %v5713_v42, %v2187_v57  ;;  %2481 = vrot.lane.b32.xlu1 %v5836_v15, %s4566_s25 }
 0x32e   : > { %2309 = vst.msk [vmem:[#allocation2 + $0xc1] sm:$0xff] %vm226_vm0, %v2277_v47  ;;  %v2278_v62 = vmax.f32 %v2196_v50, 0.0 }
 0x32f   : > { %2307 = vst.msk [vmem:[#allocation2 + $0xa9] sm:$0xff] %vm226_vm0, %v2275_v51  ;;  %v2276_v12 = vmax.f32 %v2188_v61, 0.0 }
 0x330   : > { %2310 = vst.msk [vmem:[#allocation2 + $0xc9] sm:$0xff] %vm226_vm0, %v2278_v62 }
 0x331   : > { %2308 = vst.msk [vmem:[#allocation2 + $0xb1] sm:$0xff] %vm226_vm0, %v2276_v12 }
 0x335   : > { %v5845_v1 = vld [vmem:[#allocation2 + $0xc0] sm:$0xff] }
 0x336   : > { %v2405_v2 = vld [vmem:[#allocation2 + $0xa9] sm:$0xff]  ;;  %2375 = vst.msk [vmem:[#allocation3 + $0x80] sm:$0xff] %vm226_vm0, %v5845_v1  ;;  %v2407_v11 = vld [vmem:[#allocation2 + $0xc1] sm:$0xff] }
 0x337   : > { %v5847_v3 = vld [vmem:[#allocation2 + $0xa8] sm:$0xff]  ;;  %2483 = vrot.lane.b32.xlu0 %v2405_v2, %s4566_s25 }
 0x338   : > { %2373 = vst.msk [vmem:[#allocation3 + $0x70] sm:$0xff] %vm226_vm0, %v5847_v3  ;;  %v2406_v10 = vld [vmem:[#allocation2 + $0xb1] sm:$0xff]  ;;  %v5857_v22 = vld [vmem:[#allocation2 + $0xc8] sm:$0xff] }
 0x339   : > { %v4480_v16 = vpop.f32.mrb[16].mxu0  ;;  %2485 = vrot.lane.b32.xlu1 %v2406_v10, %s4566_s25  ;;  %v5855_v17 = vld [vmem:[#allocation2 + $0xb0] sm:$0xff]  ;;  %2376 = vst.msk [vmem:[#allocation3 + $0x88] sm:$0xff] %vm226_vm0, %v5857_v22 }
 0x33a   : > { %v2209_v40 = vadd.f32 %v4480_v16, %v5713_v42  ;;  %v2200_v41 = vpop.f32.mrb[17].mxu0  ;;  %2374 = vst.msk [vmem:[#allocation3 + $0x78] sm:$0xff] %vm226_vm0, %v5855_v17  ;;  %v2408_v14 = vld [vmem:[#allocation2 + $0xc9] sm:$0xff] }
 0x33b   : > { %v2201_v44 = vadd.f32 %v5713_v42, %v2200_v41  ;;  %v4481_v48 = vpop.f32.mrb[18].mxu0  ;;  %2487 = vrot.lane.b32.xlu0 %v2407_v11, %s4566_s25 }
 0x33c   : > { %v2281_v59 = vmax.f32 %v2209_v40, 0.0  ;;  %v2212_v52 = vadd.f32 %v4481_v48, %v5713_v42  ;;  %v2203_v53 = vpop.f32.mrb[19].mxu0 }
 0x33d   : > { %v2279_v13 = vmax.f32 %v2201_v44, 0.0  ;;  %v2204_v18 = vadd.f32 %v5713_v42, %v2203_v53  ;;  %2489 = vrot.lane.b32.xlu1 %v2408_v14, %s4566_s25 }
 0x33e   : > { %2313 = vst.msk [vmem:[#allocation2 + $0xf1] sm:$0xff] %vm226_vm0, %v2281_v59  ;;  %v2282_v19 = vmax.f32 %v2212_v52, 0.0 }
 0x33f   : > { %2311 = vst.msk [vmem:[#allocation2 + $0xd9] sm:$0xff] %vm226_vm0, %v2279_v13  ;;  %v2280_v20 = vmax.f32 %v2204_v18, 0.0 }
 0x340   : > { %2314 = vst.msk [vmem:[#allocation2 + $0xf9] sm:$0xff] %vm226_vm0, %v2282_v19 }
 0x341   : > { %2312 = vst.msk [vmem:[#allocation2 + $0xe1] sm:$0xff] %vm226_vm0, %v2280_v20 }
 0x345   : > { %v5873_v23 = vld [vmem:[#allocation2 + $0xf0] sm:$0xff] }
 0x346   : > { %v2409_v24 = vld [vmem:[#allocation2 + $0xd9] sm:$0xff]  ;;  %2379 = vst.msk [vmem:[#allocation3 + $0xa0] sm:$0xff] %vm226_vm0, %v5873_v23  ;;  %v2411_v39 = vld [vmem:[#allocation2 + $0xf1] sm:$0xff] }
 0x347   : > { %v5875_v25 = vld [vmem:[#allocation2 + $0xd8] sm:$0xff]  ;;  %2491 = vrot.lane.b32.xlu0 %v2409_v24, %s4566_s25 }
 0x348   : > { %2377 = vst.msk [vmem:[#allocation3 + $0x90] sm:$0xff] %vm226_vm0, %v5875_v25  ;;  %v2410_v27 = vld [vmem:[#allocation2 + $0xe1] sm:$0xff]  ;;  %v5885_v30 = vld [vmem:[#allocation2 + $0xf8] sm:$0xff] }
 0x349   : > { %v4484_v28 = vpop.f32.mrb[20].mxu0  ;;  %2493 = vrot.lane.b32.xlu1 %v2410_v27, %s4566_s25  ;;  %v5883_v29 = vld [vmem:[#allocation2 + $0xe0] sm:$0xff]  ;;  %2380 = vst.msk [vmem:[#allocation3 + $0xa8] sm:$0xff] %vm226_vm0, %v5885_v30 }
 0x34a   : > { %v2225_v37 = vadd.f32 %v4484_v28, %v5713_v42  ;;  %v2216_v38 = vpop.f32.mrb[21].mxu0  ;;  %2378 = vst.msk [vmem:[#allocation3 + $0x98] sm:$0xff] %vm226_vm0, %v5883_v29  ;;  %v2412_v51 = vld [vmem:[#allocation2 + $0xf9] sm:$0xff] }
 0x34b   : > { %v2217_v43 = vadd.f32 %v5713_v42, %v2216_v38  ;;  %v4485_v46 = vpop.f32.mrb[22].mxu0  ;;  %2495 = vrot.lane.b32.xlu0 %v2411_v39, %s4566_s25 }
 0x34c   : > { %v2285_v47 = vmax.f32 %v2225_v37, 0.0  ;;  %v2228_v50 = vadd.f32 %v4485_v46, %v5713_v42  ;;  %v2219_v57 = vpop.f32.mrb[23].mxu0 }
 0x34d   : > { %v2283_v61 = vmax.f32 %v2217_v43, 0.0  ;;  %v2220_v62 = vadd.f32 %v5713_v42, %v2219_v57  ;;  %2497 = vrot.lane.b32.xlu1 %v2412_v51, %s4566_s25 }
 0x34e   : > { %2317 = vst.msk [vmem:[#allocation2 + $0x121] sm:$0xff] %vm226_vm0, %v2285_v47  ;;  %v2286_v12 = vmax.f32 %v2228_v50, 0.0 }
 0x34f   : > { %2315 = vst.msk [vmem:[#allocation2 + $0x109] sm:$0xff] %vm226_vm0, %v2283_v61  ;;  %v2284_v2 = vmax.f32 %v2220_v62, 0.0 }
 0x350   : > { %2318 = vst.msk [vmem:[#allocation2 + $0x129] sm:$0xff] %vm226_vm0, %v2286_v12 }
 0x351   : > { %2316 = vst.msk [vmem:[#allocation2 + $0x111] sm:$0xff] %vm226_vm0, %v2284_v2 }
 0x355   : > { %v5901_v10 = vld [vmem:[#allocation2 + $0x120] sm:$0xff] }
 0x356   : > { %v2413_v16 = vld [vmem:[#allocation2 + $0x109] sm:$0xff]  ;;  %2383 = vst.msk [vmem:[#allocation3 + $0xc0] sm:$0xff] %vm226_vm0, %v5901_v10  ;;  %v2415_v48 = vld [vmem:[#allocation2 + $0x121] sm:$0xff] }
 0x357   : > { %v5903_v40 = vld [vmem:[#allocation2 + $0x108] sm:$0xff]  ;;  %2499 = vrot.lane.b32.xlu0 %v2413_v16, %s4566_s25 }
 0x358   : > { %2381 = vst.msk [vmem:[#allocation3 + $0xb0] sm:$0xff] %vm226_vm0, %v5903_v40  ;;  %v2414_v41 = vld [vmem:[#allocation2 + $0x111] sm:$0xff]  ;;  %v5913_v44 = vld [vmem:[#allocation2 + $0x128] sm:$0xff] }
 0x359   : > { %2501 = vrot.lane.b32.xlu1 %v2414_v41, %s4566_s25  ;;  %v5911_v11 = vld [vmem:[#allocation2 + $0x110] sm:$0xff]  ;;  %2384 = vst.msk [vmem:[#allocation3 + $0xc8] sm:$0xff] %vm226_vm0, %v5913_v44 }
 0x35a   : > { %2382 = vst.msk [vmem:[#allocation3 + $0xb8] sm:$0xff] %vm226_vm0, %v5911_v11  ;;  %v2416_v59 = vld [vmem:[#allocation2 + $0x129] sm:$0xff] }
 0x35b   : > { %2503 = vrot.lane.b32.xlu0 %v2415_v48, %s4566_s25 }
 0x35d   : > { %v4488_v52 = vpop.f32.mrb[24].mxu0  ;;  %2505 = vrot.lane.b32.xlu1 %v2416_v59, %s4566_s25 }
 0x35e   : > { %v2241_v53 = vadd.f32 %v4488_v52, %v5713_v42  ;;  %v2232_v14 = vpop.f32.mrb[25].mxu0 }
 0x35f   : > { %v2233_v13 = vadd.f32 %v5713_v42, %v2232_v14  ;;  %v4489_v18 = vpop.f32.mrb[26].mxu0 }
 0x360   : > { %v2289_v19 = vmax.f32 %v2241_v53, 0.0  ;;  %v2244_v20 = vadd.f32 %v4489_v18, %v5713_v42  ;;  %v2235_v24 = vpop.f32.mrb[27].mxu0 }
 0x361   : > { %v2287_v27 = vmax.f32 %v2233_v13, 0.0  ;;  %v2236_v28 = vadd.f32 %v5713_v42, %v2235_v24 }
 0x362   : > { %2321 = vst.msk [vmem:[#allocation2 + $0x151] sm:$0xff] %vm226_vm0, %v2289_v19  ;;  %v2290_v37 = vmax.f32 %v2244_v20, 0.0 }
 0x363   : > { %2319 = vst.msk [vmem:[#allocation2 + $0x139] sm:$0xff] %vm226_vm0, %v2287_v27  ;;  %v2288_v38 = vmax.f32 %v2236_v28, 0.0 }
 0x364   : > { %2322 = vst.msk [vmem:[#allocation2 + $0x159] sm:$0xff] %vm226_vm0, %v2290_v37 }
 0x365   : > { %2320 = vst.msk [vmem:[#allocation2 + $0x141] sm:$0xff] %vm226_vm0, %v2288_v38  ;;  %v2583_v38 = vld [vmem:[#allocation2 + $0x2] sm:$0xff] }
 0x369   : > { %v2355_v39 = vld [vmem:[#allocation2 + $0x150] sm:$0xff] }
 0x36a   : > { %v2417_v43 = vld [vmem:[#allocation2 + $0x139] sm:$0xff]  ;;  %2387 = vst.msk [vmem:[#allocation3 + $0xe0] sm:$0xff] %vm226_vm0, %v2355_v39  ;;  %v2419_v51 = vld [vmem:[#allocation2 + $0x151] sm:$0xff] }
 0x36b   : > { %v2353_v46 = vld [vmem:[#allocation2 + $0x138] sm:$0xff]  ;;  %2507 = vrot.lane.b32.xlu0 %v2417_v43, %s4566_s25  ;;  %v2584_v43 = vld [vmem:[#allocation2 + $0xa] sm:$0xff] }
 0x36c   : > { %2385 = vst.msk [vmem:[#allocation3 + $0xd0] sm:$0xff] %vm226_vm0, %v2353_v46  ;;  %v2418_v47 = vld [vmem:[#allocation2 + $0x141] sm:$0xff]  ;;  %v2356_v57 = vld [vmem:[#allocation2 + $0x158] sm:$0xff] }
 0x36d   : > { %2509 = vrot.lane.b32.xlu1 %v2418_v47, %s4566_s25  ;;  %v2354_v50 = vld [vmem:[#allocation2 + $0x140] sm:$0xff]  ;;  %2388 = vst.msk [vmem:[#allocation3 + $0xe8] sm:$0xff] %vm226_vm0, %v2356_v57 }
 0x36e   : > { %2386 = vst.msk [vmem:[#allocation3 + $0xd8] sm:$0xff] %vm226_vm0, %v2354_v50  ;;  %v2420_v61 = vld [vmem:[#allocation2 + $0x159] sm:$0xff]  ;;  %v5961_v57 = vld [vmem:[#allocation2 + $0x22] sm:$0xff] }
 0x36f   : > { %2511 = vrot.lane.b32.xlu0 %v2419_v51, %s4566_s25  ;;  %v5956_v47 = vld [vmem:[#allocation2 + $0x1a] sm:$0xff] }
 0x371   : > { %2513 = vrot.lane.b32.xlu1 %v2420_v61, %s4566_s25  ;;  %v5966_v61 = vld [vmem:[#allocation2 + $0x32] sm:$0xff] }
 0x375   : > { %v4492_v62 = vpop.f32.mrb[28].mxu0 }
 0x376   : > { %v2257_v12 = vadd.f32 %v4492_v62, %v5713_v42  ;;  %v2248_v2 = vpop.f32.mrb[29].mxu0 }
 0x377   : > { %v2249_v16 = vadd.f32 %v5713_v42, %v2248_v2  ;;  %v4493_v41 = vpop.f32.mrb[30].mxu0  ;;  %v5975_v2 = vld [vmem:[#allocation2 + $0x4a] sm:$0xff] }
 0x378   : > { %v2293_v48 = vmax.f32 %v2257_v12, 0.0  ;;  %v2260_v59 = vadd.f32 %v4493_v41, %v5713_v42  ;;  %v2251_v52 = vpop.f32.mrb[31].mxu0  ;;  %v5971_v12 = vld [vmem:[#allocation2 + $0x3a] sm:$0xff]  ;;  %v5983_v41 = vld [vmem:[#allocation2 + $0x62] sm:$0xff] }
 0x379   : > { %v2291_v53 = vmax.f32 %v2249_v16, 0.0  ;;  %v2252_v14 = vadd.f32 %v5713_v42, %v2251_v52  ;;  %v2460_v13 = vpop.permute.xlu0 %2459  ;;  %v5979_v16 = vld [vmem:[#allocation2 + $0x52] sm:$0xff]  ;;  %v5992_v52 = vld [vmem:[#allocation2 + $0x7a] sm:$0xff] }
 0x37a   : > { %2325 = vst.msk [vmem:[#allocation2 + $0x181] sm:$0xff] %vm226_vm0, %v2293_v48  ;;  %v2294_v18 = vmax.f32 %v2260_v59, 0.0  ;;  %v5987_v48 = vld [vmem:[#allocation2 + $0x6a] sm:$0xff] }
 0x37b   : > { %2553 = vst.msk [vmem:[#allocation3 + $0x10] sm:$0xff] %vm589_vm3, %v2460_v13  ;;  %v2292_v19 = vmax.f32 %v2252_v14, 0.0  ;;  %v2462_v20 = vpop.permute.xlu1 %2461  ;;  %v5997_v14 = vld [vmem:[#allocation2 + $0x82] sm:$0xff] }
 0x37c   : > { %2323 = vst.msk [vmem:[#allocation2 + $0x169] sm:$0xff] %vm226_vm0, %v2291_v53  ;;  %2326 = vst.msk [vmem:[#allocation2 + $0x189] sm:$0xff] %vm226_vm0, %v2294_v18  ;;  %v6002_v18 = vld [vmem:[#allocation2 + $0x92] sm:$0xff] }
 0x37d   : > { %2554 = vst.msk [vmem:[#allocation3 + $0x18] sm:$0xff] %vm589_vm3, %v2462_v20  ;;  %v2464_v24 = vpop.permute.xlu0 %2463  ;;  %v6007_v20 = vld [vmem:[#allocation2 + $0x9a] sm:$0xff] }
 0x37e   : > { %2324 = vst.msk [vmem:[#allocation2 + $0x171] sm:$0xff] %vm226_vm0, %v2292_v19 }
 0x37f   : > { %2555 = vst.msk [vmem:[#allocation3 + $0x20] sm:$0xff] %vm589_vm3, %v2464_v24  ;;  %v2466_v42 = vpop.permute.xlu1 %2465  ;;  %v6011_v24 = vld [vmem:[#allocation2 + $0xaa] sm:$0xff] }
 0x380   : > { %2556 = vst.msk [vmem:[#allocation3 + $0x28] sm:$0xff] %vm589_vm3, %v2466_v42  ;;  %v6015_v42 = vld [vmem:[#allocation2 + $0xb2] sm:$0xff] }
 0x383   : > { %v2421_v27 = vld [vmem:[#allocation2 + $0x169] sm:$0xff] }
 0x384   : > { %v2357_v28 = vld [vmem:[#allocation2 + $0x168] sm:$0xff]  ;;  %2515 = vrot.lane.b32.xlu0 %v2421_v27, %s4566_s25 }
 0x385   : > { %2389 = vst.msk [vmem:[#allocation3 + $0xf0] sm:$0xff] %vm226_vm0, %v2357_v28  ;;  %v2422_v37 = vld [vmem:[#allocation2 + $0x171] sm:$0xff]  ;;  %v6019_v27 = vld [vmem:[#allocation2 + $0xc2] sm:$0xff] }
 0x386   : > { %2517 = vrot.lane.b32.xlu1 %v2422_v37, %s4566_s25  ;;  %v2358_v39 = vld [vmem:[#allocation2 + $0x170] sm:$0xff] }
 0x387   : > { %2390 = vst.msk [vmem:[#allocation3 + $0xf8] sm:$0xff] %vm226_vm0, %v2358_v39  ;;  %v6023_v28 = vld [vmem:[#allocation2 + $0xca] sm:$0xff] }
 0x388   : > { %2647 = vrot.lane.b32.xlu0 %v2583_v38, %s4567_s26  ;;  %v6028_v38 = vld [vmem:[#allocation2 + $0xda] sm:$0xff] }
 0x389   : > { %v2468_v46 = vpop.permute.xlu0 %2467 }
 0x38a   : > { %2649 = vrot.lane.b32.xlu1 %v2584_v43, %s4567_s26  ;;  %2557 = vst.msk [vmem:[#allocation3 + $0x30] sm:$0xff] %vm589_vm3, %v2468_v46  ;;  %v6033_v43 = vld [vmem:[#allocation2 + $0xe2] sm:$0xff] }
 0x38b   : > { %v2470_v50 = vpop.permute.xlu1 %2469 }
 0x38c   : > { %2651 = vrot.lane.b32.xlu0 %v5956_v47, %s4567_s26  ;;  %2558 = vst.msk [vmem:[#allocation3 + $0x38] sm:$0xff] %vm589_vm3, %v2470_v50  ;;  %v6038_v50 = vld [vmem:[#allocation2 + $0xf2] sm:$0xff] }
 0x38d   : > { %v2472_v51 = vpop.permute.xlu0 %2471 }
 0x38e   : > { %2653 = vrot.lane.b32.xlu1 %v5961_v57, %s4567_s26  ;;  %2559 = vst.msk [vmem:[#allocation3 + $0x40] sm:$0xff] %vm589_vm3, %v2472_v51 }
 0x38f   : > { %v2474_v62 = vpop.permute.xlu1 %2473 }
 0x390   : > { %2655 = vrot.lane.b32.xlu0 %v5966_v61, %s4567_s26  ;;  %2560 = vst.msk [vmem:[#allocation3 + $0x48] sm:$0xff] %vm589_vm3, %v2474_v62  ;;  %v6043_v62 = vld [vmem:[#allocation2 + $0xfa] sm:$0xff] }
 0x392   : > { %2657 = vrot.lane.b32.xlu1 %v5971_v12, %s4567_s26 }
 0x394   : > { %2659 = vrot.lane.b32.xlu0 %v5975_v2, %s4567_s26 }
 0x396   : > { %2661 = vrot.lane.b32.xlu1 %v5979_v16, %s4567_s26 }
 0x398   : > { %2663 = vrot.lane.b32.xlu0 %v5983_v41, %s4567_s26 }
 0x399   : > { %v2476_v59 = vpop.permute.xlu0 %2475 }
 0x39a   : > { %2665 = vrot.lane.b32.xlu1 %v5987_v48, %s4567_s26  ;;  %2561 = vst.msk [vmem:[#allocation3 + $0x50] sm:$0xff] %vm589_vm3, %v2476_v59  ;;  %v2605_v59 = vld [vmem:[#allocation2 + $0x10a] sm:$0xff] }
 0x39b   : > { %v2478_v53 = vpop.permute.xlu1 %2477 }
 0x39c   : > { %2667 = vrot.lane.b32.xlu0 %v5992_v52, %s4567_s26  ;;  %2562 = vst.msk [vmem:[#allocation3 + $0x58] sm:$0xff] %vm589_vm3, %v2478_v53  ;;  %v2606_v53 = vld [vmem:[#allocation2 + $0x112] sm:$0xff] }
 0x39d   : > { %v2480_v13 = vpop.permute.xlu0 %2479 }
 0x39e   : > { %2669 = vrot.lane.b32.xlu1 %v5997_v14, %s4567_s26  ;;  %2563 = vst.msk [vmem:[#allocation3 + $0x60] sm:$0xff] %vm589_vm3, %v2480_v13  ;;  %v2607_v13 = vld [vmem:[#allocation2 + $0x122] sm:$0xff] }
 0x39f   : > { %v2482_v19 = vpop.permute.xlu1 %2481 }
 0x3a0   : > { %2671 = vrot.lane.b32.xlu0 %v6002_v18, %s4567_s26  ;;  %2564 = vst.msk [vmem:[#allocation3 + $0x68] sm:$0xff] %vm589_vm3, %v2482_v19  ;;  %v2608_v19 = vld [vmem:[#allocation2 + $0x12a] sm:$0xff] }
 0x3a2   : > { %2673 = vrot.lane.b32.xlu1 %v6007_v20, %s4567_s26 }
 0x3a4   : > { %2675 = vrot.lane.b32.xlu0 %v6011_v24, %s4567_s26 }
 0x3a6   : > { %2677 = vrot.lane.b32.xlu1 %v6015_v42, %s4567_s26 }
 0x3a8   : > { %2679 = vrot.lane.b32.xlu0 %v6019_v27, %s4567_s26 }
 0x3a9   : > { %v2484_v37 = vpop.permute.xlu0 %2483 }
 0x3aa   : > { %2681 = vrot.lane.b32.xlu1 %v6023_v28, %s4567_s26  ;;  %2565 = vst.msk [vmem:[#allocation3 + $0x70] sm:$0xff] %vm589_vm3, %v2484_v37 }
 0x3ab   : > { %v2486_v39 = vpop.permute.xlu1 %2485 }
 0x3ac   : > { %2683 = vrot.lane.b32.xlu0 %v6028_v38, %s4567_s26  ;;  %2566 = vst.msk [vmem:[#allocation3 + $0x78] sm:$0xff] %vm589_vm3, %v2486_v39  ;;  %v2609_v39 = vld [vmem:[#allocation2 + $0x13a] sm:$0xff] }
 0x3ad   : > { %v2488_v46 = vpop.permute.xlu0 %2487 }
 0x3ae   : > { %2685 = vrot.lane.b32.xlu1 %v6033_v43, %s4567_s26  ;;  %2567 = vst.msk [vmem:[#allocation3 + $0x80] sm:$0xff] %vm589_vm3, %v2488_v46 }
 0x3af   : > { %v2490_v51 = vpop.permute.xlu1 %2489 }
 0x3b0   : > { %2687 = vrot.lane.b32.xlu0 %v6038_v50, %s4567_s26  ;;  %2568 = vst.msk [vmem:[#allocation3 + $0x88] sm:$0xff] %vm589_vm3, %v2490_v51  ;;  %v2610_v51 = vld [vmem:[#allocation2 + $0x142] sm:$0xff] }
 0x3b2   : > { %2689 = vrot.lane.b32.xlu1 %v6043_v62, %s4567_s26 }
 0x3b4   : > { %2691 = vrot.lane.b32.xlu0 %v2605_v59, %s4567_s26 }
 0x3b6   : > { %2693 = vrot.lane.b32.xlu1 %v2606_v53, %s4567_s26  ;;  %v2611_v53 = vld [vmem:[#allocation2 + $0x152] sm:$0xff] }
 0x3b8   : > { %2695 = vrot.lane.b32.xlu0 %v2607_v13, %s4567_s26 }
 0x3b9   : > { %v2492_v37 = vpop.permute.xlu0 %2491 }
 0x3ba   : > { %2697 = vrot.lane.b32.xlu1 %v2608_v19, %s4567_s26  ;;  %2569 = vst.msk [vmem:[#allocation3 + $0x90] sm:$0xff] %vm589_vm3, %v2492_v37  ;;  %v2612_v19 = vld [vmem:[#allocation2 + $0x15a] sm:$0xff]  ;;  %v2613_v37 = vld [vmem:[#allocation2 + $0x16a] sm:$0xff] }
 0x3bb   : > { %v2494_v46 = vpop.permute.xlu1 %2493 }
 0x3bc   : > { %2699 = vrot.lane.b32.xlu0 %v2609_v39, %s4567_s26  ;;  %2570 = vst.msk [vmem:[#allocation3 + $0x98] sm:$0xff] %vm589_vm3, %v2494_v46  ;;  %v2614_v39 = vld [vmem:[#allocation2 + $0x172] sm:$0xff] }
 0x3bd   : > { %v2496_v59 = vpop.permute.xlu0 %2495 }
 0x3be   : > { %2701 = vrot.lane.b32.xlu1 %v2610_v51, %s4567_s26  ;;  %2571 = vst.msk [vmem:[#allocation3 + $0xa0] sm:$0xff] %vm589_vm3, %v2496_v59 }
 0x3bf   : > { %v2498_v13 = vpop.permute.xlu1 %2497 }
 0x3c0   : > { %2703 = vrot.lane.b32.xlu0 %v2611_v53, %s4567_s26  ;;  %2572 = vst.msk [vmem:[#allocation3 + $0xa8] sm:$0xff] %vm589_vm3, %v2498_v13 }
 0x3c2   : > { %2705 = vrot.lane.b32.xlu1 %v2612_v19, %s4567_s26 }
 0x3c4   : > { %2707 = vrot.lane.b32.xlu0 %v2613_v37, %s4567_s26 }
 0x3c6   : > { %2709 = vrot.lane.b32.xlu1 %v2614_v39, %s4567_s26 }
 0x3c8   : > { %2839 = vrot.lane.b32.xlu0 %v5729_v8, %s4568_s27 }
 0x3c9   : > { %v2500_v46 = vpop.permute.xlu0 %2499 }
 0x3ca   : > { %2841 = vrot.lane.b32.xlu1 %v5741_v9, %s4568_s27  ;;  %2573 = vst.msk [vmem:[#allocation3 + $0xb0] sm:$0xff] %vm589_vm3, %v2500_v46 }
 0x3cb   : > { %v2502_v51 = vpop.permute.xlu1 %2501 }
 0x3cc   : > { %2843 = vrot.lane.b32.xlu0 %v5725_v4, %s4568_s27  ;;  %2574 = vst.msk [vmem:[#allocation3 + $0xb8] sm:$0xff] %vm589_vm3, %v2502_v51 }
 0x3cd   : > { %v2504_v59 = vpop.permute.xlu0 %2503 }
 0x3ce   : > { %2845 = vrot.lane.b32.xlu1 %v5737_v54, %s4568_s27  ;;  %2575 = vst.msk [vmem:[#allocation3 + $0xc0] sm:$0xff] %vm589_vm3, %v2504_v59 }
 0x3cf   : > { %v2506_v53 = vpop.permute.xlu1 %2505 }
 0x3d0   : > { %2847 = vrot.lane.b32.xlu0 %v5769_v55, %s4568_s27  ;;  %2576 = vst.msk [vmem:[#allocation3 + $0xc8] sm:$0xff] %vm589_vm3, %v2506_v53 }
 0x3d2   : > { %2849 = vrot.lane.b32.xlu1 %v5781_v63, %s4568_s27 }
 0x3d4   : > { %2851 = vrot.lane.b32.xlu0 %v5765_v0, %s4568_s27 }
 0x3d6   : > { %2853 = vrot.lane.b32.xlu1 %v5777_v5, %s4568_s27 }
 0x3d8   : > { %2855 = vrot.lane.b32.xlu0 %v5809_v33, %s4568_s27 }
 0x3da   : > { %2857 = vrot.lane.b32.xlu1 %v5821_v36, %s4568_s27 }
 0x3dc   : > { %2859 = vrot.lane.b32.xlu0 %v5805_v31, %s4568_s27 }
 0x3dd   : > { %v2508_v8 = vpop.permute.xlu0 %2507 }
 0x3de   : > { %2861 = vrot.lane.b32.xlu1 %v5817_v34, %s4568_s27  ;;  %2577 = vst.msk [vmem:[#allocation3 + $0xd0] sm:$0xff] %vm589_vm3, %v2508_v8 }
 0x3df   : > { %v2510_v9 = vpop.permute.xlu1 %2509 }
 0x3e0   : > { %2863 = vrot.lane.b32.xlu0 %v5847_v3, %s4568_s27  ;;  %2578 = vst.msk [vmem:[#allocation3 + $0xd8] sm:$0xff] %vm589_vm3, %v2510_v9 }
 0x3e1   : > { %v2512_v13 = vpop.permute.xlu0 %2511 }
 0x3e2   : > { %2865 = vrot.lane.b32.xlu1 %v5855_v17, %s4568_s27  ;;  %2579 = vst.msk [vmem:[#allocation3 + $0xe0] sm:$0xff] %vm589_vm3, %v2512_v13 }
 0x3e3   : > { %v2514_v19 = vpop.permute.xlu1 %2513 }
 0x3e4   : > { %2867 = vrot.lane.b32.xlu0 %v5845_v1, %s4568_s27  ;;  %2580 = vst.msk [vmem:[#allocation3 + $0xe8] sm:$0xff] %vm589_vm3, %v2514_v19 }
 0x3e6   : > { %2869 = vrot.lane.b32.xlu1 %v5857_v22, %s4568_s27 }
 0x3e8   : > { %2871 = vrot.lane.b32.xlu0 %v5875_v25, %s4568_s27 }
 0x3ea   : > { %2873 = vrot.lane.b32.xlu1 %v5883_v29, %s4568_s27 }
 0x3ec   : > { %3031 = vrot.lane.b32.xlu0 %v5727_v7, %s4569_s28 }
 0x3ee   : > { %3033 = vrot.lane.b32.xlu1 %v5739_v49, %s4569_s28 }
 0x3f0   : > { %3035 = vrot.lane.b32.xlu0 %v5750_v21, %s4569_s28 }
 0x3f2   : > { %3037 = vrot.lane.b32.xlu1 %v5756_v45, %s4569_s28 }
 0x3f4   : > { %3223 = vrot.lane.b32.xlu0 %v5956_v47, %s4570_s29 }
 0x3f6   : > { %3225 = vrot.lane.b32.xlu1 %v5961_v57, %s4570_s29  ;;  %v2516_v37 = vpop.permute.xlu0 %2515 }
 0x3f7   : > { %2581 = vst.msk [vmem:[#allocation3 + $0xf0] sm:$0xff] %vm589_vm3, %v2516_v37 }
 0x3f8   : > { %v2518_v39 = vpop.permute.xlu1 %2517  ;;  %3227 = vrot.lane.b32.xlu0 %v5966_v61, %s4570_s29 }
 0x3f9   : > { %2582 = vst.msk [vmem:[#allocation3 + $0xf8] sm:$0xff] %vm589_vm3, %v2518_v39 }
 0x3fa   : > { %3229 = vrot.lane.b32.xlu1 %v5971_v12, %s4570_s29  ;;  %v2648_v7 = vpop.permute.xlu0 %2647 }
 0x3fb   : > { %2743 = vst.msk [vmem:[#allocation3] sm:$0xff] %vm782_vm4, %v2648_v7 }
 0x3fc   : > { %v2650_v49 = vpop.permute.xlu1 %2649  ;;  %3415 = vrot.lane.b32.xlu0 %v5725_v4, %s4571_s30  ;;  %v4554_v4 = vld [vmem:[%s6760_s3] sm:$0xff]  }
 0x3fd   : > { %2744 = vst.msk [vmem:[#allocation3 + $0x8] sm:$0xff] %vm782_vm4, %v2650_v49  ;;  %4494 = vmatprep.subr.bf16.mxu1 %v4554_v4 }
 0x3fe   : > { %3417 = vrot.lane.b32.xlu1 %v5737_v54, %s4571_s30  ;;  %v2652_v47 = vpop.permute.xlu0 %2651  ;;  %4495 = vmatpush3.bf16.msra.mxu1 %v4554_v4 }
 0x3ff   : > { %2745 = vst.msk [vmem:[#allocation3 + $0x10] sm:$0xff] %vm782_vm4, %v2652_v47 }
 0x400   : > { %v2654_v57 = vpop.permute.xlu1 %2653  ;;  %3419 = vrot.lane.b32.xlu0 %v5769_v55, %s4571_s30 }
 0x401   : > { %2746 = vst.msk [vmem:[#allocation3 + $0x18] sm:$0xff] %vm782_vm4, %v2654_v57 }
 0x402   : > { %3421 = vrot.lane.b32.xlu1 %v5781_v63, %s4571_s30  ;;  %v2656_v46 = vpop.permute.xlu0 %2655  ;;  %v4555_v63 = vld [vmem:[%s6760_s3 + $0x8] sm:$0xff]  }
 0x403   : > { %2747 = vst.msk [vmem:[#allocation3 + $0x20] sm:$0xff] %vm782_vm4, %v2656_v46  ;;  %4496 = vmatprep.subr.bf16.mxu1 %v4555_v63 }
 0x404   : > { %v2658_v54 = vpop.permute.xlu1 %2657  ;;  %3607 = vrot.lane.b32.xlu0 %v5750_v21, %s4572_s8  ;;  %4497 = vmatpush3.bf16.msra.mxu1 %v4555_v63 }
 0x405   : > { %2748 = vst.msk [vmem:[#allocation3 + $0x28] sm:$0xff] %vm782_vm4, %v2658_v54 }
 0x406   : > { %3609 = vrot.lane.b32.xlu1 %v5756_v45, %s4572_s8  ;;  %v2660_v55 = vpop.permute.xlu0 %2659  ;;  %v4556_v45 = vld [vmem:[%s6760_s3 + $0x10] ss:$0 sps:$4 sm:$0x33]  }
 0x407   : > { %2749 = vst.msk [vmem:[#allocation3 + $0x30] sm:$0xff] %vm782_vm4, %v2660_v55  ;;  %4533 = vmatprep.subr.msk.bf16.mxu1 %vm2098_vm8, %v4556_v45  ;;  %v4051_v53 = vsel %vm2098_vm8, %v4556_v45, 0 }
 0x408   : > { %v2662_v51 = vpop.permute.xlu1 %2661  ;;  %3611 = vrot.lane.b32.xlu0 %v5767_v60, %s4572_s8  ;;  %4499 = vmatpush3.bf16.msra.mxu1 %v4051_v53 }
 0x409   : > { %2750 = vst.msk [vmem:[#allocation3 + $0x38] sm:$0xff] %vm782_vm4, %v2662_v51 }
 0x40a   : > { %3613 = vrot.lane.b32.xlu1 %v5779_v58, %s4572_s8  ;;  %v2664_v21 = vpop.permute.xlu0 %2663 }
 0x40b   : > { %2751 = vst.msk [vmem:[#allocation3 + $0x40] sm:$0xff] %vm782_vm4, %v2664_v21 }
 0x40c   : > { %v2666_v59 = vpop.permute.xlu1 %2665  ;;  %3799 = vrot.lane.b32.xlu0 %v5966_v61, %s4573_s13 }
 0x40d   : > { %2752 = vst.msk [vmem:[#allocation3 + $0x48] sm:$0xff] %vm782_vm4, %v2666_v59 }
 0x40e   : > { %3801 = vrot.lane.b32.xlu1 %v5971_v12, %s4573_s13  ;;  %v2668_v8 = vpop.permute.xlu0 %2667 }
 0x40f   : > { %2753 = vst.msk [vmem:[#allocation3 + $0x50] sm:$0xff] %vm782_vm4, %v2668_v8 }
 0x410   : > { %v2670_v9 = vpop.permute.xlu1 %2669  ;;  %3803 = vrot.lane.b32.xlu0 %v5975_v2, %s4573_s13 }
 0x411   : > { %2754 = vst.msk [vmem:[#allocation3 + $0x58] sm:$0xff] %vm782_vm4, %v2670_v9 }
 0x412   : > { %3805 = vrot.lane.b32.xlu1 %v5979_v16, %s4573_s13  ;;  %v2672_v61 = vpop.permute.xlu0 %2671 }
 0x413   : > { %2755 = vst.msk [vmem:[#allocation3 + $0x60] sm:$0xff] %vm782_vm4, %v2672_v61 }
 0x414   : > { %v2674_v13 = vpop.permute.xlu1 %2673  ;;  %3039 = vrot.lane.b32.xlu0 %v5767_v60, %s4569_s28 }
 0x415   : > { %2756 = vst.msk [vmem:[#allocation3 + $0x68] sm:$0xff] %vm782_vm4, %v2674_v13  ;;  %v2981_v13 = vld [vmem:[#allocation2 + $0xc1] sm:$0xff] }
 0x416   : > { %3041 = vrot.lane.b32.xlu1 %v5779_v58, %s4569_s28  ;;  %v2676_v12 = vpop.permute.xlu0 %2675 }
 0x417   : > { %2757 = vst.msk [vmem:[#allocation3 + $0x70] sm:$0xff] %vm782_vm4, %v2676_v12 }
 0x418   : > { %v2678_v19 = vpop.permute.xlu1 %2677  ;;  %3043 = vrot.lane.b32.xlu0 %v5790_v6, %s4569_s28 }
 0x419   : > { %2758 = vst.msk [vmem:[#allocation3 + $0x78] sm:$0xff] %vm782_vm4, %v2678_v19  ;;  %v2982_v19 = vld [vmem:[#allocation2 + $0xc9] sm:$0xff] }
 0x41a   : > { %3045 = vrot.lane.b32.xlu1 %v5796_v26, %s4569_s28  ;;  %v2680_v37 = vpop.permute.xlu0 %2679 }
 0x41b   : > { %2759 = vst.msk [vmem:[#allocation3 + $0x80] sm:$0xff] %vm782_vm4, %v2680_v37 }
 0x41c   : > { %v2682_v60 = vpop.permute.xlu1 %2681  ;;  %3231 = vrot.lane.b32.xlu0 %v5975_v2, %s4570_s29 }
 0x41d   : > { %2760 = vst.msk [vmem:[#allocation3 + $0x88] sm:$0xff] %vm782_vm4, %v2682_v60 }
 0x41e   : > { %3233 = vrot.lane.b32.xlu1 %v5979_v16, %s4570_s29  ;;  %v2684_v58 = vpop.permute.xlu0 %2683 }
 0x41f   : > { %2761 = vst.msk [vmem:[#allocation3 + $0x90] sm:$0xff] %vm782_vm4, %v2684_v58 }
 0x420   : > { %v2686_v39 = vpop.permute.xlu1 %2685  ;;  %3235 = vrot.lane.b32.xlu0 %v5983_v41, %s4570_s29 }
 0x421   : > { %2762 = vst.msk [vmem:[#allocation3 + $0x98] sm:$0xff] %vm782_vm4, %v2686_v39 }
 0x422   : > { %3237 = vrot.lane.b32.xlu1 %v5987_v48, %s4570_s29  ;;  %v2688_v7 = vpop.permute.xlu0 %2687 }
 0x423   : > { %2763 = vst.msk [vmem:[#allocation3 + $0xa0] sm:$0xff] %vm782_vm4, %v2688_v7 }
 0x424   : > { %v2690_v2 = vpop.permute.xlu1 %2689  ;;  %3423 = vrot.lane.b32.xlu0 %v5765_v0, %s4571_s30 }
 0x425   : > { %2764 = vst.msk [vmem:[#allocation3 + $0xa8] sm:$0xff] %vm782_vm4, %v2690_v2 }
 0x426   : > { %3425 = vrot.lane.b32.xlu1 %v5777_v5, %s4571_s30  ;;  %v2692_v16 = vpop.permute.xlu0 %2691 }
 0x427   : > { %2765 = vst.msk [vmem:[#allocation3 + $0xb0] sm:$0xff] %vm782_vm4, %v2692_v16 }
 0x428   : > { %v2694_v49 = vpop.permute.xlu1 %2693  ;;  %3427 = vrot.lane.b32.xlu0 %v5809_v33, %s4571_s30 }
 0x429   : > { %2766 = vst.msk [vmem:[#allocation3 + $0xb8] sm:$0xff] %vm782_vm4, %v2694_v49  ;;  %v3557_v49 = vld [vmem:[#allocation2 + $0xd9] sm:$0xff] }
 0x42a   : > { %3429 = vrot.lane.b32.xlu1 %v5821_v36, %s4571_s30  ;;  %v2696_v47 = vpop.permute.xlu0 %2695 }
 0x42b   : > { %2767 = vst.msk [vmem:[#allocation3 + $0xc0] sm:$0xff] %vm782_vm4, %v2696_v47 }
 0x42c   : > { %v2698_v0 = vpop.permute.xlu1 %2697  ;;  %3615 = vrot.lane.b32.xlu0 %v5790_v6, %s4572_s8 }
 0x42d   : > { %2768 = vst.msk [vmem:[#allocation3 + $0xc8] sm:$0xff] %vm782_vm4, %v2698_v0 }
 0x42e   : > { %3617 = vrot.lane.b32.xlu1 %v5796_v26, %s4572_s8  ;;  %v2700_v5 = vpop.permute.xlu0 %2699 }
 0x42f   : > { %2769 = vst.msk [vmem:[#allocation3 + $0xd0] sm:$0xff] %vm782_vm4, %v2700_v5 }
 0x430   : > { %v2702_v33 = vpop.permute.xlu1 %2701  ;;  %3619 = vrot.lane.b32.xlu0 %v5807_v32, %s4572_s8 }
 0x431   : > { %2770 = vst.msk [vmem:[#allocation3 + $0xd8] sm:$0xff] %vm782_vm4, %v2702_v33 }
 0x432   : > { %3621 = vrot.lane.b32.xlu1 %v5819_v35, %s4572_s8  ;;  %v2704_v36 = vpop.permute.xlu0 %2703 }
 0x433   : > { %2771 = vst.msk [vmem:[#allocation3 + $0xe0] sm:$0xff] %vm782_vm4, %v2704_v36 }
 0x434   : > { %v2706_v6 = vpop.permute.xlu1 %2705  ;;  %3807 = vrot.lane.b32.xlu0 %v5983_v41, %s4573_s13 }
 0x435   : > { %2772 = vst.msk [vmem:[#allocation3 + $0xe8] sm:$0xff] %vm782_vm4, %v2706_v6 }
 0x436   : > { %3809 = vrot.lane.b32.xlu1 %v5987_v48, %s4573_s13  ;;  %v2708_v26 = vpop.permute.xlu0 %2707 }
 0x437   : > { %2773 = vst.msk [vmem:[#allocation3 + $0xf0] sm:$0xff] %vm782_vm4, %v2708_v26 }
 0x438   : > { %v2710_v57 = vpop.permute.xlu1 %2709  ;;  %3811 = vrot.lane.b32.xlu0 %v5992_v52, %s4573_s13 }
 0x439   : > { %2774 = vst.msk [vmem:[#allocation3 + $0xf8] sm:$0xff] %vm782_vm4, %v2710_v57 }
 0x43a   : > { %3813 = vrot.lane.b32.xlu1 %v5997_v14, %s4573_s13  ;;  %v2840_v46 = vpop.permute.xlu0 %2839 }
 0x43b   : > { %2935 = vst.msk [vmem:[#allocation3] sm:$0xff] %vm975_vm5, %v2840_v46 }
 0x43c   : > { %v2842_v41 = vpop.permute.xlu1 %2841  ;;  %3047 = vrot.lane.b32.xlu0 %v5807_v32, %s4569_s28 }
 0x43d   : > { %2936 = vst.msk [vmem:[#allocation3 + $0x8] sm:$0xff] %vm975_vm5, %v2842_v41 }
 0x43e   : > { %3049 = vrot.lane.b32.xlu1 %v5819_v35, %s4569_s28  ;;  %v2844_v48 = vpop.permute.xlu0 %2843 }
 0x43f   : > { %2937 = vst.msk [vmem:[#allocation3 + $0x10] sm:$0xff] %vm975_vm5, %v2844_v48 }
 0x440   : > { %v2846_v4 = vpop.permute.xlu1 %2845  ;;  %3051 = vrot.lane.b32.xlu0 %v5830_v56, %s4569_s28 }
 0x441   : > { %2938 = vst.msk [vmem:[#allocation3 + $0x18] sm:$0xff] %vm975_vm5, %v2846_v4 }
 0x442   : > { %3053 = vrot.lane.b32.xlu1 %v5836_v15, %s4569_s28  ;;  %v2848_v54 = vpop.permute.xlu0 %2847 }
 0x443   : > { %2939 = vst.msk [vmem:[#allocation3 + $0x20] sm:$0xff] %vm975_vm5, %v2848_v54 }
 0x444   : > { %v2850_v32 = vpop.permute.xlu1 %2849  ;;  %3239 = vrot.lane.b32.xlu0 %v5992_v52, %s4570_s29 }
 0x445   : > { %2940 = vst.msk [vmem:[#allocation3 + $0x28] sm:$0xff] %vm975_vm5, %v2850_v32  ;;  %v2985_v32 = vld [vmem:[#allocation2 + $0xf1] sm:$0xff] }
 0x446   : > { %3241 = vrot.lane.b32.xlu1 %v5997_v14, %s4570_s29  ;;  %v2852_v35 = vpop.permute.xlu0 %2851 }
 0x447   : > { %2941 = vst.msk [vmem:[#allocation3 + $0x30] sm:$0xff] %vm975_vm5, %v2852_v35 }
 0x448   : > { %v2854_v56 = vpop.permute.xlu1 %2853  ;;  %3243 = vrot.lane.b32.xlu0 %v6002_v18, %s4570_s29 }
 0x449   : > { %2942 = vst.msk [vmem:[#allocation3 + $0x38] sm:$0xff] %vm975_vm5, %v2854_v56  ;;  %v2986_v56 = vld [vmem:[#allocation2 + $0xf9] sm:$0xff] }
 0x44a   : > { %3245 = vrot.lane.b32.xlu1 %v6007_v20, %s4570_s29  ;;  %v2856_v15 = vpop.permute.xlu0 %2855 }
 0x44b   : > { %2943 = vst.msk [vmem:[#allocation3 + $0x40] sm:$0xff] %vm975_vm5, %v2856_v15 }
 0x44c   : > { %v2858_v52 = vpop.permute.xlu1 %2857  ;;  %3431 = vrot.lane.b32.xlu0 %v5805_v31, %s4571_s30  ;;  %v3551_v31 = vld [vmem:[#allocation2 + $0x91] sm:$0xff] }
 0x44d   : > { %2944 = vst.msk [vmem:[#allocation3 + $0x48] sm:$0xff] %vm975_vm5, %v2858_v52 }
 0x44e   : > { %3433 = vrot.lane.b32.xlu1 %v5817_v34, %s4571_s30  ;;  %v2860_v14 = vpop.permute.xlu0 %2859  ;;  %v3552_v34 = vld [vmem:[#allocation2 + $0x99] sm:$0xff] }
 0x44f   : > { %2945 = vst.msk [vmem:[#allocation3 + $0x50] sm:$0xff] %vm975_vm5, %v2860_v14 }
 0x450   : > { %v2862_v55 = vpop.permute.xlu1 %2861  ;;  %3435 = vrot.lane.b32.xlu0 %v5847_v3, %s4571_s30  ;;  %v3553_v3 = vld [vmem:[#allocation2 + $0xa9] sm:$0xff] }
 0x451   : > { %2946 = vst.msk [vmem:[#allocation3 + $0x58] sm:$0xff] %vm975_vm5, %v2862_v55 }
 0x452   : > { %3437 = vrot.lane.b32.xlu1 %v5855_v17, %s4571_s30  ;;  %v2864_v63 = vpop.permute.xlu0 %2863  ;;  %v3554_v17 = vld [vmem:[#allocation2 + $0xb1] sm:$0xff] }
 0x453   : > { %2947 = vst.msk [vmem:[#allocation3 + $0x60] sm:$0xff] %vm975_vm5, %v2864_v63 }
 0x454   : > { %v2866_v51 = vpop.permute.xlu1 %2865  ;;  %3623 = vrot.lane.b32.xlu0 %v3551_v31, %s4572_s8  ;;  %v3561_v31 = vld [vmem:[#allocation2 + $0x109] sm:$0xff] }
 0x455   : > { %2948 = vst.msk [vmem:[#allocation3 + $0x68] sm:$0xff] %vm975_vm5, %v2866_v51 }
 0x456   : > { %3625 = vrot.lane.b32.xlu1 %v3552_v34, %s4572_s8  ;;  %v2868_v21 = vpop.permute.xlu0 %2867  ;;  %v3562_v34 = vld [vmem:[#allocation2 + $0x111] sm:$0xff] }
 0x457   : > { %2949 = vst.msk [vmem:[#allocation3 + $0x70] sm:$0xff] %vm975_vm5, %v2868_v21 }
 0x458   : > { %v2870_v45 = vpop.permute.xlu1 %2869  ;;  %3627 = vrot.lane.b32.xlu0 %v3553_v3, %s4572_s8 }
 0x459   : > { %2950 = vst.msk [vmem:[#allocation3 + $0x78] sm:$0xff] %vm975_vm5, %v2870_v45 }
 0x45a   : > { %3629 = vrot.lane.b32.xlu1 %v3554_v17, %s4572_s8  ;;  %v2872_v59 = vpop.permute.xlu0 %2871 }
 0x45b   : > { %2951 = vst.msk [vmem:[#allocation3 + $0x80] sm:$0xff] %vm975_vm5, %v2872_v59 }
 0x45c   : > { %v2874_v53 = vpop.permute.xlu1 %2873  ;;  %3815 = vrot.lane.b32.xlu0 %v6002_v18, %s4573_s13 }
 0x45d   : > { %2952 = vst.msk [vmem:[#allocation3 + $0x88] sm:$0xff] %vm975_vm5, %v2874_v53  ;;  %v3752_v53 = vld [vmem:[#allocation2 + $0xfa] sm:$0xff] }
 0x45e   : > { %3817 = vrot.lane.b32.xlu1 %v6007_v20, %s4573_s13  ;;  %v3032_v8 = vpop.permute.xlu0 %3031 }
 0x45f   : > { %3127 = vst.msk [vmem:[#allocation3] sm:$0xff] %vm1168_vm6, %v3032_v8 }
 0x460   : > { %v3034_v9 = vpop.permute.xlu1 %3033  ;;  %3819 = vrot.lane.b32.xlu0 %v6011_v24, %s4573_s13 }
 0x461   : > { %3128 = vst.msk [vmem:[#allocation3 + $0x8] sm:$0xff] %vm1168_vm6, %v3034_v9 }
 0x462   : > { %3821 = vrot.lane.b32.xlu1 %v6015_v42, %s4573_s13  ;;  %v3036_v61 = vpop.permute.xlu0 %3035 }
 0x463   : > { %3129 = vst.msk [vmem:[#allocation3 + $0x10] sm:$0xff] %vm1168_vm6, %v3036_v61  ;;  %v3753_v61 = vld [vmem:[#allocation2 + $0x10a] sm:$0xff] }
 0x464   : > { %v3038_v18 = vpop.permute.xlu1 %3037  ;;  %3055 = vrot.lane.b32.xlu0 %v3553_v3, %s4569_s28  ;;  %v3751_v3 = vld [vmem:[#allocation2 + $0xf2] sm:$0xff] }
 0x465   : > { %3130 = vst.msk [vmem:[#allocation3 + $0x18] sm:$0xff] %vm1168_vm6, %v3038_v18 }
 0x466   : > { %3057 = vrot.lane.b32.xlu1 %v3554_v17, %s4569_s28  ;;  %v3224_v20 = vpop.permute.xlu0 %3223 }
 0x467   : > { %3319 = vst.msk [vmem:[#allocation3] sm:$0xff] %vm1361_vm7, %v3224_v20 }
 0x468   : > { %v3226_v12 = vpop.permute.xlu1 %3225  ;;  %3059 = vrot.lane.b32.xlu0 %v2981_v13, %s4569_s28 }
 0x469   : > { %3320 = vst.msk [vmem:[#allocation3 + $0x8] sm:$0xff] %vm1361_vm7, %v3226_v12  ;;  %v3754_v12 = vld [vmem:[#allocation2 + $0x112] sm:$0xff] }
 0x46a   : > { %3061 = vrot.lane.b32.xlu1 %v2982_v19, %s4569_s28  ;;  %v3228_v37 = vpop.permute.xlu0 %3227 }
 0x46b   : > { %3321 = vst.msk [vmem:[#allocation3 + $0x10] sm:$0xff] %vm1361_vm7, %v3228_v37 }
 0x46c   : > { %v3230_v60 = vpop.permute.xlu1 %3229  ;;  %3247 = vrot.lane.b32.xlu0 %v6011_v24, %s4570_s29 }
 0x46d   : > { %3322 = vst.msk [vmem:[#allocation3 + $0x18] sm:$0xff] %vm1361_vm7, %v3230_v60 }
 0x46e   : > { %3249 = vrot.lane.b32.xlu1 %v6015_v42, %s4570_s29  ;;  %v3416_v58 = vpop.permute.xlu0 %3415 }
 0x46f   : > { %3511 = vst.msk [vmem:[#allocation3] sm:$0xff] %vm1555_vm9, %v3416_v58 }
 0x470   : > { %v3418_v39 = vpop.permute.xlu1 %3417  ;;  %3251 = vrot.lane.b32.xlu0 %v6019_v27, %s4570_s29 }
 0x471   : > { %3512 = vst.msk [vmem:[#allocation3 + $0x8] sm:$0xff] %vm1555_vm9, %v3418_v39 }
 0x472   : > { %3253 = vrot.lane.b32.xlu1 %v6023_v28, %s4570_s29  ;;  %v3420_v7 = vpop.permute.xlu0 %3419 }
 0x473   : > { %3513 = vst.msk [vmem:[#allocation3 + $0x10] sm:$0xff] %vm1555_vm9, %v3420_v7 }
 0x474   : > { %v3422_v24 = vpop.permute.xlu1 %3421  ;;  %3439 = vrot.lane.b32.xlu0 %v5845_v1, %s4571_s30 }
 0x475   : > { %3514 = vst.msk [vmem:[#allocation3 + $0x18] sm:$0xff] %vm1555_vm9, %v3422_v24  ;;  %v2989_v24 = vld [vmem:[#allocation2 + $0x121] sm:$0xff] }
 0x476   : > { %3441 = vrot.lane.b32.xlu1 %v5857_v22, %s4571_s30  ;;  %v3608_v42 = vpop.permute.xlu0 %3607 }
 0x477   : > { %3703 = vst.msk [vmem:[#allocation3] sm:$0xff] %vm1748_vm10, %v3608_v42 }
 0x478   : > { %v3610_v2 = vpop.permute.xlu1 %3609  ;;  %3443 = vrot.lane.b32.xlu0 %v5875_v25, %s4571_s30 }
 0x479   : > { %3704 = vst.msk [vmem:[#allocation3 + $0x8] sm:$0xff] %vm1748_vm10, %v3610_v2 }
 0x47a   : > { %3445 = vrot.lane.b32.xlu1 %v5883_v29, %s4571_s30  ;;  %v3612_v16 = vpop.permute.xlu0 %3611  ;;  %v3558_v29 = vld [vmem:[#allocation2 + $0xe1] sm:$0xff] }
 0x47b   : > { %3705 = vst.msk [vmem:[#allocation3 + $0x10] sm:$0xff] %vm1748_vm10, %v3612_v16 }
 0x47c   : > { %v3614_v1 = vpop.permute.xlu1 %3613  ;;  %3631 = vrot.lane.b32.xlu0 %v2981_v13, %s4572_s8 }
 0x47d   : > { %3706 = vst.msk [vmem:[#allocation3 + $0x18] sm:$0xff] %vm1748_vm10, %v3614_v1  ;;  %v3181_v1 = vld [vmem:[#allocation2 + $0x122] sm:$0xff] }
 0x47e   : > { %3633 = vrot.lane.b32.xlu1 %v2982_v19, %s4572_s8  ;;  %v3800_v22 = vpop.permute.xlu0 %3799 }
 0x47f   : > { %3895 = vst.msk [vmem:[#allocation3] sm:$0xff] %vm1941_vm11, %v3800_v22 }
 0x480   : > { %v3802_v25 = vpop.permute.xlu1 %3801  ;;  %3635 = vrot.lane.b32.xlu0 %v3557_v49, %s4572_s8 }
 0x481   : > { %3896 = vst.msk [vmem:[#allocation3 + $0x8] sm:$0xff] %vm1941_vm11, %v3802_v25 }
 0x482   : > { %3637 = vrot.lane.b32.xlu1 %v3558_v29, %s4572_s8  ;;  %v3804_v47 = vpop.permute.xlu0 %3803 }
 0x483   : > { %3897 = vst.msk [vmem:[#allocation3 + $0x10] sm:$0xff] %vm1941_vm11, %v3804_v47 }
 0x484   : > { %v3806_v0 = vpop.permute.xlu1 %3805  ;;  %3823 = vrot.lane.b32.xlu0 %v6019_v27, %s4573_s13 }
 0x485   : > { %3898 = vst.msk [vmem:[#allocation3 + $0x18] sm:$0xff] %vm1941_vm11, %v3806_v0  ;;  %v3372_v0 = vld [vmem:[#allocation2 + $0x128] sm:$0xff] }
 0x486   : > { %3825 = vrot.lane.b32.xlu1 %v6023_v28, %s4573_s13  ;;  %v3040_v5 = vpop.permute.xlu0 %3039  ;;  %v3927_v36 = vld [vmem:[#allocation3] sm:$0xff] }
 0x487   : > { %3131 = vst.msk [vmem:[#allocation3 + $0x20] sm:$0xff] %vm1168_vm6, %v3040_v5 }
 0x488   : > { %v3042_v33 = vpop.permute.xlu1 %3041  ;;  %3827 = vrot.lane.b32.xlu0 %v6028_v38, %s4573_s13  ;;  %v3928_v6 = vld [vmem:[#allocation3 + $0x8] sm:$0xff] }
 0x489   : > { %3132 = vst.msk [vmem:[#allocation3 + $0x28] sm:$0xff] %vm1168_vm6, %v3042_v33  ;;  %v3959_v26 = vpack.c.bf16 %v3928_v6, %v3927_v36  ;;  %v3373_v33 = vld [vmem:[#allocation2 + $0x138] sm:$0xff]  ;;  %v3374_v6 = vld [vmem:[#allocation2 + $0x140] sm:$0xff] }
 0x48a   : > { %3829 = vrot.lane.b32.xlu1 %v6033_v43, %s4573_s13  ;;  %v3044_v27 = vpop.permute.xlu0 %3043  ;;  %v3929_v57 = vld [vmem:[#allocation3 + $0x10] sm:$0xff] }
 0x48b   : > { %3133 = vst.msk [vmem:[#allocation3 + $0x30] sm:$0xff] %vm1168_vm6, %v3044_v27  ;;  %4500 = vmatprep.mubr.msk.bf16.mxu1 %vm2049_vm12, %v3959_v26 }
 0x48c   : > { %v3046_v28 = vpop.permute.xlu1 %3045  ;;  %2875 = vrot.lane.b32.xlu0 %v5873_v23, %s4568_s27  ;;  %v3930_v46 = vld [vmem:[#allocation3 + $0x18] sm:$0xff] }
 0x48d   : > { %3134 = vst.msk [vmem:[#allocation3 + $0x38] sm:$0xff] %vm1168_vm6, %v3046_v28  ;;  %v3960_v41 = vpack.c.bf16 %v3930_v46, %v3929_v57 }
 0x48e   : > { %2877 = vrot.lane.b32.xlu1 %v5885_v30, %s4568_s27  ;;  %v3232_v48 = vpop.permute.xlu0 %3231 }
 0x48f   : > { %3323 = vst.msk [vmem:[#allocation3 + $0x20] sm:$0xff] %vm1361_vm7, %v3232_v48  ;;  %4501 = vmatmul.mubr.msk.bf16.vlgmr.msra.gmra.mrb[0].mxu1 %vm2049_vm12, %v3960_v41  ;;  %v3565_v48 = vld [vmem:[#allocation2 + $0x139] sm:$0xff] }
 0x490   : > { %v3234_v4 = vpop.permute.xlu1 %3233  ;;  %3063 = vrot.lane.b32.xlu0 %v3557_v49, %s4569_s28  ;;  %v3182_v49 = vld [vmem:[#allocation2 + $0x12a] sm:$0xff] }
 0x491   : > { %3324 = vst.msk [vmem:[#allocation3 + $0x28] sm:$0xff] %vm1361_vm7, %v3234_v4 }
 0x492   : > { %3065 = vrot.lane.b32.xlu1 %v3558_v29, %s4569_s28  ;;  %v3236_v54 = vpop.permute.xlu0 %3235  ;;  %v3371_v29 = vld [vmem:[#allocation2 + $0x120] sm:$0xff] }
 0x493   : > { %3325 = vst.msk [vmem:[#allocation3 + $0x30] sm:$0xff] %vm1361_vm7, %v3236_v54 }
 0x494   : > { %v3238_v35 = vpop.permute.xlu1 %3237  ;;  %3067 = vrot.lane.b32.xlu0 %v2985_v32, %s4569_s28 }
 0x495   : > { %3326 = vst.msk [vmem:[#allocation3 + $0x38] sm:$0xff] %vm1361_vm7, %v3238_v35  ;;  %v3566_v35 = vld [vmem:[#allocation2 + $0x141] sm:$0xff] }
 0x496   : > { %3069 = vrot.lane.b32.xlu1 %v2986_v56, %s4569_s28  ;;  %v3424_v15 = vpop.permute.xlu0 %3423 }
 0x497   : > { %3515 = vst.msk [vmem:[#allocation3 + $0x20] sm:$0xff] %vm1555_vm9, %v3424_v15 }
 0x498   : > { %v3426_v52 = vpop.permute.xlu1 %3425  ;;  %3255 = vrot.lane.b32.xlu0 %v6028_v38, %s4570_s29 }
 0x499   : > { %3516 = vst.msk [vmem:[#allocation3 + $0x28] sm:$0xff] %vm1555_vm9, %v3426_v52 }
 0x49a   : > { %3257 = vrot.lane.b32.xlu1 %v6033_v43, %s4570_s29  ;;  %v3428_v14 = vpop.permute.xlu0 %3427 }
 0x49b   : > { %3517 = vst.msk [vmem:[#allocation3 + $0x30] sm:$0xff] %vm1555_vm9, %v3428_v14 }
 0x49c   : > { %v3430_v55 = vpop.permute.xlu1 %3429  ;;  %3259 = vrot.lane.b32.xlu0 %v6038_v50, %s4570_s29 }
 0x49d   : > { %3518 = vst.msk [vmem:[#allocation3 + $0x38] sm:$0xff] %vm1555_vm9, %v3430_v55  ;;  %v3757_v55 = vld [vmem:[#allocation2 + $0x13a] sm:$0xff] }
 0x49e   : > { %3261 = vrot.lane.b32.xlu1 %v6043_v62, %s4570_s29  ;;  %v3616_v63 = vpop.permute.xlu0 %3615 }
 0x49f   : > { %3707 = vst.msk [vmem:[#allocation3 + $0x20] sm:$0xff] %vm1748_vm10, %v3616_v63 }
 0x4a0   : > { %v3618_v38 = vpop.permute.xlu1 %3617  ;;  %3447 = vrot.lane.b32.xlu0 %v5873_v23, %s4571_s30 }
 0x4a1   : > { %3708 = vst.msk [vmem:[#allocation3 + $0x28] sm:$0xff] %vm1748_vm10, %v3618_v38  ;;  %v3758_v38 = vld [vmem:[#allocation2 + $0x142] sm:$0xff] }
 0x4a2   : > { %3449 = vrot.lane.b32.xlu1 %v5885_v30, %s4571_s30  ;;  %v3620_v43 = vpop.permute.xlu0 %3619 }
 0x4a3   : > { %3709 = vst.msk [vmem:[#allocation3 + $0x30] sm:$0xff] %vm1748_vm10, %v3620_v43 }
 0x4a4   : > { %v3622_v50 = vpop.permute.xlu1 %3621  ;;  %3451 = vrot.lane.b32.xlu0 %v5903_v40, %s4571_s30 }
 0x4a5   : > { %3710 = vst.msk [vmem:[#allocation3 + $0x38] sm:$0xff] %vm1748_vm10, %v3622_v50 }
 0x4a6   : > { %3453 = vrot.lane.b32.xlu1 %v5911_v11, %s4571_s30  ;;  %v3808_v62 = vpop.permute.xlu0 %3807 }
 0x4a7   : > { %3899 = vst.msk [vmem:[#allocation3 + $0x20] sm:$0xff] %vm1941_vm11, %v3808_v62 }
 0x4a8   : > { %v3810_v23 = vpop.permute.xlu1 %3809  ;;  %3639 = vrot.lane.b32.xlu0 %v2985_v32, %s4572_s8 }
 0x4a9   : > { %3900 = vst.msk [vmem:[#allocation3 + $0x28] sm:$0xff] %vm1941_vm11, %v3810_v23  ;;  %v2801_v23 = vld [vmem:[#allocation2 + $0x150] sm:$0xff] }
 0x4aa   : > { %3641 = vrot.lane.b32.xlu1 %v2986_v56, %s4572_s8  ;;  %v3812_v30 = vpop.permute.xlu0 %3811 }
 0x4ab   : > { %3901 = vst.msk [vmem:[#allocation3 + $0x30] sm:$0xff] %vm1941_vm11, %v3812_v30 }
 0x4ac   : > { %v3814_v51 = vpop.permute.xlu1 %3813  ;;  %3643 = vrot.lane.b32.xlu0 %v3561_v31, %s4572_s8 }
 0x4ad   : > { %3902 = vst.msk [vmem:[#allocation3 + $0x38] sm:$0xff] %vm1941_vm11, %v3814_v51 }
 0x4ae   : > { %3645 = vrot.lane.b32.xlu1 %v3562_v34, %s4572_s8  ;;  %v3048_v21 = vpop.permute.xlu0 %3047  ;;  %v3931_v17 = vld [vmem:[#allocation3 + $0x20] sm:$0xff] }
 0x4af   : > { %3135 = vst.msk [vmem:[#allocation3 + $0x40] sm:$0xff] %vm1168_vm6, %v3048_v21 }
 0x4b0   : > { %v3050_v45 = vpop.permute.xlu1 %3049  ;;  %3831 = vrot.lane.b32.xlu0 %v3751_v3, %s4573_s13  ;;  %v3932_v59 = vld [vmem:[#allocation3 + $0x28] sm:$0xff] }
 0x4b1   : > { %3136 = vst.msk [vmem:[#allocation3 + $0x48] sm:$0xff] %vm1168_vm6, %v3050_v45  ;;  %v3961_v8 = vpack.c.bf16 %v3932_v59, %v3931_v17  ;;  %v2993_v3 = vld [vmem:[#allocation2 + $0x151] sm:$0xff]  ;;  %v2994_v17 = vld [vmem:[#allocation2 + $0x159] sm:$0xff] }
 0x4b2   : > { %3833 = vrot.lane.b32.xlu1 %v3752_v53, %s4573_s13  ;;  %v3052_v9 = vpop.permute.xlu0 %3051  ;;  %v3933_v20 = vld [vmem:[#allocation3 + $0x30] sm:$0xff] }
 0x4b3   : > { %3137 = vst.msk [vmem:[#allocation3 + $0x50] sm:$0xff] %vm1168_vm6, %v3052_v9  ;;  %4504 = vmatprep.mubr.msk.bf16.mxu1 %vm2049_vm12, %v3961_v8  ;;  %v3185_v9 = vld [vmem:[#allocation2 + $0x152] sm:$0xff] }
 0x4b4   : > { %v3054_v18 = vpop.permute.xlu1 %3053  ;;  %3835 = vrot.lane.b32.xlu0 %v3753_v61, %s4573_s13  ;;  %v3934_v13 = vld [vmem:[#allocation3 + $0x38] sm:$0xff] }
 0x4b5   : > { %3138 = vst.msk [vmem:[#allocation3 + $0x58] sm:$0xff] %vm1168_vm6, %v3054_v18  ;;  %v3962_v19 = vpack.c.bf16 %v3934_v13, %v3933_v20  ;;  %v3186_v18 = vld [vmem:[#allocation2 + $0x15a] sm:$0xff] }
 0x4b6   : > { %3837 = vrot.lane.b32.xlu1 %v3754_v12, %s4573_s13  ;;  %v3240_v37 = vpop.permute.xlu0 %3239 }
 0x4b7   : > { %3327 = vst.msk [vmem:[#allocation3 + $0x40] sm:$0xff] %vm1361_vm7, %v3240_v37  ;;  %4505 = vmatmul.mubr.msk.bf16.gmra.mrb[4].mxu1 %vm2049_vm12, %v3962_v19 }
 0x4b8   : > { %v3242_v60 = vpop.permute.xlu1 %3241  ;;  %2879 = vrot.lane.b32.xlu0 %v5903_v40, %s4568_s27 }
 0x4b9   : > { %3328 = vst.msk [vmem:[#allocation3 + $0x48] sm:$0xff] %vm1361_vm7, %v3242_v60 }
 0x4ba   : > { %2881 = vrot.lane.b32.xlu1 %v5911_v11, %s4568_s27  ;;  %v3244_v58 = vpop.permute.xlu0 %3243 }
 0x4bb   : > { %3329 = vst.msk [vmem:[#allocation3 + $0x50] sm:$0xff] %vm1361_vm7, %v3244_v58  ;;  %v3377_v58 = vld [vmem:[#allocation2 + $0x168] sm:$0xff] }
 0x4bc   : > { %v3246_v39 = vpop.permute.xlu1 %3245  ;;  %2883 = vrot.lane.b32.xlu0 %v5901_v10, %s4568_s27 }
 0x4bd   : > { %3330 = vst.msk [vmem:[#allocation3 + $0x58] sm:$0xff] %vm1361_vm7, %v3246_v39 }
 0x4be   : > { %2885 = vrot.lane.b32.xlu1 %v5913_v44, %s4568_s27  ;;  %v3432_v7 = vpop.permute.xlu0 %3431  ;;  %v2990_v44 = vld [vmem:[#allocation2 + $0x129] sm:$0xff] }
 0x4bf   : > { %3519 = vst.msk [vmem:[#allocation3 + $0x40] sm:$0xff] %vm1555_vm9, %v3432_v7 }
 0x4c0   : > { %v3434_v40 = vpop.permute.xlu1 %3433  ;;  %3071 = vrot.lane.b32.xlu0 %v3561_v31, %s4569_s28  ;;  %v2802_v31 = vld [vmem:[#allocation2 + $0x158] sm:$0xff] }
 0x4c1   : > { %3520 = vst.msk [vmem:[#allocation3 + $0x48] sm:$0xff] %vm1555_vm9, %v3434_v40 }
 0x4c2   : > { %3073 = vrot.lane.b32.xlu1 %v3562_v34, %s4569_s28  ;;  %v3436_v11 = vpop.permute.xlu0 %3435 }
 0x4c3   : > { %3521 = vst.msk [vmem:[#allocation3 + $0x50] sm:$0xff] %vm1555_vm9, %v3436_v11  ;;  %v3378_v11 = vld [vmem:[#allocation2 + $0x170] sm:$0xff] }
 0x4c4   : > { %v3438_v10 = vpop.permute.xlu1 %3437  ;;  %3075 = vrot.lane.b32.xlu0 %v2989_v24, %s4569_s28 }
 0x4c5   : > { %3522 = vst.msk [vmem:[#allocation3 + $0x58] sm:$0xff] %vm1555_vm9, %v3438_v10 }
 0x4c6   : > { %3077 = vrot.lane.b32.xlu1 %v2990_v44, %s4569_s28  ;;  %v3624_v42 = vpop.permute.xlu0 %3623 }
 0x4c7   : > { %3711 = vst.msk [vmem:[#allocation3 + $0x40] sm:$0xff] %vm1748_vm10, %v3624_v42 }
 0x4c8   : > { %v3626_v2 = vpop.permute.xlu1 %3625  ;;  %3263 = vrot.lane.b32.xlu0 %v3753_v61, %s4570_s29 }
 0x4c9   : > { %3712 = vst.msk [vmem:[#allocation3 + $0x48] sm:$0xff] %vm1748_vm10, %v3626_v2  ;;  %v3569_v2 = vld [vmem:[#allocation2 + $0x169] sm:$0xff] }
 0x4ca   : > { %3265 = vrot.lane.b32.xlu1 %v3754_v12, %s4570_s29  ;;  %v3628_v16 = vpop.permute.xlu0 %3627 }
 0x4cb   : > { %3713 = vst.msk [vmem:[#allocation3 + $0x50] sm:$0xff] %vm1748_vm10, %v3628_v16 }
 0x4cc   : > { %v3630_v22 = vpop.permute.xlu1 %3629  ;;  %3267 = vrot.lane.b32.xlu0 %v3181_v1, %s4570_s29 }
 0x4cd   : > { %3714 = vst.msk [vmem:[#allocation3 + $0x58] sm:$0xff] %vm1748_vm10, %v3630_v22 }
 0x4ce   : > { %3269 = vrot.lane.b32.xlu1 %v3182_v49, %s4570_s29  ;;  %v3816_v25 = vpop.permute.xlu0 %3815 }
 0x4cf   : > { %3903 = vst.msk [vmem:[#allocation3 + $0x40] sm:$0xff] %vm1941_vm11, %v3816_v25 }
 0x4d0   : > { %v3818_v47 = vpop.permute.xlu1 %3817  ;;  %3455 = vrot.lane.b32.xlu0 %v3371_v29, %s4571_s30  ;;  %v3761_v29 = vld [vmem:[#allocation2 + $0x16a] sm:$0xff] }
 0x4d1   : > { %3904 = vst.msk [vmem:[#allocation3 + $0x48] sm:$0xff] %vm1941_vm11, %v3818_v47 }
 0x4d2   : > { %3457 = vrot.lane.b32.xlu1 %v3372_v0, %s4571_s30  ;;  %v3820_v5 = vpop.permute.xlu0 %3819  ;;  %v3762_v0 = vld [vmem:[#allocation2 + $0x172] sm:$0xff] }
 0x4d3   : > { %3905 = vst.msk [vmem:[#allocation3 + $0x50] sm:$0xff] %vm1941_vm11, %v3820_v5 }
 0x4d4   : > { %v3822_v36 = vpop.permute.xlu1 %3821  ;;  %3459 = vrot.lane.b32.xlu0 %v3373_v33, %s4571_s30 }
 0x4d5   : > { %3906 = vst.msk [vmem:[#allocation3 + $0x58] sm:$0xff] %vm1941_vm11, %v3822_v36 }
 0x4d6   : > { %3461 = vrot.lane.b32.xlu1 %v3374_v6, %s4571_s30  ;;  %v3056_v26 = vpop.permute.xlu0 %3055  ;;  %v3935_v28 = vld [vmem:[#allocation3 + $0x40] sm:$0xff] }
 0x4d7   : > { %3139 = vst.msk [vmem:[#allocation3 + $0x60] sm:$0xff] %vm1168_vm6, %v3056_v26 }
 0x4d8   : > { %v3058_v27 = vpop.permute.xlu1 %3057  ;;  %3647 = vrot.lane.b32.xlu0 %v2989_v24, %s4572_s8  ;;  %v3936_v57 = vld [vmem:[#allocation3 + $0x48] sm:$0xff] }
 0x4d9   : > { %3140 = vst.msk [vmem:[#allocation3 + $0x68] sm:$0xff] %vm1168_vm6, %v3058_v27  ;;  %v3963_v46 = vpack.c.bf16 %v3936_v57, %v3935_v28  ;;  %v2806_v27 = vld [vmem:[#allocation2 + $0x188] sm:$0xff] }
 0x4da   : > { %3649 = vrot.lane.b32.xlu1 %v2990_v44, %s4572_s8  ;;  %v3060_v41 = vpop.permute.xlu0 %3059  ;;  %v3937_v54 = vld [vmem:[#allocation3 + $0x50] sm:$0xff] }
 0x4db   : > { %3141 = vst.msk [vmem:[#allocation3 + $0x70] sm:$0xff] %vm1168_vm6, %v3060_v41  ;;  %4508 = vmatprep.mubr.msk.bf16.mxu1 %vm2049_vm12, %v3963_v46  ;;  %v2997_v41 = vld [vmem:[#allocation2 + $0x181] sm:$0xff] }
 0x4dc   : > { %v3062_v4 = vpop.permute.xlu1 %3061  ;;  %3651 = vrot.lane.b32.xlu0 %v3565_v48, %s4572_s8  ;;  %v3938_v32 = vld [vmem:[#allocation3 + $0x58] sm:$0xff] }
 0x4dd   : > { %3142 = vst.msk [vmem:[#allocation3 + $0x78] sm:$0xff] %vm1168_vm6, %v3062_v4  ;;  %v3964_v56 = vpack.c.bf16 %v3938_v32, %v3937_v54  ;;  %v2998_v4 = vld [vmem:[#allocation2 + $0x189] sm:$0xff] }
 0x4de   : > { %3653 = vrot.lane.b32.xlu1 %v3566_v35, %s4572_s8  ;;  %v3248_v15 = vpop.permute.xlu0 %3247 }
 0x4df   : > { %3331 = vst.msk [vmem:[#allocation3 + $0x60] sm:$0xff] %vm1361_vm7, %v3248_v15  ;;  %4509 = vmatmul.mubr.msk.bf16.gmra.mrb[8].mxu1 %vm2049_vm12, %v3964_v56  ;;  %v3189_v56 = vld [vmem:[#allocation2 + $0x182] sm:$0xff] }
 0x4e0   : > { %v3250_v52 = vpop.permute.xlu1 %3249  ;;  %3839 = vrot.lane.b32.xlu0 %v3181_v1, %s4573_s13  ;;  %v3570_v1 = vld [vmem:[#allocation2 + $0x171] sm:$0xff] }
 0x4e1   : > { %3332 = vst.msk [vmem:[#allocation3 + $0x68] sm:$0xff] %vm1361_vm7, %v3250_v52 }
 0x4e2   : > { %3841 = vrot.lane.b32.xlu1 %v3182_v49, %s4573_s13  ;;  %v3252_v14 = vpop.permute.xlu0 %3251 }
 0x4e3   : > { %3333 = vst.msk [vmem:[#allocation3 + $0x70] sm:$0xff] %vm1361_vm7, %v3252_v14 }
 0x4e4   : > { %v3254_v63 = vpop.permute.xlu1 %3253  ;;  %3843 = vrot.lane.b32.xlu0 %v3757_v55, %s4573_s13 }
 0x4e5   : > { %3334 = vst.msk [vmem:[#allocation3 + $0x78] sm:$0xff] %vm1361_vm7, %v3254_v63 }
 0x4e6   : > { %3845 = vrot.lane.b32.xlu1 %v3758_v38, %s4573_s13  ;;  %v3440_v43 = vpop.permute.xlu0 %3439 }
 0x4e7   : > { %3523 = vst.msk [vmem:[#allocation3 + $0x60] sm:$0xff] %vm1555_vm9, %v3440_v43 }
 0x4e8   : > { %v3442_v50 = vpop.permute.xlu1 %3441  ;;  %2887 = vrot.lane.b32.xlu0 %v3373_v33, %s4568_s27 }
 0x4e9   : > { %3524 = vst.msk [vmem:[#allocation3 + $0x68] sm:$0xff] %vm1555_vm9, %v3442_v50 }
 0x4ea   : > { %2889 = vrot.lane.b32.xlu1 %v3374_v6, %s4568_s27  ;;  %v3444_v62 = vpop.permute.xlu0 %3443  ;;  %v2805_v6 = vld [vmem:[#allocation2 + $0x180] sm:$0xff] }
 0x4eb   : > { %3525 = vst.msk [vmem:[#allocation3 + $0x70] sm:$0xff] %vm1555_vm9, %v3444_v62 }
 0x4ec   : > { %v3446_v30 = vpop.permute.xlu1 %3445  ;;  %2891 = vrot.lane.b32.xlu0 %v2801_v23, %s4568_s27 }
 0x4ed   : > { %3526 = vst.msk [vmem:[#allocation3 + $0x78] sm:$0xff] %vm1555_vm9, %v3446_v30  ;;  %v3381_v30 = vld [vmem:[#allocation2 + $0x198] sm:$0xff] }
 0x4ee   : > { %2893 = vrot.lane.b32.xlu1 %v2802_v31, %s4568_s27  ;;  %v3632_v51 = vpop.permute.xlu0 %3631 }
 0x4ef   : > { %3715 = vst.msk [vmem:[#allocation3 + $0x60] sm:$0xff] %vm1748_vm10, %v3632_v51  ;;  %v3382_v51 = vld [vmem:[#allocation2 + $0x1a0] sm:$0xff] }
 0x4f0   : > { %v3634_v34 = vpop.permute.xlu1 %3633  ;;  %3079 = vrot.lane.b32.xlu0 %v3565_v48, %s4569_s28 }
 0x4f1   : > { %3716 = vst.msk [vmem:[#allocation3 + $0x68] sm:$0xff] %vm1748_vm10, %v3634_v34 }
 0x4f2   : > { %3081 = vrot.lane.b32.xlu1 %v3566_v35, %s4569_s28  ;;  %v3636_v21 = vpop.permute.xlu0 %3635 }
 0x4f3   : > { %3717 = vst.msk [vmem:[#allocation3 + $0x70] sm:$0xff] %vm1748_vm10, %v3636_v21 }
 0x4f4   : > { %v3638_v45 = vpop.permute.xlu1 %3637  ;;  %3083 = vrot.lane.b32.xlu0 %v2993_v3, %s4569_s28 }
 0x4f5   : > { %3718 = vst.msk [vmem:[#allocation3 + $0x78] sm:$0xff] %vm1748_vm10, %v3638_v45  ;;  %v3573_v45 = vld [vmem:[#allocation2 + $0x199] sm:$0xff] }
 0x4f6   : > { %3085 = vrot.lane.b32.xlu1 %v2994_v17, %s4569_s28  ;;  %v3824_v59 = vpop.permute.xlu0 %3823 }
 0x4f7   : > { %3907 = vst.msk [vmem:[#allocation3 + $0x60] sm:$0xff] %vm1941_vm11, %v3824_v59  ;;  %v3574_v59 = vld [vmem:[#allocation2 + $0x1a1] sm:$0xff] }
 0x4f8   : > { %v3826_v53 = vpop.permute.xlu1 %3825  ;;  %3271 = vrot.lane.b32.xlu0 %v3757_v55, %s4570_s29  ;;  %v3190_v55 = vld [vmem:[#allocation2 + $0x18a] sm:$0xff] }
 0x4f9   : > { %3908 = vst.msk [vmem:[#allocation3 + $0x68] sm:$0xff] %vm1941_vm11, %v3826_v53 }
 0x4fa   : > { %3273 = vrot.lane.b32.xlu1 %v3758_v38, %s4570_s29  ;;  %v3828_v8 = vpop.permute.xlu0 %3827 }
 0x4fb   : > { %3909 = vst.msk [vmem:[#allocation3 + $0x70] sm:$0xff] %vm1941_vm11, %v3828_v8 }
 0x4fc   : > { %v3830_v61 = vpop.permute.xlu1 %3829  ;;  %3275 = vrot.lane.b32.xlu0 %v3185_v9, %s4570_s29 }
 0x4fd   : > { %3910 = vst.msk [vmem:[#allocation3 + $0x78] sm:$0xff] %vm1941_vm11, %v3830_v61  ;;  %v3765_v61 = vld [vmem:[#allocation2 + $0x19a] sm:$0xff] }
 0x4fe   : > { %3277 = vrot.lane.b32.xlu1 %v3186_v18, %s4570_s29  ;;  %v2876_v20 = vpop.permute.xlu0 %2875  ;;  %v3939_v12 = vld [vmem:[#allocation3 + $0x60] sm:$0xff] }
 0x4ff   : > { %2953 = vst.msk [vmem:[#allocation3 + $0x90] sm:$0xff] %vm975_vm5, %v2876_v20  ;;  %v3766_v20 = vld [vmem:[#allocation2 + $0x1a2] sm:$0xff] }
 0x500   : > { %v2878_v13 = vpop.permute.xlu1 %2877  ;;  %3463 = vrot.lane.b32.xlu0 %v2801_v23, %s4571_s30  ;;  %v3940_v19 = vld [vmem:[#allocation3 + $0x68] sm:$0xff] }
 0x501   : > { %2954 = vst.msk [vmem:[#allocation3 + $0x98] sm:$0xff] %vm975_vm5, %v2878_v13  ;;  %v3965_v37 = vpack.c.bf16 %v3940_v19, %v3939_v12 }
 0x502   : > { %3465 = vrot.lane.b32.xlu1 %v2802_v31, %s4571_s30  ;;  %v3064_v60 = vpop.permute.xlu0 %3063  ;;  %v3941_v7 = vld [vmem:[#allocation3 + $0x70] sm:$0xff] }
 0x503   : > { %3143 = vst.msk [vmem:[#allocation3 + $0x80] sm:$0xff] %vm1168_vm6, %v3064_v60  ;;  %4512 = vmatprep.mubr.msk.bf16.mxu1 %vm2049_vm12, %v3965_v37 }
 0x504   : > { %v3066_v39 = vpop.permute.xlu1 %3065  ;;  %3467 = vrot.lane.b32.xlu0 %v3377_v58, %s4571_s30  ;;  %v3942_v40 = vld [vmem:[#allocation3 + $0x78] sm:$0xff] }
 0x505   : > { %3144 = vst.msk [vmem:[#allocation3 + $0x88] sm:$0xff] %vm1168_vm6, %v3066_v39  ;;  %v3966_v24 = vpack.c.bf16 %v3942_v40, %v3941_v7 }
 0x506   : > { %3469 = vrot.lane.b32.xlu1 %v3378_v11, %s4571_s30  ;;  %v3068_v10 = vpop.permute.xlu0 %3067 }
 0x507   : > { %3145 = vst.msk [vmem:[#allocation3 + $0x90] sm:$0xff] %vm1168_vm6, %v3068_v10  ;;  %4513 = vmatmul.mubr.msk.bf16.gmra.mrb[12].mxu1 %vm2049_vm12, %v3966_v24 }
 0x508   : > { %v3070_v44 = vpop.permute.xlu1 %3069  ;;  %3655 = vrot.lane.b32.xlu0 %v2993_v3, %s4572_s8 }
 0x509   : > { %3146 = vst.msk [vmem:[#allocation3 + $0x98] sm:$0xff] %vm1168_vm6, %v3070_v44 }
 0x50a   : > { %3657 = vrot.lane.b32.xlu1 %v2994_v17, %s4572_s8  ;;  %v3256_v42 = vpop.permute.xlu0 %3255 }
 0x50b   : > { %3335 = vst.msk [vmem:[#allocation3 + $0x80] sm:$0xff] %vm1361_vm7, %v3256_v42 }
 0x50c   : > { %v3258_v16 = vpop.permute.xlu1 %3257  ;;  %3659 = vrot.lane.b32.xlu0 %v3569_v2, %s4572_s8 }
 0x50d   : > { %3336 = vst.msk [vmem:[#allocation3 + $0x88] sm:$0xff] %vm1361_vm7, %v3258_v16 }
 0x50e   : > { %3661 = vrot.lane.b32.xlu1 %v3570_v1, %s4572_s8  ;;  %v3260_v22 = vpop.permute.xlu0 %3259 }
 0x50f   : > { %3337 = vst.msk [vmem:[#allocation3 + $0x90] sm:$0xff] %vm1361_vm7, %v3260_v22 }
 0x510   : > { %v3262_v49 = vpop.permute.xlu1 %3261  ;;  %3847 = vrot.lane.b32.xlu0 %v3185_v9, %s4573_s13 }
 0x511   : > { %3338 = vst.msk [vmem:[#allocation3 + $0x98] sm:$0xff] %vm1361_vm7, %v3262_v49  ;;  %v6567_v49 = vld [vmem:[%s6761_s4] ss:$0 sm:$0xff] }
 0x512   : > { %3849 = vrot.lane.b32.xlu1 %v3186_v18, %s4573_s13  ;;  %v3448_v25 = vpop.permute.xlu0 %3447 }
 0x513   : > { %3527 = vst.msk [vmem:[#allocation3 + $0x80] sm:$0xff] %vm1555_vm9, %v3448_v25 }
 0x514   : > { %v3450_v47 = vpop.permute.xlu1 %3449  ;;  %3851 = vrot.lane.b32.xlu0 %v3761_v29, %s4573_s13 }
 0x515   : > { %3528 = vst.msk [vmem:[#allocation3 + $0x88] sm:$0xff] %vm1555_vm9, %v3450_v47 }
 0x516   : > { %3853 = vrot.lane.b32.xlu1 %v3762_v0, %s4573_s13  ;;  %v3452_v5 = vpop.permute.xlu0 %3451 }
 0x517   : > { %3529 = vst.msk [vmem:[#allocation3 + $0x90] sm:$0xff] %vm1555_vm9, %v3452_v5 }
 0x518   : > { %v3454_v33 = vpop.permute.xlu1 %3453  ;;  %2895 = vrot.lane.b32.xlu0 %v3377_v58, %s4568_s27 }
 0x519   : > { %3530 = vst.msk [vmem:[#allocation3 + $0x98] sm:$0xff] %vm1555_vm9, %v3454_v33  ;;  %v4216_v33 = vld [vmem:[%s4666_s24 + $0x10] sm:$0xff] }
 0x51a   : > { %2897 = vrot.lane.b32.xlu1 %v3378_v11, %s4568_s27  ;;  %v3640_v36 = vpop.permute.xlu0 %3639 }
 0x51b   : > { %3719 = vst.msk [vmem:[#allocation3 + $0x80] sm:$0xff] %vm1748_vm10, %v3640_v36 }
 0x51c   : > { %v3642_v26 = vpop.permute.xlu1 %3641  ;;  %2899 = vrot.lane.b32.xlu0 %v2805_v6, %s4568_s27 }
 0x51d   : > { %3720 = vst.msk [vmem:[#allocation3 + $0x88] sm:$0xff] %vm1748_vm10, %v3642_v26  ;;  %v4214_v26 = vld [vmem:[%s4666_s24] sm:$0xff] }
 0x51e   : > { %2901 = vrot.lane.b32.xlu1 %v2806_v27, %s4568_s27  ;;  %v3644_v28 = vpop.permute.xlu0 %3643 }
 0x51f   : > { %3721 = vst.msk [vmem:[#allocation3 + $0x90] sm:$0xff] %vm1748_vm10, %v3644_v28 }
 0x520   : > { %v3646_v57 = vpop.permute.xlu1 %3645  ;;  %3087 = vrot.lane.b32.xlu0 %v3569_v2, %s4569_s28 }
 0x521   : > { %3722 = vst.msk [vmem:[#allocation3 + $0x98] sm:$0xff] %vm1748_vm10, %v3646_v57 }
 0x522   : > { %3089 = vrot.lane.b32.xlu1 %v3570_v1, %s4569_s28  ;;  %v3832_v46 = vpop.permute.xlu0 %3831 }
 0x523   : > { %3911 = vst.msk [vmem:[#allocation3 + $0x80] sm:$0xff] %vm1941_vm11, %v3832_v46  ;;  %v4217_v46 = vld [vmem:[%s4666_s24 + $0x18] sm:$0xff] }
 0x524   : > { %v3834_v48 = vpop.permute.xlu1 %3833  ;;  %3091 = vrot.lane.b32.xlu0 %v2997_v41, %s4569_s28 }
 0x525   : > { %3912 = vst.msk [vmem:[#allocation3 + $0x88] sm:$0xff] %vm1941_vm11, %v3834_v48 }
 0x526   : > { %3093 = vrot.lane.b32.xlu1 %v2998_v4, %s4569_s28  ;;  %v3836_v54 = vpop.permute.xlu0 %3835 }
 0x527   : > { %3913 = vst.msk [vmem:[#allocation3 + $0x90] sm:$0xff] %vm1941_vm11, %v3836_v54  ;;  %v4215_v54 = vld [vmem:[%s4666_s24 + $0x8] sm:$0xff] }
 0x528   : > { %v3838_v32 = vpop.permute.xlu1 %3837  ;;  %3279 = vrot.lane.b32.xlu0 %v3761_v29, %s4570_s29 }
 0x529   : > { %3914 = vst.msk [vmem:[#allocation3 + $0x98] sm:$0xff] %vm1941_vm11, %v3838_v32 }
 0x52a   : > { %3281 = vrot.lane.b32.xlu1 %v3762_v0, %s4570_s29  ;;  %v2880_v35 = vpop.permute.xlu0 %2879  ;;  %v3943_v52 = vld [vmem:[#allocation3 + $0x80] sm:$0xff] }
 0x52b   : > { %2955 = vst.msk [vmem:[#allocation3 + $0xa0] sm:$0xff] %vm975_vm5, %v2880_v35 }
 0x52c   : > { %v2882_v15 = vpop.permute.xlu1 %2881  ;;  %3283 = vrot.lane.b32.xlu0 %v3189_v56, %s4570_s29  ;;  %v3944_v14 = vld [vmem:[#allocation3 + $0x88] sm:$0xff] }
 0x52d   : > { %2956 = vst.msk [vmem:[#allocation3 + $0xa8] sm:$0xff] %vm975_vm5, %v2882_v15  ;;  %v3967_v63 = vpack.c.bf16 %v3944_v14, %v3943_v52 }
 0x52e   : > { %3285 = vrot.lane.b32.xlu1 %v3190_v55, %s4570_s29  ;;  %v2884_v38 = vpop.permute.xlu0 %2883  ;;  %v3945_v50 = vld [vmem:[#allocation3 + $0x90] sm:$0xff] }
 0x52f   : > { %2957 = vst.msk [vmem:[#allocation3 + $0xb0] sm:$0xff] %vm975_vm5, %v2884_v38  ;;  %4516 = vmatprep.mubr.msk.bf16.mxu1 %vm2049_vm12, %v3967_v63 }
 0x530   : > { %v2886_v43 = vpop.permute.xlu1 %2885  ;;  %3471 = vrot.lane.b32.xlu0 %v2805_v6, %s4571_s30  ;;  %v3946_v62 = vld [vmem:[#allocation3 + $0x98] sm:$0xff] }
 0x531   : > { %2958 = vst.msk [vmem:[#allocation3 + $0xb8] sm:$0xff] %vm975_vm5, %v2886_v43  ;;  %v3968_v23 = vpack.c.bf16 %v3946_v62, %v3945_v50 }
 0x532   : > { %3473 = vrot.lane.b32.xlu1 %v2806_v27, %s4571_s30  ;;  %v3072_v31 = vpop.permute.xlu0 %3071 }
 0x533   : > { %3147 = vst.msk [vmem:[#allocation3 + $0xa0] sm:$0xff] %vm1168_vm6, %v3072_v31  ;;  %4517 = vmatmul.mubr.msk.bf16.gmra.mrb[16].mxu1 %vm2049_vm12, %v3968_v23 }
 0x534   : > { %v3074_v34 = vpop.permute.xlu1 %3073  ;;  %3475 = vrot.lane.b32.xlu0 %v3381_v30, %s4571_s30 }
 0x535   : > { %3148 = vst.msk [vmem:[#allocation3 + $0xa8] sm:$0xff] %vm1168_vm6, %v3074_v34 }
 0x536   : > { %3477 = vrot.lane.b32.xlu1 %v3382_v51, %s4571_s30  ;;  %v3076_v21 = vpop.permute.xlu0 %3075  ;;  %s6580_s30 = scalar_lea.vmem %s6762_s5, %s4416_s21 }
 0x537   : > { %3149 = vst.msk [vmem:[#allocation3 + $0xb0] sm:$0xff] %vm1168_vm6, %v3076_v21 }
 0x538   : > { %v3078_v3 = vpop.permute.xlu1 %3077  ;;  %3663 = vrot.lane.b32.xlu0 %v2997_v41, %s4572_s8 }
 0x539   : > { %3150 = vst.msk [vmem:[#allocation3 + $0xb8] sm:$0xff] %vm1168_vm6, %v3078_v3 }
 0x53a   : > { %3665 = vrot.lane.b32.xlu1 %v2998_v4, %s4572_s8  ;;  %v3264_v17 = vpop.permute.xlu0 %3263 }
 0x53b   : > { %3339 = vst.msk [vmem:[#allocation3 + $0xa0] sm:$0xff] %vm1361_vm7, %v3264_v17 }
 0x53c   : > { %v3266_v53 = vpop.permute.xlu1 %3265  ;;  %3667 = vrot.lane.b32.xlu0 %v3573_v45, %s4572_s8 }
 0x53d   : > { %3340 = vst.msk [vmem:[#allocation3 + $0xa8] sm:$0xff] %vm1361_vm7, %v3266_v53 }
 0x53e   : > { %3669 = vrot.lane.b32.xlu1 %v3574_v59, %s4572_s8  ;;  %v3268_v8 = vpop.permute.xlu0 %3267 }
 0x53f   : > { %3341 = vst.msk [vmem:[#allocation3 + $0xb0] sm:$0xff] %vm1361_vm7, %v3268_v8 }
 0x540   : > { %v3270_v9 = vpop.permute.xlu1 %3269  ;;  %3855 = vrot.lane.b32.xlu0 %v3189_v56, %s4573_s13 }
 0x541   : > { %3342 = vst.msk [vmem:[#allocation3 + $0xb8] sm:$0xff] %vm1361_vm7, %v3270_v9  ;;  %v4220_v9 = vld [vmem:[%s4666_s24 + $0x30] sm:$0xff] }
 0x542   : > { %3857 = vrot.lane.b32.xlu1 %v3190_v55, %s4573_s13  ;;  %v3456_v18 = vpop.permute.xlu0 %3455 }
 0x543   : > { %3531 = vst.msk [vmem:[#allocation3 + $0xa0] sm:$0xff] %vm1555_vm9, %v3456_v18 }
 0x544   : > { %v3458_v13 = vpop.permute.xlu1 %3457  ;;  %3859 = vrot.lane.b32.xlu0 %v3765_v61, %s4573_s13 }
 0x545   : > { %3532 = vst.msk [vmem:[#allocation3 + $0xa8] sm:$0xff] %vm1555_vm9, %v3458_v13 }
 0x546   : > { %3861 = vrot.lane.b32.xlu1 %v3766_v20, %s4573_s13  ;;  %v3460_v12 = vpop.permute.xlu0 %3459  ;;  %v4218_v20 = vld [vmem:[%s4666_s24 + $0x20] sm:$0xff] }
 0x547   : > { %3533 = vst.msk [vmem:[#allocation3 + $0xb0] sm:$0xff] %vm1555_vm9, %v3460_v12 }
 0x548   : > { %v3462_v19 = vpop.permute.xlu1 %3461 }
 0x549   : > { %3534 = vst.msk [vmem:[#allocation3 + $0xb8] sm:$0xff] %vm1555_vm9, %v3462_v19 }
 0x54a   : > { %v3648_v37 = vpop.permute.xlu0 %3647 }
 0x54b   : > { %3723 = vst.msk [vmem:[#allocation3 + $0xa0] sm:$0xff] %vm1748_vm10, %v3648_v37  ;;  %v4221_v37 = vld [vmem:[%s4666_s24 + $0x38] sm:$0xff] }
 0x54c   : > { %v3650_v60 = vpop.permute.xlu1 %3649 }
 0x54d   : > { %3724 = vst.msk [vmem:[#allocation3 + $0xa8] sm:$0xff] %vm1748_vm10, %v3650_v60 }
 0x54e   : > { %v3652_v58 = vpop.permute.xlu0 %3651 }
 0x54f   : > { %3725 = vst.msk [vmem:[#allocation3 + $0xb0] sm:$0xff] %vm1748_vm10, %v3652_v58 }
 0x550   : > { %v3654_v39 = vpop.permute.xlu1 %3653 }
 0x551   : > { %3726 = vst.msk [vmem:[#allocation3 + $0xb8] sm:$0xff] %vm1748_vm10, %v3654_v39 }
 0x552   : > { %v3840_v7 = vpop.permute.xlu0 %3839 }
 0x553   : > { %3915 = vst.msk [vmem:[#allocation3 + $0xa0] sm:$0xff] %vm1941_vm11, %v3840_v7 }
 0x554   : > { %v3842_v40 = vpop.permute.xlu1 %3841 }
 0x555   : > { %3916 = vst.msk [vmem:[#allocation3 + $0xa8] sm:$0xff] %vm1941_vm11, %v3842_v40 }
 0x556   : > { %v3844_v11 = vpop.permute.xlu0 %3843 }
 0x557   : > { %3917 = vst.msk [vmem:[#allocation3 + $0xb0] sm:$0xff] %vm1941_vm11, %v3844_v11  ;;  %v4219_v11 = vld [vmem:[%s4666_s24 + $0x28] sm:$0xff] }
 0x558   : > { %v3846_v24 = vpop.permute.xlu1 %3845 }
 0x559   : > { %3918 = vst.msk [vmem:[#allocation3 + $0xb8] sm:$0xff] %vm1941_vm11, %v3846_v24 }
 0x55a   : > { %v2888_v10 = vpop.permute.xlu0 %2887  ;;  %v3947_v42 = vld [vmem:[#allocation3 + $0xa0] sm:$0xff] }
 0x55b   : > { %2959 = vst.msk [vmem:[#allocation3 + $0xc0] sm:$0xff] %vm975_vm5, %v2888_v10 }
 0x55c   : > { %v2890_v44 = vpop.permute.xlu1 %2889  ;;  %v3948_v2 = vld [vmem:[#allocation3 + $0xa8] sm:$0xff] }
 0x55d   : > { %2960 = vst.msk [vmem:[#allocation3 + $0xc8] sm:$0xff] %vm975_vm5, %v2890_v44  ;;  %v3969_v16 = vpack.c.bf16 %v3948_v2, %v3947_v42 }
 0x55e   : > { %v2892_v1 = vpop.permute.xlu0 %2891  ;;  %v3949_v25 = vld [vmem:[#allocation3 + $0xb0] sm:$0xff] }
 0x55f   : > { %2961 = vst.msk [vmem:[#allocation3 + $0xd0] sm:$0xff] %vm975_vm5, %v2892_v1  ;;  %4520 = vmatprep.mubr.msk.bf16.mxu1 %vm2049_vm12, %v3969_v16 }
 0x560   : > { %v2894_v22 = vpop.permute.xlu1 %2893  ;;  %v3950_v29 = vld [vmem:[#allocation3 + $0xb8] sm:$0xff] }
 0x561   : > { %2962 = vst.msk [vmem:[#allocation3 + $0xd8] sm:$0xff] %vm975_vm5, %v2894_v22  ;;  %v3970_v47 = vpack.c.bf16 %v3950_v29, %v3949_v25 }
 0x562   : > { %v3080_v0 = vpop.permute.xlu0 %3079  ;;  %v4502_v5 = vpop.f32.mrb[0].mxu1 }
 0x563   : > { %3151 = vst.msk [vmem:[#allocation3 + $0xc0] sm:$0xff] %vm1168_vm6, %v3080_v0  ;;  %v4096_v36 = vadd.f32 %v4502_v5, %v6567_v49  ;;  %v4087_v6 = vpop.f32.mrb[1].mxu1  ;;  %4521 = vmatmul.mubr.msk.bf16.gmra.mrb[20].mxu1 %vm2049_vm12, %v3970_v47 }
 0x564   : > { %v4088_v27 = vadd.f32 %v6567_v49, %v4087_v6  ;;  %v3082_v28 = vpop.permute.xlu1 %3081  ;;  %v4503_v57 = vpop.f32.mrb[2].mxu1 }
 0x565   : > { %v4248_v41 = vadd.f32 %v4216_v33, %v4096_v36  ;;  %3152 = vst.msk [vmem:[#allocation3 + $0xc8] sm:$0xff] %vm1168_vm6, %v3082_v28  ;;  %v4099_v48 = vadd.f32 %v4503_v57, %v6567_v49  ;;  %v4090_v4 = vpop.f32.mrb[3].mxu1 }
 0x566   : > { %v4246_v32 = vadd.f32 %v4214_v26, %v4088_v27  ;;  %v4091_v35 = vadd.f32 %v6567_v49, %v4090_v4  ;;  %v3084_v56 = vpop.permute.xlu0 %3083 }
 0x567   : > { %4280 = vst.msk [vmem:[%s6580_s30 + $0x10] sm:$0xff] %vm226_vm0, %v4248_v41  ;;  %v4249_v15 = vadd.f32 %v4217_v46, %v4099_v48 }
 0x568   : > { %3153 = vst.msk [vmem:[#allocation3 + $0xd0] sm:$0xff] %vm1168_vm6, %v3084_v56  ;;  %v4247_v52 = vadd.f32 %v4215_v54, %v4091_v35  ;;  %v3086_v14 = vpop.permute.xlu1 %3085 }
 0x569   : > { %4278 = vst.msk [vmem:[%s6580_s30] sm:$0xff] %vm226_vm0, %v4246_v32  ;;  %4281 = vst.msk [vmem:[%s6580_s30 + $0x18] sm:$0xff] %vm226_vm0, %v4249_v15  ;;  %v4224_v15 = vld [vmem:[%s4666_s24 + $0x50] sm:$0xff] }
 0x56a   : > { %3154 = vst.msk [vmem:[#allocation3 + $0xd8] sm:$0xff] %vm1168_vm6, %v3086_v14  ;;  %v3272_v55 = vpop.permute.xlu0 %3271 }
 0x56b   : > { %4279 = vst.msk [vmem:[%s6580_s30 + $0x8] sm:$0xff] %vm226_vm0, %v4247_v52 }
 0x56c   : > { %3343 = vst.msk [vmem:[#allocation3 + $0xc0] sm:$0xff] %vm1361_vm7, %v3272_v55  ;;  %v3274_v63 = vpop.permute.xlu1 %3273  ;;  %v4222_v55 = vld [vmem:[%s4666_s24 + $0x40] sm:$0xff] }
 0x56d   : > { %3344 = vst.msk [vmem:[#allocation3 + $0xc8] sm:$0xff] %vm1361_vm7, %v3274_v63 }
 0x56e   : > { %v3276_v38 = vpop.permute.xlu0 %3275 }
 0x56f   : > { %3345 = vst.msk [vmem:[#allocation3 + $0xd0] sm:$0xff] %vm1361_vm7, %v3276_v38 }
 0x570   : > { %v3278_v43 = vpop.permute.xlu1 %3277 }
 0x571   : > { %3346 = vst.msk [vmem:[#allocation3 + $0xd8] sm:$0xff] %vm1361_vm7, %v3278_v43 }
 0x572   : > { %v3464_v50 = vpop.permute.xlu0 %3463 }
 0x573   : > { %3535 = vst.msk [vmem:[#allocation3 + $0xc0] sm:$0xff] %vm1555_vm9, %v3464_v50  ;;  %v4225_v50 = vld [vmem:[%s4666_s24 + $0x58] sm:$0xff] }
 0x574   : > { %v3466_v62 = vpop.permute.xlu1 %3465 }
 0x575   : > { %3536 = vst.msk [vmem:[#allocation3 + $0xc8] sm:$0xff] %vm1555_vm9, %v3466_v62 }
 0x576   : > { %v3468_v23 = vpop.permute.xlu0 %3467 }
 0x577   : > { %3537 = vst.msk [vmem:[#allocation3 + $0xd0] sm:$0xff] %vm1555_vm9, %v3468_v23 }
 0x578   : > { %v3470_v30 = vpop.permute.xlu1 %3469 }
 0x579   : > { %3538 = vst.msk [vmem:[#allocation3 + $0xd8] sm:$0xff] %vm1555_vm9, %v3470_v30 }
 0x57a   : > { %v3656_v31 = vpop.permute.xlu0 %3655 }
 0x57b   : > { %3727 = vst.msk [vmem:[#allocation3 + $0xc0] sm:$0xff] %vm1748_vm10, %v3656_v31  ;;  %v4223_v31 = vld [vmem:[%s4666_s24 + $0x48] sm:$0xff] }
 0x57c   : > { %v3658_v51 = vpop.permute.xlu1 %3657 }
 0x57d   : > { %3728 = vst.msk [vmem:[#allocation3 + $0xc8] sm:$0xff] %vm1748_vm10, %v3658_v51 }
 0x57e   : > { %v3660_v34 = vpop.permute.xlu0 %3659 }
 0x57f   : > { %3729 = vst.msk [vmem:[#allocation3 + $0xd0] sm:$0xff] %vm1748_vm10, %v3660_v34 }
 0x580   : > { %v3662_v21 = vpop.permute.xlu1 %3661 }
 0x581   : > { %3730 = vst.msk [vmem:[#allocation3 + $0xd8] sm:$0xff] %vm1748_vm10, %v3662_v21 }
 0x582   : > { %v3848_v3 = vpop.permute.xlu0 %3847 }
 0x583   : > { %3919 = vst.msk [vmem:[#allocation3 + $0xc0] sm:$0xff] %vm1941_vm11, %v3848_v3 }
 0x584   : > { %v3850_v45 = vpop.permute.xlu1 %3849 }
 0x585   : > { %3920 = vst.msk [vmem:[#allocation3 + $0xc8] sm:$0xff] %vm1941_vm11, %v3850_v45 }
 0x586   : > { %v3852_v17 = vpop.permute.xlu0 %3851 }
 0x587   : > { %3921 = vst.msk [vmem:[#allocation3 + $0xd0] sm:$0xff] %vm1941_vm11, %v3852_v17 }
 0x588   : > { %v3854_v59 = vpop.permute.xlu1 %3853 }
 0x589   : > { %3922 = vst.msk [vmem:[#allocation3 + $0xd8] sm:$0xff] %vm1941_vm11, %v3854_v59 }
 0x58a   : > { %v2896_v53 = vpop.permute.xlu0 %2895  ;;  %v4506_v8 = vpop.f32.mrb[4].mxu1  ;;  %v3951_v60 = vld [vmem:[#allocation3 + $0xc0] sm:$0xff] }
 0x58b   : > { %2963 = vst.msk [vmem:[#allocation3 + $0xe0] sm:$0xff] %vm975_vm5, %v2896_v53  ;;  %v4112_v61 = vadd.f32 %v4506_v8, %v6567_v49  ;;  %v4103_v18 = vpop.f32.mrb[5].mxu1 }
 0x58c   : > { %v4104_v13 = vadd.f32 %v6567_v49, %v4103_v18  ;;  %v2898_v12 = vpop.permute.xlu1 %2897  ;;  %v4507_v19 = vpop.f32.mrb[6].mxu1  ;;  %v3952_v58 = vld [vmem:[#allocation3 + $0xc8] sm:$0xff] }
 0x58d   : > { %v4252_v39 = vadd.f32 %v4220_v9, %v4112_v61  ;;  %2964 = vst.msk [vmem:[#allocation3 + $0xe8] sm:$0xff] %vm975_vm5, %v2898_v12  ;;  %v4115_v7 = vadd.f32 %v4507_v19, %v6567_v49  ;;  %v4106_v40 = vpop.f32.mrb[7].mxu1  ;;  %v3971_v24 = vpack.c.bf16 %v3952_v58, %v3951_v60 }
 0x58e   : > { %v4250_v10 = vadd.f32 %v4218_v20, %v4104_v13  ;;  %v4107_v44 = vadd.f32 %v6567_v49, %v4106_v40  ;;  %v2900_v42 = vpop.permute.xlu0 %2899  ;;  %v3953_v22 = vld [vmem:[#allocation3 + $0xd0] sm:$0xff]  ;;  %v4228_v13 = vld [vmem:[%s4666_s24 + $0x70] sm:$0xff] }
 0x58f   : > { %4284 = vst.msk [vmem:[%s6580_s30 + $0x30] sm:$0xff] %vm226_vm0, %v4252_v39  ;;  %v4253_v2 = vadd.f32 %v4221_v37, %v4115_v7  ;;  %4524 = vmatprep.mubr.msk.bf16.mxu1 %vm2049_vm12, %v3971_v24  ;;  %v4226_v37 = vld [vmem:[%s4666_s24 + $0x60] sm:$0xff]  ;;  %v4229_v39 = vld [vmem:[%s4666_s24 + $0x78] sm:$0xff]  ;;  %v4227_v24 = vld [vmem:[%s4666_s24 + $0x68] sm:$0xff] }
 0x590   : > { %2965 = vst.msk [vmem:[#allocation3 + $0xf0] sm:$0xff] %vm975_vm5, %v2900_v42  ;;  %v4251_v16 = vadd.f32 %v4219_v11, %v4107_v44  ;;  %v2902_v1 = vpop.permute.xlu1 %2901  ;;  %v3954_v25 = vld [vmem:[#allocation3 + $0xd8] sm:$0xff] }
 0x591   : > { %4282 = vst.msk [vmem:[%s6580_s30 + $0x20] sm:$0xff] %vm226_vm0, %v4250_v10  ;;  %4285 = vst.msk [vmem:[%s6580_s30 + $0x38] sm:$0xff] %vm226_vm0, %v4253_v2  ;;  %v3972_v29 = vpack.c.bf16 %v3954_v25, %v3953_v22 }
 0x592   : > { %2966 = vst.msk [vmem:[#allocation3 + $0xf8] sm:$0xff] %vm975_vm5, %v2902_v1  ;;  %v3088_v47 = vpop.permute.xlu0 %3087  ;;  %v4232_v1 = vld [vmem:[%s4666_s24 + $0x90] sm:$0xff] }
 0x593   : > { %4283 = vst.msk [vmem:[%s6580_s30 + $0x28] sm:$0xff] %vm226_vm0, %v4251_v16  ;;  %4525 = vmatmul.mubr.msk.bf16.gmra.mrb[24].mxu1 %vm2049_vm12, %v3972_v29  ;;  %v4230_v29 = vld [vmem:[%s4666_s24 + $0x80] sm:$0xff] }
 0x594   : > { %3155 = vst.msk [vmem:[#allocation3 + $0xe0] sm:$0xff] %vm1168_vm6, %v3088_v47  ;;  %v3090_v0 = vpop.permute.xlu1 %3089 }
 0x595   : > { %3156 = vst.msk [vmem:[#allocation3 + $0xe8] sm:$0xff] %vm1168_vm6, %v3090_v0 }
 0x596   : > { %v3092_v5 = vpop.permute.xlu0 %3091 }
 0x597   : > { %3157 = vst.msk [vmem:[#allocation3 + $0xf0] sm:$0xff] %vm1168_vm6, %v3092_v5  ;;  %v4233_v5 = vld [vmem:[%s4666_s24 + $0x98] sm:$0xff] }
 0x598   : > { %v3094_v33 = vpop.permute.xlu1 %3093 }
 0x599   : > { %3158 = vst.msk [vmem:[#allocation3 + $0xf8] sm:$0xff] %vm1168_vm6, %v3094_v33 }
 0x59a   : > { %v3280_v36 = vpop.permute.xlu0 %3279 }
 0x59b   : > { %3347 = vst.msk [vmem:[#allocation3 + $0xe0] sm:$0xff] %vm1361_vm7, %v3280_v36 }
 0x59c   : > { %v3282_v6 = vpop.permute.xlu1 %3281 }
 0x59d   : > { %3348 = vst.msk [vmem:[#allocation3 + $0xe8] sm:$0xff] %vm1361_vm7, %v3282_v6 }
 0x59e   : > { %v3284_v26 = vpop.permute.xlu0 %3283 }
 0x59f   : > { %3349 = vst.msk [vmem:[#allocation3 + $0xf0] sm:$0xff] %vm1361_vm7, %v3284_v26  ;;  %v4231_v26 = vld [vmem:[%s4666_s24 + $0x88] sm:$0xff] }
 0x5a0   : > { %v3286_v27 = vpop.permute.xlu1 %3285 }
 0x5a1   : > { %3350 = vst.msk [vmem:[#allocation3 + $0xf8] sm:$0xff] %vm1361_vm7, %v3286_v27 }
 0x5a2   : > { %v3472_v28 = vpop.permute.xlu0 %3471 }
 0x5a3   : > { %3539 = vst.msk [vmem:[#allocation3 + $0xe0] sm:$0xff] %vm1555_vm9, %v3472_v28 }
 0x5a4   : > { %v3474_v57 = vpop.permute.xlu1 %3473 }
 0x5a5   : > { %3540 = vst.msk [vmem:[#allocation3 + $0xe8] sm:$0xff] %vm1555_vm9, %v3474_v57 }
 0x5a6   : > { %v3476_v46 = vpop.permute.xlu0 %3475 }
 0x5a7   : > { %3541 = vst.msk [vmem:[#allocation3 + $0xf0] sm:$0xff] %vm1555_vm9, %v3476_v46 }
 0x5a8   : > { %v3478_v41 = vpop.permute.xlu1 %3477 }
 0x5a9   : > { %3542 = vst.msk [vmem:[#allocation3 + $0xf8] sm:$0xff] %vm1555_vm9, %v3478_v41 }
 0x5aa   : > { %v3664_v48 = vpop.permute.xlu0 %3663 }
 0x5ab   : > { %3731 = vst.msk [vmem:[#allocation3 + $0xe0] sm:$0xff] %vm1748_vm10, %v3664_v48  ;;  %v4236_v48 = vld [vmem:[%s4666_s24 + $0xb0] sm:$0xff] }
 0x5ac   : > { %v3666_v4 = vpop.permute.xlu1 %3665 }
 0x5ad   : > { %3732 = vst.msk [vmem:[#allocation3 + $0xe8] sm:$0xff] %vm1748_vm10, %v3666_v4 }
 0x5ae   : > { %v3668_v54 = vpop.permute.xlu0 %3667 }
 0x5af   : > { %3733 = vst.msk [vmem:[#allocation3 + $0xf0] sm:$0xff] %vm1748_vm10, %v3668_v54 }
 0x5b0   : > { %v3670_v32 = vpop.permute.xlu1 %3669 }
 0x5b1   : > { %3734 = vst.msk [vmem:[#allocation3 + $0xf8] sm:$0xff] %vm1748_vm10, %v3670_v32  ;;  %v4234_v32 = vld [vmem:[%s4666_s24 + $0xa0] sm:$0xff] }
 0x5b2   : > { %v3856_v35 = vpop.permute.xlu0 %3855  ;;  %v4510_v56 = vpop.f32.mrb[8].mxu1 }
 0x5b3   : > { %3923 = vst.msk [vmem:[#allocation3 + $0xe0] sm:$0xff] %vm1941_vm11, %v3856_v35  ;;  %v4128_v52 = vadd.f32 %v4510_v56, %v6567_v49  ;;  %v4119_v14 = vpop.f32.mrb[9].mxu1 }
 0x5b4   : > { %v4120_v63 = vadd.f32 %v6567_v49, %v4119_v14  ;;  %v3858_v38 = vpop.permute.xlu1 %3857  ;;  %v4511_v43 = vpop.f32.mrb[10].mxu1 }
 0x5b5   : > { %v4256_v62 = vadd.f32 %v4224_v15, %v4128_v52  ;;  %3924 = vst.msk [vmem:[#allocation3 + $0xe8] sm:$0xff] %vm1941_vm11, %v3858_v38  ;;  %v4131_v23 = vadd.f32 %v4511_v43, %v6567_v49  ;;  %v4122_v30 = vpop.f32.mrb[11].mxu1  ;;  %v4237_v15 = vld [vmem:[%s4666_s24 + $0xb8] sm:$0xff] }
 0x5b6   : > { %v4254_v51 = vadd.f32 %v4222_v55, %v4120_v63  ;;  %v4123_v34 = vadd.f32 %v6567_v49, %v4122_v30  ;;  %v3860_v21 = vpop.permute.xlu0 %3859  ;;  %v4235_v63 = vld [vmem:[%s4666_s24 + $0xa8] sm:$0xff]  ;;  %v4240_v30 = vld [vmem:[%s4666_s24 + $0xd0] sm:$0xff] }
 0x5b7   : > { %4288 = vst.msk [vmem:[%s6580_s30 + $0x50] sm:$0xff] %vm226_vm0, %v4256_v62  ;;  %v4257_v3 = vadd.f32 %v4225_v50, %v4131_v23 }
 0x5b8   : > { %3925 = vst.msk [vmem:[#allocation3 + $0xf0] sm:$0xff] %vm1941_vm11, %v3860_v21  ;;  %v4255_v45 = vadd.f32 %v4223_v31, %v4123_v34  ;;  %v3862_v17 = vpop.permute.xlu1 %3861  ;;  %v4238_v34 = vld [vmem:[%s4666_s24 + $0xc0] sm:$0xff] }
 0x5b9   : > { %4286 = vst.msk [vmem:[%s6580_s30 + $0x40] sm:$0xff] %vm226_vm0, %v4254_v51  ;;  %4289 = vst.msk [vmem:[%s6580_s30 + $0x58] sm:$0xff] %vm226_vm0, %v4257_v3 }
 0x5ba   : > { %3926 = vst.msk [vmem:[#allocation3 + $0xf8] sm:$0xff] %vm1941_vm11, %v3862_v17  ;;  %v3955_v59 = vld [vmem:[#allocation3 + $0xe0] sm:$0xff] }
 0x5bb   : > { %4287 = vst.msk [vmem:[%s6580_s30 + $0x48] sm:$0xff] %vm226_vm0, %v4255_v45  ;;  %v4241_v45 = vld [vmem:[%s4666_s24 + $0xd8] sm:$0xff] }
 0x5bc   : > { %v3956_v53 = vld [vmem:[#allocation3 + $0xe8] sm:$0xff] }
 0x5bd   : > { %v3973_v8 = vpack.c.bf16 %v3956_v53, %v3955_v59 }
 0x5bf   : > { %v3957_v9 = vld [vmem:[#allocation3 + $0xf0] sm:$0xff]  ;;  %4528 = vmatprep.mubr.msk.bf16.mxu1 %vm2049_vm12, %v3973_v8  ;;  %v4239_v8 = vld [vmem:[%s4666_s24 + $0xc8] sm:$0xff] }
 0x5c1   : > { %v3958_v61 = vld [vmem:[#allocation3 + $0xf8] sm:$0xff] }
 0x5c2   : > { %v3974_v18 = vpack.c.bf16 %v3958_v61, %v3957_v9 }
 0x5c4   : > { %4529 = vmatmul.mubr.msk.bf16.gmra.mrb[28].mxu1 %vm2049_vm12, %v3974_v18 }
 0x5da   : > { %v4514_v20 = vpop.f32.mrb[12].mxu1 }
 0x5db   : > { %v4144_v12 = vadd.f32 %v4514_v20, %v6567_v49  ;;  %v4135_v19 = vpop.f32.mrb[13].mxu1 }
 0x5dc   : > { %v4136_v60 = vadd.f32 %v6567_v49, %v4135_v19  ;;  %v4515_v58 = vpop.f32.mrb[14].mxu1 }
 0x5dd   : > { %v4260_v7 = vadd.f32 %v4228_v13, %v4144_v12  ;;  %v4147_v40 = vadd.f32 %v4515_v58, %v6567_v49  ;;  %v4138_v11 = vpop.f32.mrb[15].mxu1  ;;  %v4244_v12 = vld [vmem:[%s4666_s24 + $0xf0] sm:$0xff] }
 0x5de   : > { %v4258_v10 = vadd.f32 %v4226_v37, %v4136_v60  ;;  %v4139_v44 = vadd.f32 %v6567_v49, %v4138_v11  ;;  %v4242_v60 = vld [vmem:[%s4666_s24 + $0xe0] sm:$0xff] }
 0x5df   : > { %4292 = vst.msk [vmem:[%s6580_s30 + $0x70] sm:$0xff] %vm226_vm0, %v4260_v7  ;;  %v4261_v42 = vadd.f32 %v4229_v39, %v4147_v40  ;;  %v4245_v7 = vld [vmem:[%s4666_s24 + $0xf8] sm:$0xff] }
 0x5e0   : > { %4290 = vst.msk [vmem:[%s6580_s30 + $0x60] sm:$0xff] %vm226_vm0, %v4258_v10  ;;  %v4259_v2 = vadd.f32 %v4227_v24, %v4139_v44  ;;  %v4243_v10 = vld [vmem:[%s4666_s24 + $0xe8] sm:$0xff] }
 0x5e1   : > { %4293 = vst.msk [vmem:[%s6580_s30 + $0x78] sm:$0xff] %vm226_vm0, %v4261_v42 }
 0x5e2   : > { %4291 = vst.msk [vmem:[%s6580_s30 + $0x68] sm:$0xff] %vm226_vm0, %v4259_v2 }
 0x606   : > { %v4518_v16 = vpop.f32.mrb[16].mxu1 }
 0x607   : > { %v4160_v22 = vadd.f32 %v4518_v16, %v6567_v49  ;;  %v4151_v25 = vpop.f32.mrb[17].mxu1 }
 0x608   : > { %v4152_v47 = vadd.f32 %v6567_v49, %v4151_v25  ;;  %v4519_v0 = vpop.f32.mrb[18].mxu1 }
 0x609   : > { %v4264_v33 = vadd.f32 %v4232_v1, %v4160_v22  ;;  %v4163_v36 = vadd.f32 %v4519_v0, %v6567_v49  ;;  %v4154_v6 = vpop.f32.mrb[19].mxu1 }
 0x60a   : > { %v4262_v27 = vadd.f32 %v4230_v29, %v4152_v47  ;;  %v4155_v28 = vadd.f32 %v6567_v49, %v4154_v6 }
 0x60b   : > { %4296 = vst.msk [vmem:[%s6580_s30 + $0x90] sm:$0xff] %vm226_vm0, %v4264_v33  ;;  %v4265_v57 = vadd.f32 %v4233_v5, %v4163_v36 }
 0x60c   : > { %4294 = vst.msk [vmem:[%s6580_s30 + $0x80] sm:$0xff] %vm226_vm0, %v4262_v27  ;;  %v4263_v46 = vadd.f32 %v4231_v26, %v4155_v28 }
 0x60d   : > { %4297 = vst.msk [vmem:[%s6580_s30 + $0x98] sm:$0xff] %vm226_vm0, %v4265_v57 }
 0x60e   : > { %4295 = vst.msk [vmem:[%s6580_s30 + $0x88] sm:$0xff] %vm226_vm0, %v4263_v46 }
 0x636   : > { %v4522_v41 = vpop.f32.mrb[20].mxu1 }
 0x637   : > { %v4176_v4 = vadd.f32 %v4522_v41, %v6567_v49  ;;  %v4167_v54 = vpop.f32.mrb[21].mxu1 }
 0x638   : > { %v4168_v35 = vadd.f32 %v6567_v49, %v4167_v54  ;;  %v4523_v56 = vpop.f32.mrb[22].mxu1 }
 0x639   : > { %v4268_v52 = vadd.f32 %v4236_v48, %v4176_v4  ;;  %v4179_v14 = vadd.f32 %v4523_v56, %v6567_v49  ;;  %v4170_v55 = vpop.f32.mrb[23].mxu1 }
 0x63a   : > { %v4266_v38 = vadd.f32 %v4234_v32, %v4168_v35  ;;  %v4171_v43 = vadd.f32 %v6567_v49, %v4170_v55 }
 0x63b   : > { %4300 = vst.msk [vmem:[%s6580_s30 + $0xb0] sm:$0xff] %vm226_vm0, %v4268_v52  ;;  %v4269_v50 = vadd.f32 %v4237_v15, %v4179_v14 }
 0x63c   : > { %4298 = vst.msk [vmem:[%s6580_s30 + $0xa0] sm:$0xff] %vm226_vm0, %v4266_v38  ;;  %v4267_v62 = vadd.f32 %v4235_v63, %v4171_v43 }
 0x63d   : > { %4301 = vst.msk [vmem:[%s6580_s30 + $0xb8] sm:$0xff] %vm226_vm0, %v4269_v50 }
 0x63e   : > { %4299 = vst.msk [vmem:[%s6580_s30 + $0xa8] sm:$0xff] %vm226_vm0, %v4267_v62 }
 0x666   : > { %v4526_v23 = vpop.f32.mrb[24].mxu1 }
 0x667   : > { %v4192_v31 = vadd.f32 %v4526_v23, %v6567_v49  ;;  %v4183_v51 = vpop.f32.mrb[25].mxu1 }
 0x668   : > { %v4184_v21 = vadd.f32 %v6567_v49, %v4183_v51  ;;  %v4527_v3 = vpop.f32.mrb[26].mxu1 }
 0x669   : > { %v4272_v17 = vadd.f32 %v4240_v30, %v4192_v31  ;;  %v4195_v59 = vadd.f32 %v4527_v3, %v6567_v49  ;;  %v4186_v53 = vpop.f32.mrb[27].mxu1 }
 0x66a   : > { %v4270_v9 = vadd.f32 %v4238_v34, %v4184_v21  ;;  %v4187_v61 = vadd.f32 %v6567_v49, %v4186_v53 }
 0x66b   : > { %4304 = vst.msk [vmem:[%s6580_s30 + $0xd0] sm:$0xff] %vm226_vm0, %v4272_v17  ;;  %v4273_v18 = vadd.f32 %v4241_v45, %v4195_v59 }
 0x66c   : > { %4302 = vst.msk [vmem:[%s6580_s30 + $0xc0] sm:$0xff] %vm226_vm0, %v4270_v9  ;;  %v4271_v20 = vadd.f32 %v4239_v8, %v4187_v61 }
 0x66d   : > { %4305 = vst.msk [vmem:[%s6580_s30 + $0xd8] sm:$0xff] %vm226_vm0, %v4273_v18 }
 0x66e   : > { %4303 = vst.msk [vmem:[%s6580_s30 + $0xc8] sm:$0xff] %vm226_vm0, %v4271_v20 }
 0x697   : > { %v4530_v13 = vpop.f32.mrb[28].mxu1 }
 0x698   : > { %v4208_v19 = vadd.f32 %v4530_v13, %v6567_v49  ;;  %v4199_v37 = vpop.f32.mrb[29].mxu1 }
 0x699   : > { %v4200_v58 = vadd.f32 %v6567_v49, %v4199_v37  ;;  %v4531_v39 = vpop.f32.mrb[30].mxu1 }
 0x69a   : > { %v4276_v40 = vadd.f32 %v4244_v12, %v4208_v19  ;;  %v4211_v11 = vadd.f32 %v4531_v39, %v6567_v49  ;;  %v4202_v24 = vpop.f32.mrb[31].mxu1 }
 0x69b   : > { %v4274_v44 = vadd.f32 %v4242_v60, %v4200_v58  ;;  %v4203_v42 = vadd.f32 %v6567_v49, %v4202_v24 }
 0x69c   : > { %4308 = vst.msk [vmem:[%s6580_s30 + $0xf0] sm:$0xff] %vm226_vm0, %v4276_v40  ;;  %v4277_v2 = vadd.f32 %v4245_v7, %v4211_v11 }
 0x69d   : > { %4306 = vst.msk [vmem:[%s6580_s30 + $0xe0] sm:$0xff] %vm226_vm0, %v4274_v44  ;;  %v4275_v16 = vadd.f32 %v4243_v10, %v4203_v42 }
 0x69e   : > { %4309 = vst.msk [vmem:[%s6580_s30 + $0xf8] sm:$0xff] %vm226_vm0, %v4277_v2 }
 0x69f   : > { %4307 = vst.msk [vmem:[%s6580_s30 + $0xe8] sm:$0xff] %vm226_vm0, %v4275_v16 }
 0x6a0 PF: > { %s15_s18 = sadd.s32 1, %s4563_s18  }
 0x6a1   : > { %p12_p4 = scmp.ge.s32.totalorder %s15_s18, 4  }
 0x6a3   :  { %14 = sbr.rel (!%p12_p4) target bundleno = 1 (0x1), region = 73 }

</bundles_post_ra>
